<compile_context>
chip_gen: v5e
topology: v5e:2x2
jax: 0.10.0
libtpu: 0.0.40
codegen_flags: <defaults>
</compile_context>

<pallas_src>
import numpy as np
import jax
import jax.numpy as jnp
from jax import lax
from jax.experimental import pallas as pl
from jax.experimental.pallas import tpu as pltpu

_EPS = 1e-5                      # nn.GroupNorm default eps
_INV_SQRT2 = 0.7071067811865476
_LANES = 128


def _round_up(x, m):
    return ((x + m - 1) // m) * m


def _gelu(x):
    # exact (erf-based) GELU, matching torch.nn.GELU() default
    return 0.5 * x * (1.0 + lax.erf(x * _INV_SQRT2))


# ------------------------------ fused kernel ------------------------------

def _make_downsample_kernel(Ho, Wo, Cp, cin, cout):
    S = Ho * Wo
    inv_cnt_in = 1.0 / float(S * cin)      # GroupNorm(1) element counts (real channels)
    inv_cnt_out = 1.0 / float(S * cout)

    def kernel(x_ref, w1, w2, w3, w4,
               g1, b1, g2, b2, g3, b3, g4, b4,
               emb_ref, o_ref, pad_ref):
        # channel masks: GroupNorm variance only over the real (unpadded) channels
        lane = lax.broadcasted_iota(jnp.int32, (1, Cp), 1)
        mask_in = (lane < cin).astype(jnp.float32)
        mask_out = (lane < cout).astype(jnp.float32)

        # zero the halo-padded scratch once; only the interior is rewritten per conv,
        # so the 1-pixel zero border is reused by all four convs.
        pad_ref[...] = jnp.zeros_like(pad_ref)

        # ---- fused 2x2 max-pool, entirely in VMEM ---------------------------
        # x block layout: (Ho, 2, Wo, 2*Cp); dim-1 is the window row and the lane dim
        # holds [left-col | right-col] of the window (a free row-major reshape in XLA).
        x5 = x_ref[0]                                          # (Ho, 2, Wo, 2*Cp) bf16
        xa = jnp.maximum(x5[:, 0], x5[:, 1])                   # (Ho, Wo, 2*Cp)
        xp3 = jnp.maximum(xa[:, :, :Cp], xa[:, :, Cp:])        # (Ho, Wo, Cp)
        xp = xp3.astype(jnp.float32).reshape(S, Cp)            # pooled activation, f32

        # ---- 3x3 conv (pad=1, no bias) as 9 shifted dot-accumulates ---------
        def conv3x3(h_f32, w_ref):
            pad_ref[1:Ho + 1, 1:Wo + 1, :] = h_f32.reshape(Ho, Wo, Cp)
            acc = jnp.zeros((S, Cp), jnp.float32)
            for dh in range(3):
                for dw in range(3):
                    patch = (pad_ref[dh:dh + Ho, dw:dw + Wo, :]
                             .reshape(S, Cp).astype(jnp.bfloat16))
                    acc = acc + jnp.dot(patch, w_ref[dh * 3 + dw],
                                        preferred_element_type=jnp.float32)
            return acc

        def gnorm(y, g_ref, b_ref, mask, inv_cnt):
            # GroupNorm(num_groups=1): stats over the whole (S, C_real) sample.
            # Padded lanes of y are exactly 0, so sum(y) == sum over real lanes.
            mu = jnp.sum(y, keepdims=True) * inv_cnt
            d = y - mu
            var = jnp.sum((d * mask) ** 2, keepdims=True) * inv_cnt
            return d * lax.rsqrt(var + _EPS) * g_ref[...] + b_ref[...]

        # DoubleConv(cin, cin, residual=True):  GELU(x + GN(conv(GELU(GN(conv(x))))))
        h = _gelu(gnorm(conv3x3(xp, w1), g1, b1, mask_in, inv_cnt_in))
        h = _gelu(xp + gnorm(conv3x3(h, w2), g2, b2, mask_in, inv_cnt_in))
        # DoubleConv(cin, cout):  GN(conv(GELU(GN(conv(h)))))
        h = _gelu(gnorm(conv3x3(h, w3), g3, b3, mask_out, inv_cnt_out))
        y = gnorm(conv3x3(h, w4), g4, b4, mask_out, inv_cnt_out)
        # + time embedding (precomputed per sample), broadcast over spatial rows
        o_ref[0] = y + emb_ref[0]

    return kernel


# ------------------------------ parameters ------------------------------

def init_params(key, cin, cout, emb_dim=256):
    ks = jax.random.split(key, 14)

    def conv_w(k, co, ci):
        return jax.random.normal(k, (co, ci, 3, 3), jnp.float32) / jnp.sqrt(9.0 * ci)

    def gn(kg, kb, c):
        return (1.0 + 0.1 * jax.random.normal(kg, (c,), jnp.float32),
                0.1 * jax.random.normal(kb, (c,), jnp.float32))

    g1, b1 = gn(ks[1], ks[2], cin)
    g2, b2 = gn(ks[4], ks[5], cin)
    g3, b3 = gn(ks[7], ks[8], cout)
    g4, b4 = gn(ks[10], ks[11], cout)
    return {
        "w1": conv_w(ks[0], cin, cin),   "g1": g1, "b1": b1,
        "w2": conv_w(ks[3], cin, cin),   "g2": g2, "b2": b2,
        "w3": conv_w(ks[6], cout, cin),  "g3": g3, "b3": b3,
        "w4": conv_w(ks[9], cout, cout), "g4": g4, "b4": b4,
        "lin_w": jax.random.normal(ks[12], (cout, emb_dim), jnp.float32) / jnp.sqrt(emb_dim),
        "lin_b": 0.1 * jax.random.normal(ks[13], (cout,), jnp.float32),
    }


def prepare_params(params):
    """Repack PyTorch-layout parameters for the kernel (run ONCE per parameter set,
    hoisted out of the jitted forward)."""
    cin = params["w1"].shape[0]
    cout = params["w3"].shape[0]
    cp = _round_up(max(cin, cout), _LANES)

    def wtap(w):   # OIHW (Co, Ci, 3, 3) -> (9, Cp, Cp) bf16 tap matrices, zero-padded
        co, ci = w.shape[0], w.shape[1]
        w = jnp.transpose(w, (2, 3, 1, 0)).reshape(9, ci, co)
        w = jnp.pad(w, ((0, 0), (0, cp - ci), (0, cp - co)))
        return w.astype(jnp.bfloat16)

    def vec(v):    # (C,) -> zero-padded (1, Cp) f32
        return jnp.pad(v, (0, cp - v.shape[0])).reshape(1, cp).astype(jnp.float32)

    kp = {}
    for i in (1, 2, 3, 4):
        kp[f"w{i}"] = wtap(params[f"w{i}"])
        kp[f"g{i}"] = vec(params[f"g{i}"])
        kp[f"b{i}"] = vec(params[f"b{i}"])
    kp["lin_w"] = params["lin_w"]      # (Cout, E) -- used by the XLA-side emb linear
    kp["lin_b"] = params["lin_b"]      # (Cout,)
    return kp


# ------------------------------ forward ------------------------------

@jax.jit
def downsample_forward(x_nchw, t, kp):
    N, cin, H, W = x_nchw.shape
    Ho, Wo = H // 2, W // 2
    S = Ho * Wo
    Cp = kp["w1"].shape[-1]
    cout = kp["lin_w"].shape[0]

    # --- XLA glue: layout only (transpose, zero-pad channels, free reshapes) ---
    x = jnp.transpose(x_nchw, (0, 2, 3, 1))                        # NHWC
    x = jnp.pad(x, ((0, 0), (0, 0), (0, 0), (0, Cp - cin)))        # lane-pad channels
    x = x.astype(jnp.bfloat16).reshape(N, Ho, 2, Wo, 2 * Cp)       # free row-major reshape

    # time embedding: one tiny (N,E)x(E,Cout) matmul per batch, outside the conv kernel
    emb = (jnp.dot(jax.nn.silu(t), kp["lin_w"].T,
                   precision=lax.Precision.HIGHEST) + kp["lin_b"])
    emb = jnp.pad(emb, ((0, 0), (0, Cp - cout))).astype(jnp.float32).reshape(N, 1, Cp)

    kernel = _make_downsample_kernel(Ho, Wo, Cp, cin, cout)
    vspec = lambda n: (0, 0)         # broadcast (1, Cp) gamma/beta
    wspec = lambda n: (0, 0, 0)      # broadcast (9, Cp, Cp) weights

    out = pl.pallas_call(
        kernel,
        out_shape=jax.ShapeDtypeStruct((N, S, Cp), jnp.float32),
        grid=(N,),
        in_specs=[
            pl.BlockSpec((1, Ho, 2, Wo, 2 * Cp), lambda n: (n, 0, 0, 0, 0)),
            pl.BlockSpec((9, Cp, Cp), wspec), pl.BlockSpec((9, Cp, Cp), wspec),
            pl.BlockSpec((9, Cp, Cp), wspec), pl.BlockSpec((9, Cp, Cp), wspec),
            pl.BlockSpec((1, Cp), vspec), pl.BlockSpec((1, Cp), vspec),
            pl.BlockSpec((1, Cp), vspec), pl.BlockSpec((1, Cp), vspec),
            pl.BlockSpec((1, Cp), vspec), pl.BlockSpec((1, Cp), vspec),
            pl.BlockSpec((1, Cp), vspec), pl.BlockSpec((1, Cp), vspec),
            pl.BlockSpec((1, 1, Cp), lambda n: (n, 0, 0)),
        ],
        out_specs=pl.BlockSpec((1, S, Cp), lambda n: (n, 0, 0)),
        scratch_shapes=[pltpu.VMEM((Ho + 2, Wo + 2, Cp), jnp.float32)],
        compiler_params=pltpu.CompilerParams(
            dimension_semantics=("parallel",),
            vmem_limit_bytes=32 * 1024 * 1024),
    )(x, kp["w1"], kp["w2"], kp["w3"], kp["w4"],
      kp["g1"], kp["b1"], kp["g2"], kp["b2"],
      kp["g3"], kp["b3"], kp["g4"], kp["b4"], emb)

    out = out[:, :, :cout].reshape(N, Ho, Wo, cout)
    return jnp.transpose(out, (0, 3, 1, 2))                        # NCHW


# ------------------------------ pure-JAX reference ------------------------------

def _ref_forward(x, t, p):
    hi = lax.Precision.HIGHEST

    def conv(x, w):
        return lax.conv_general_dilated(x, w, (1, 1), ((1, 1), (1, 1)),
                                        dimension_numbers=("NCHW", "OIHW", "NCHW"),
                                        precision=hi)

    def gn(x, g, b):
        mu = x.mean(axis=(1, 2, 3), keepdims=True)
        var = ((x - mu) ** 2).mean(axis=(1, 2, 3), keepdims=True)
        return ((x - mu) * lax.rsqrt(var + _EPS)
                * g[None, :, None, None] + b[None, :, None, None])

    gelu = lambda v: 0.5 * v * (1.0 + lax.erf(v * _INV_SQRT2))

    N, C, H, W = x.shape
    xp = x.reshape(N, C, H // 2, 2, W // 2, 2).max(axis=(3, 5))
    h = gelu(gn(conv(xp, p["w1"]), p["g1"], p["b1"]))
    h = gelu(xp + gn(conv(h, p["w2"]), p["g2"], p["b2"]))
    h = gelu(gn(conv(h, p["w3"]), p["g3"], p["b3"]))
    h = gn(conv(h, p["w4"]), p["g4"], p["b4"])
    emb = jnp.dot(jax.nn.silu(t), p["lin_w"].T, precision=hi) + p["lin_b"]
    return h + emb[:, :, None, None]


if __name__ == "__main__":
    key = jax.random.PRNGKey(0)
    kx, kt, kparam = jax.random.split(key, 3)

    N, Cin, Cout, H, W, E = 2, 4, 8, 16, 16, 256
    x = jax.random.normal(kx, (N, Cin, H, W), jnp.float32)
    t = jax.random.normal(kt, (N, E), jnp.float32)
    params = init_params(kparam, Cin, Cout, E)

    kp = prepare_params(params)                 # hoisted out of the jitted forward
    out = jax.block_until_ready(downsample_forward(x, t, kp))

    assert out.shape == (N, Cout, H // 2, W // 2)
    ref = _ref_forward(x, t, params)
    # bf16 MXU operands with f32 accumulation -> compare against the f32 reference
    # with a bf16-appropriate tolerance.
    np.testing.assert_allclose(np.asarray(out), np.asarray(ref), rtol=2e-2, atol=2e-2)

    print("KERNEL_OK")
</pallas_src>

<mosaic_0001>
module attributes {stable_mosaic.version = 11 : i64} {
  func.func @kernel(%arg0: i32, %arg1: memref<1x8x2x8x256xbf16, #tpu.memory_space<vmem>>, %arg2: memref<9x128x128xbf16, #tpu.memory_space<vmem>>, %arg3: memref<9x128x128xbf16, #tpu.memory_space<vmem>>, %arg4: memref<9x128x128xbf16, #tpu.memory_space<vmem>>, %arg5: memref<9x128x128xbf16, #tpu.memory_space<vmem>>, %arg6: memref<1x128xf32, #tpu.memory_space<vmem>>, %arg7: memref<1x128xf32, #tpu.memory_space<vmem>>, %arg8: memref<1x128xf32, #tpu.memory_space<vmem>>, %arg9: memref<1x128xf32, #tpu.memory_space<vmem>>, %arg10: memref<1x128xf32, #tpu.memory_space<vmem>>, %arg11: memref<1x128xf32, #tpu.memory_space<vmem>>, %arg12: memref<1x128xf32, #tpu.memory_space<vmem>>, %arg13: memref<1x128xf32, #tpu.memory_space<vmem>>, %arg14: memref<1x1x128xf32, #tpu.memory_space<vmem>>, %arg15: memref<1x64x128xf32, #tpu.memory_space<vmem>>, %arg16: memref<10x10x128xf32, #tpu.memory_space<vmem>>) attributes {dimension_semantics = [#tpu.dimension_semantics<parallel>], iteration_bounds = array<i64: 2>, scalar_prefetch = 0 : i64, scratch_operands = 1 : i64, tpu.core_type = #tpu.core_type<tc>, window_params = [{transform_indices = @transform_0, window_bounds = array<i64: 1, 8, 2, 8, 256>}, {pipeline_mode = #tpu.pipeline_mode<synchronous>, transform_indices = @transform_1, window_bounds = array<i64: 9, 128, 128>}, {pipeline_mode = #tpu.pipeline_mode<synchronous>, transform_indices = @transform_2, window_bounds = array<i64: 9, 128, 128>}, {pipeline_mode = #tpu.pipeline_mode<synchronous>, transform_indices = @transform_3, window_bounds = array<i64: 9, 128, 128>}, {pipeline_mode = #tpu.pipeline_mode<synchronous>, transform_indices = @transform_4, window_bounds = array<i64: 9, 128, 128>}, {pipeline_mode = #tpu.pipeline_mode<synchronous>, transform_indices = @transform_5, window_bounds = array<i64: 1, 128>}, {pipeline_mode = #tpu.pipeline_mode<synchronous>, transform_indices = @transform_6, window_bounds = array<i64: 1, 128>}, {pipeline_mode = #tpu.pipeline_mode<synchronous>, transform_indices = @transform_7, window_bounds = array<i64: 1, 128>}, {pipeline_mode = #tpu.pipeline_mode<synchronous>, transform_indices = @transform_8, window_bounds = array<i64: 1, 128>}, {pipeline_mode = #tpu.pipeline_mode<synchronous>, transform_indices = @transform_9, window_bounds = array<i64: 1, 128>}, {pipeline_mode = #tpu.pipeline_mode<synchronous>, transform_indices = @transform_10, window_bounds = array<i64: 1, 128>}, {pipeline_mode = #tpu.pipeline_mode<synchronous>, transform_indices = @transform_11, window_bounds = array<i64: 1, 128>}, {pipeline_mode = #tpu.pipeline_mode<synchronous>, transform_indices = @transform_12, window_bounds = array<i64: 1, 128>}, {transform_indices = @transform_13, window_bounds = array<i64: 1, 1, 128>}, {transform_indices = @transform_14, window_bounds = array<i64: 1, 64, 128>}]} {
    %0 = tpu.iota {dimensions = array<i32: 1>} : vector<1x128xi32>
    %c4_i32 = arith.constant 4 : i32
    %1 = vector.broadcast %c4_i32 : i32 to vector<1x128xi32>
    %2 = arith.cmpi slt, %0, %1 : vector<1x128xi32>
    %3 = arith.extui %2 : vector<1x128xi1> to vector<1x128xi32>
    %4 = arith.sitofp %3 : vector<1x128xi32> to vector<1x128xf32>
    %c8_i32 = arith.constant 8 : i32
    %5 = vector.broadcast %c8_i32 : i32 to vector<1x128xi32>
    %6 = arith.cmpi slt, %0, %5 : vector<1x128xi32>
    %7 = arith.extui %6 : vector<1x128xi1> to vector<1x128xi32>
    %8 = arith.sitofp %7 : vector<1x128xi32> to vector<1x128xf32>
    %cst = arith.constant 0.000000e+00 : f32
    %9 = vector.broadcast %cst : f32 to vector<10x10x128xf32>
    %c0 = arith.constant 0 : index
    %c0_0 = arith.constant 0 : index
    %c0_1 = arith.constant 0 : index
    %10 = vector.load %arg16[%c0, %c0_0, %c0_1] : memref<10x10x128xf32, #tpu.memory_space<vmem>>, vector<10x10x128xf32>
    tpu.vector_store %arg16[%c0, %c0_0, %c0_1], %9 {strides = array<i32>} : memref<10x10x128xf32, #tpu.memory_space<vmem>>, vector<10x10x128xf32>,
    %c0_2 = arith.constant 0 : index
    %c0_3 = arith.constant 0 : index
    %c0_4 = arith.constant 0 : index
    %c0_5 = arith.constant 0 : index
    %c0_6 = arith.constant 0 : index
    %11 = vector.load %arg1[%c0_2, %c0_3, %c0_4, %c0_5, %c0_6] : memref<1x8x2x8x256xbf16, #tpu.memory_space<vmem>>, vector<1x8x2x8x256xbf16>
    %12 = vector.shape_cast %11 : vector<1x8x2x8x256xbf16> to vector<8x2x8x256xbf16>
    %13 = vector.extract_strided_slice %12 {offsets = [0, 0, 0, 0], sizes = [8, 1, 8, 256], strides = [1, 1, 1, 1]} : vector<8x2x8x256xbf16> to vector<8x1x8x256xbf16>
    %14 = vector.shape_cast %13 : vector<8x1x8x256xbf16> to vector<8x8x256xbf16>
    %15 = vector.extract_strided_slice %12 {offsets = [0, 1, 0, 0], sizes = [8, 1, 8, 256], strides = [1, 1, 1, 1]} : vector<8x2x8x256xbf16> to vector<8x1x8x256xbf16>
    %16 = vector.shape_cast %15 : vector<8x1x8x256xbf16> to vector<8x8x256xbf16>
    %17 = arith.maximumf %14, %16 : vector<8x8x256xbf16>
    %18 = vector.extract_strided_slice %17 {offsets = [0, 0, 0], sizes = [8, 8, 128], strides = [1, 1, 1]} : vector<8x8x256xbf16> to vector<8x8x128xbf16>
    %19 = vector.extract_strided_slice %17 {offsets = [0, 0, 128], sizes = [8, 8, 128], strides = [1, 1, 1]} : vector<8x8x256xbf16> to vector<8x8x128xbf16>
    %20 = arith.maximumf %18, %19 : vector<8x8x128xbf16>
    %21 = arith.extf %20 : vector<8x8x128xbf16> to vector<8x8x128xf32>
    %22 = vector.shape_cast %21 : vector<8x8x128xf32> to vector<64x128xf32>
    %23 = vector.shape_cast %22 : vector<64x128xf32> to vector<8x8x128xf32>
    %c1 = arith.constant 1 : index
    %c1_7 = arith.constant 1 : index
    %c0_8 = arith.constant 0 : index
    %24 = vector.load %arg16[%c1, %c1_7, %c0_8] : memref<10x10x128xf32, #tpu.memory_space<vmem>>, vector<8x8x128xf32>
    tpu.vector_store %arg16[%c1, %c1_7, %c0_8], %23 {strides = array<i32>} : memref<10x10x128xf32, #tpu.memory_space<vmem>>, vector<8x8x128xf32>,
    %cst_9 = arith.constant 0.000000e+00 : f32
    %25 = vector.broadcast %cst_9 : f32 to vector<64x128xf32>
    %c0_10 = arith.constant 0 : index
    %c0_11 = arith.constant 0 : index
    %c0_12 = arith.constant 0 : index
    %26 = vector.load %arg16[%c0_10, %c0_11, %c0_12] : memref<10x10x128xf32, #tpu.memory_space<vmem>>, vector<8x8x128xf32>
    %27 = vector.shape_cast %26 : vector<8x8x128xf32> to vector<64x128xf32>
    %28 = arith.truncf %27 : vector<64x128xf32> to vector<64x128xbf16>
    %c0_13 = arith.constant 0 : index
    %c0_14 = arith.constant 0 : index
    %c0_15 = arith.constant 0 : index
    %29 = vector.load %arg2[%c0_13, %c0_14, %c0_15] : memref<9x128x128xbf16, #tpu.memory_space<vmem>>, vector<1x128x128xbf16>
    %30 = vector.shape_cast %29 : vector<1x128x128xbf16> to vector<128x128xbf16>
    %cst_16 = arith.constant dense<0.000000e+00> : vector<64x128xf32>
    %31 = tpu.matmul %28, %30, %cst_16 {dimension_numbers = #tpu.dot_dimension_numbers<[1], [0], [0], [1], [0, 0, 1, 1], [], []>} : vector<64x128xbf16>, vector<128x128xbf16>, vector<64x128xf32> -> vector<64x128xf32>
    %32 = arith.addf %25, %31 : vector<64x128xf32>
    %c0_17 = arith.constant 0 : index
    %c1_18 = arith.constant 1 : index
    %c0_19 = arith.constant 0 : index
    %33 = vector.load %arg16[%c0_17, %c1_18, %c0_19] : memref<10x10x128xf32, #tpu.memory_space<vmem>>, vector<8x8x128xf32>
    %34 = vector.shape_cast %33 : vector<8x8x128xf32> to vector<64x128xf32>
    %35 = arith.truncf %34 : vector<64x128xf32> to vector<64x128xbf16>
    %c1_20 = arith.constant 1 : index
    %c0_21 = arith.constant 0 : index
    %c0_22 = arith.constant 0 : index
    %36 = vector.load %arg2[%c1_20, %c0_21, %c0_22] : memref<9x128x128xbf16, #tpu.memory_space<vmem>>, vector<1x128x128xbf16>
    %37 = vector.shape_cast %36 : vector<1x128x128xbf16> to vector<128x128xbf16>
    %cst_23 = arith.constant dense<0.000000e+00> : vector<64x128xf32>
    %38 = tpu.matmul %35, %37, %cst_23 {dimension_numbers = #tpu.dot_dimension_numbers<[1], [0], [0], [1], [0, 0, 1, 1], [], []>} : vector<64x128xbf16>, vector<128x128xbf16>, vector<64x128xf32> -> vector<64x128xf32>
    %39 = arith.addf %32, %38 : vector<64x128xf32>
    %c0_24 = arith.constant 0 : index
    %c2 = arith.constant 2 : index
    %c0_25 = arith.constant 0 : index
    %40 = vector.load %arg16[%c0_24, %c2, %c0_25] : memref<10x10x128xf32, #tpu.memory_space<vmem>>, vector<8x8x128xf32>
    %41 = vector.shape_cast %40 : vector<8x8x128xf32> to vector<64x128xf32>
    %42 = arith.truncf %41 : vector<64x128xf32> to vector<64x128xbf16>
    %c2_26 = arith.constant 2 : index
    %c0_27 = arith.constant 0 : index
    %c0_28 = arith.constant 0 : index
    %43 = vector.load %arg2[%c2_26, %c0_27, %c0_28] : memref<9x128x128xbf16, #tpu.memory_space<vmem>>, vector<1x128x128xbf16>
    %44 = vector.shape_cast %43 : vector<1x128x128xbf16> to vector<128x128xbf16>
    %cst_29 = arith.constant dense<0.000000e+00> : vector<64x128xf32>
    %45 = tpu.matmul %42, %44, %cst_29 {dimension_numbers = #tpu.dot_dimension_numbers<[1], [0], [0], [1], [0, 0, 1, 1], [], []>} : vector<64x128xbf16>, vector<128x128xbf16>, vector<64x128xf32> -> vector<64x128xf32>
    %46 = arith.addf %39, %45 : vector<64x128xf32>
    %c1_30 = arith.constant 1 : index
    %c0_31 = arith.constant 0 : index
    %c0_32 = arith.constant 0 : index
    %47 = vector.load %arg16[%c1_30, %c0_31, %c0_32] : memref<10x10x128xf32, #tpu.memory_space<vmem>>, vector<8x8x128xf32>
    %48 = vector.shape_cast %47 : vector<8x8x128xf32> to vector<64x128xf32>
    %49 = arith.truncf %48 : vector<64x128xf32> to vector<64x128xbf16>
    %c3 = arith.constant 3 : index
    %c0_33 = arith.constant 0 : index
    %c0_34 = arith.constant 0 : index
    %50 = vector.load %arg2[%c3, %c0_33, %c0_34] : memref<9x128x128xbf16, #tpu.memory_space<vmem>>, vector<1x128x128xbf16>
    %51 = vector.shape_cast %50 : vector<1x128x128xbf16> to vector<128x128xbf16>
    %cst_35 = arith.constant dense<0.000000e+00> : vector<64x128xf32>
    %52 = tpu.matmul %49, %51, %cst_35 {dimension_numbers = #tpu.dot_dimension_numbers<[1], [0], [0], [1], [0, 0, 1, 1], [], []>} : vector<64x128xbf16>, vector<128x128xbf16>, vector<64x128xf32> -> vector<64x128xf32>
    %53 = arith.addf %46, %52 : vector<64x128xf32>
    %c1_36 = arith.constant 1 : index
    %c1_37 = arith.constant 1 : index
    %c0_38 = arith.constant 0 : index
    %54 = vector.load %arg16[%c1_36, %c1_37, %c0_38] : memref<10x10x128xf32, #tpu.memory_space<vmem>>, vector<8x8x128xf32>
    %55 = vector.shape_cast %54 : vector<8x8x128xf32> to vector<64x128xf32>
    %56 = arith.truncf %55 : vector<64x128xf32> to vector<64x128xbf16>
    %c4 = arith.constant 4 : index
    %c0_39 = arith.constant 0 : index
    %c0_40 = arith.constant 0 : index
    %57 = vector.load %arg2[%c4, %c0_39, %c0_40] : memref<9x128x128xbf16, #tpu.memory_space<vmem>>, vector<1x128x128xbf16>
    %58 = vector.shape_cast %57 : vector<1x128x128xbf16> to vector<128x128xbf16>
    %cst_41 = arith.constant dense<0.000000e+00> : vector<64x128xf32>
    %59 = tpu.matmul %56, %58, %cst_41 {dimension_numbers = #tpu.dot_dimension_numbers<[1], [0], [0], [1], [0, 0, 1, 1], [], []>} : vector<64x128xbf16>, vector<128x128xbf16>, vector<64x128xf32> -> vector<64x128xf32>
    %60 = arith.addf %53, %59 : vector<64x128xf32>
    %c1_42 = arith.constant 1 : index
    %c2_43 = arith.constant 2 : index
    %c0_44 = arith.constant 0 : index
    %61 = vector.load %arg16[%c1_42, %c2_43, %c0_44] : memref<10x10x128xf32, #tpu.memory_space<vmem>>, vector<8x8x128xf32>
    %62 = vector.shape_cast %61 : vector<8x8x128xf32> to vector<64x128xf32>
    %63 = arith.truncf %62 : vector<64x128xf32> to vector<64x128xbf16>
    %c5 = arith.constant 5 : index
    %c0_45 = arith.constant 0 : index
    %c0_46 = arith.constant 0 : index
    %64 = vector.load %arg2[%c5, %c0_45, %c0_46] : memref<9x128x128xbf16, #tpu.memory_space<vmem>>, vector<1x128x128xbf16>
    %65 = vector.shape_cast %64 : vector<1x128x128xbf16> to vector<128x128xbf16>
    %cst_47 = arith.constant dense<0.000000e+00> : vector<64x128xf32>
    %66 = tpu.matmul %63, %65, %cst_47 {dimension_numbers = #tpu.dot_dimension_numbers<[1], [0], [0], [1], [0, 0, 1, 1], [], []>} : vector<64x128xbf16>, vector<128x128xbf16>, vector<64x128xf32> -> vector<64x128xf32>
    %67 = arith.addf %60, %66 : vector<64x128xf32>
    %c2_48 = arith.constant 2 : index
    %c0_49 = arith.constant 0 : index
    %c0_50 = arith.constant 0 : index
    %68 = vector.load %arg16[%c2_48, %c0_49, %c0_50] : memref<10x10x128xf32, #tpu.memory_space<vmem>>, vector<8x8x128xf32>
    %69 = vector.shape_cast %68 : vector<8x8x128xf32> to vector<64x128xf32>
    %70 = arith.truncf %69 : vector<64x128xf32> to vector<64x128xbf16>
    %c6 = arith.constant 6 : index
    %c0_51 = arith.constant 0 : index
    %c0_52 = arith.constant 0 : index
    %71 = vector.load %arg2[%c6, %c0_51, %c0_52] : memref<9x128x128xbf16, #tpu.memory_space<vmem>>, vector<1x128x128xbf16>
    %72 = vector.shape_cast %71 : vector<1x128x128xbf16> to vector<128x128xbf16>
    %cst_53 = arith.constant dense<0.000000e+00> : vector<64x128xf32>
    %73 = tpu.matmul %70, %72, %cst_53 {dimension_numbers = #tpu.dot_dimension_numbers<[1], [0], [0], [1], [0, 0, 1, 1], [], []>} : vector<64x128xbf16>, vector<128x128xbf16>, vector<64x128xf32> -> vector<64x128xf32>
    %74 = arith.addf %67, %73 : vector<64x128xf32>
    %c2_54 = arith.constant 2 : index
    %c1_55 = arith.constant 1 : index
    %c0_56 = arith.constant 0 : index
    %75 = vector.load %arg16[%c2_54, %c1_55, %c0_56] : memref<10x10x128xf32, #tpu.memory_space<vmem>>, vector<8x8x128xf32>
    %76 = vector.shape_cast %75 : vector<8x8x128xf32> to vector<64x128xf32>
    %77 = arith.truncf %76 : vector<64x128xf32> to vector<64x128xbf16>
    %c7 = arith.constant 7 : index
    %c0_57 = arith.constant 0 : index
    %c0_58 = arith.constant 0 : index
    %78 = vector.load %arg2[%c7, %c0_57, %c0_58] : memref<9x128x128xbf16, #tpu.memory_space<vmem>>, vector<1x128x128xbf16>
    %79 = vector.shape_cast %78 : vector<1x128x128xbf16> to vector<128x128xbf16>
    %cst_59 = arith.constant dense<0.000000e+00> : vector<64x128xf32>
    %80 = tpu.matmul %77, %79, %cst_59 {dimension_numbers = #tpu.dot_dimension_numbers<[1], [0], [0], [1], [0, 0, 1, 1], [], []>} : vector<64x128xbf16>, vector<128x128xbf16>, vector<64x128xf32> -> vector<64x128xf32>
    %81 = arith.addf %74, %80 : vector<64x128xf32>
    %c2_60 = arith.constant 2 : index
    %c2_61 = arith.constant 2 : index
    %c0_62 = arith.constant 0 : index
    %82 = vector.load %arg16[%c2_60, %c2_61, %c0_62] : memref<10x10x128xf32, #tpu.memory_space<vmem>>, vector<8x8x128xf32>
    %83 = vector.shape_cast %82 : vector<8x8x128xf32> to vector<64x128xf32>
    %84 = arith.truncf %83 : vector<64x128xf32> to vector<64x128xbf16>
    %c8 = arith.constant 8 : index
    %c0_63 = arith.constant 0 : index
    %c0_64 = arith.constant 0 : index
    %85 = vector.load %arg2[%c8, %c0_63, %c0_64] : memref<9x128x128xbf16, #tpu.memory_space<vmem>>, vector<1x128x128xbf16>
    %86 = vector.shape_cast %85 : vector<1x128x128xbf16> to vector<128x128xbf16>
    %cst_65 = arith.constant dense<0.000000e+00> : vector<64x128xf32>
    %87 = tpu.matmul %84, %86, %cst_65 {dimension_numbers = #tpu.dot_dimension_numbers<[1], [0], [0], [1], [0, 0, 1, 1], [], []>} : vector<64x128xbf16>, vector<128x128xbf16>, vector<64x128xf32> -> vector<64x128xf32>
    %88 = arith.addf %81, %87 : vector<64x128xf32>
    %89 = vector.shape_cast %88 : vector<64x128xf32> to vector<1x64x128xf32>
    %cst_66 = arith.constant dense<0.000000e+00> : vector<1xf32>
    %90 = vector.multi_reduction <add>, %89, %cst_66 [1, 2] : vector<1x64x128xf32> to vector<1xf32>
    %91 = vector.shape_cast %90 : vector<1xf32> to vector<1x1x1xf32>
    %92 = vector.extract %91[0, 0, 0] : f32 from vector<1x1x1xf32>
    %93 = vector.broadcast %92 : f32 to vector<1x1xf32>
    %cst_67 = arith.constant 3.906250e-03 : f32
    %94 = vector.broadcast %cst_67 : f32 to vector<1x1xf32>
    %95 = arith.mulf %93, %94 : vector<1x1xf32>
    %96 = vector.broadcast %95 : vector<1x1xf32> to vector<64x128xf32>
    %97 = arith.subf %88, %96 : vector<64x128xf32>
    %98 = vector.broadcast %4 : vector<1x128xf32> to vector<64x128xf32>
    %99 = arith.mulf %97, %98 : vector<64x128xf32>
    %100 = arith.mulf %99, %99 : vector<64x128xf32>
    %101 = vector.shape_cast %100 : vector<64x128xf32> to vector<1x64x128xf32>
    %cst_68 = arith.constant dense<0.000000e+00> : vector<1xf32>
    %102 = vector.multi_reduction <add>, %101, %cst_68 [1, 2] : vector<1x64x128xf32> to vector<1xf32>
    %103 = vector.shape_cast %102 : vector<1xf32> to vector<1x1x1xf32>
    %104 = vector.extract %103[0, 0, 0] : f32 from vector<1x1x1xf32>
    %105 = vector.broadcast %104 : f32 to vector<1x1xf32>
    %cst_69 = arith.constant 3.906250e-03 : f32
    %106 = vector.broadcast %cst_69 : f32 to vector<1x1xf32>
    %107 = arith.mulf %105, %106 : vector<1x1xf32>
    %cst_70 = arith.constant 9.99999974E-6 : f32
    %108 = vector.broadcast %cst_70 : f32 to vector<1x1xf32>
    %109 = arith.addf %107, %108 : vector<1x1xf32>
    %110 = math.rsqrt %109 : vector<1x1xf32>
    %111 = vector.broadcast %110 : vector<1x1xf32> to vector<64x128xf32>
    %112 = arith.mulf %97, %111 : vector<64x128xf32>
    %c0_71 = arith.constant 0 : index
    %c0_72 = arith.constant 0 : index
    %113 = vector.load %arg6[%c0_71, %c0_72] : memref<1x128xf32, #tpu.memory_space<vmem>>, vector<1x128xf32>
    %114 = vector.broadcast %113 : vector<1x128xf32> to vector<64x128xf32>
    %115 = arith.mulf %112, %114 : vector<64x128xf32>
    %c0_73 = arith.constant 0 : index
    %c0_74 = arith.constant 0 : index
    %116 = vector.load %arg7[%c0_73, %c0_74] : memref<1x128xf32, #tpu.memory_space<vmem>>, vector<1x128xf32>
    %117 = vector.broadcast %116 : vector<1x128xf32> to vector<64x128xf32>
    %118 = arith.addf %115, %117 : vector<64x128xf32>
    %cst_75 = arith.constant 5.000000e-01 : f32
    %119 = vector.broadcast %cst_75 : f32 to vector<64x128xf32>
    %120 = arith.mulf %119, %118 : vector<64x128xf32>
    %cst_76 = arith.constant 0.707106769 : f32
    %121 = vector.broadcast %cst_76 : f32 to vector<64x128xf32>
    %122 = arith.mulf %118, %121 : vector<64x128xf32>
    %123 = math.erf %122 : vector<64x128xf32>
    %cst_77 = arith.constant 1.000000e+00 : f32
    %124 = vector.broadcast %cst_77 : f32 to vector<64x128xf32>
    %125 = arith.addf %124, %123 : vector<64x128xf32>
    %126 = arith.mulf %120, %125 : vector<64x128xf32>
    %127 = vector.shape_cast %126 : vector<64x128xf32> to vector<8x8x128xf32>
    %c1_78 = arith.constant 1 : index
    %c1_79 = arith.constant 1 : index
    %c0_80 = arith.constant 0 : index
    %128 = vector.load %arg16[%c1_78, %c1_79, %c0_80] : memref<10x10x128xf32, #tpu.memory_space<vmem>>, vector<8x8x128xf32>
    tpu.vector_store %arg16[%c1_78, %c1_79, %c0_80], %127 {strides = array<i32>} : memref<10x10x128xf32, #tpu.memory_space<vmem>>, vector<8x8x128xf32>,
    %cst_81 = arith.constant 0.000000e+00 : f32
    %129 = vector.broadcast %cst_81 : f32 to vector<64x128xf32>
    %c0_82 = arith.constant 0 : index
    %c0_83 = arith.constant 0 : index
    %c0_84 = arith.constant 0 : index
    %130 = vector.load %arg16[%c0_82, %c0_83, %c0_84] : memref<10x10x128xf32, #tpu.memory_space<vmem>>, vector<8x8x128xf32>
    %131 = vector.shape_cast %130 : vector<8x8x128xf32> to vector<64x128xf32>
    %132 = arith.truncf %131 : vector<64x128xf32> to vector<64x128xbf16>
    %c0_85 = arith.constant 0 : index
    %c0_86 = arith.constant 0 : index
    %c0_87 = arith.constant 0 : index
    %133 = vector.load %arg3[%c0_85, %c0_86, %c0_87] : memref<9x128x128xbf16, #tpu.memory_space<vmem>>, vector<1x128x128xbf16>
    %134 = vector.shape_cast %133 : vector<1x128x128xbf16> to vector<128x128xbf16>
    %cst_88 = arith.constant dense<0.000000e+00> : vector<64x128xf32>
    %135 = tpu.matmul %132, %134, %cst_88 {dimension_numbers = #tpu.dot_dimension_numbers<[1], [0], [0], [1], [0, 0, 1, 1], [], []>} : vector<64x128xbf16>, vector<128x128xbf16>, vector<64x128xf32> -> vector<64x128xf32>
    %136 = arith.addf %129, %135 : vector<64x128xf32>
    %c0_89 = arith.constant 0 : index
    %c1_90 = arith.constant 1 : index
    %c0_91 = arith.constant 0 : index
    %137 = vector.load %arg16[%c0_89, %c1_90, %c0_91] : memref<10x10x128xf32, #tpu.memory_space<vmem>>, vector<8x8x128xf32>
    %138 = vector.shape_cast %137 : vector<8x8x128xf32> to vector<64x128xf32>
    %139 = arith.truncf %138 : vector<64x128xf32> to vector<64x128xbf16>
    %c1_92 = arith.constant 1 : index
    %c0_93 = arith.constant 0 : index
    %c0_94 = arith.constant 0 : index
    %140 = vector.load %arg3[%c1_92, %c0_93, %c0_94] : memref<9x128x128xbf16, #tpu.memory_space<vmem>>, vector<1x128x128xbf16>
    %141 = vector.shape_cast %140 : vector<1x128x128xbf16> to vector<128x128xbf16>
    %cst_95 = arith.constant dense<0.000000e+00> : vector<64x128xf32>
    %142 = tpu.matmul %139, %141, %cst_95 {dimension_numbers = #tpu.dot_dimension_numbers<[1], [0], [0], [1], [0, 0, 1, 1], [], []>} : vector<64x128xbf16>, vector<128x128xbf16>, vector<64x128xf32> -> vector<64x128xf32>
    %143 = arith.addf %136, %142 : vector<64x128xf32>
    %c0_96 = arith.constant 0 : index
    %c2_97 = arith.constant 2 : index
    %c0_98 = arith.constant 0 : index
    %144 = vector.load %arg16[%c0_96, %c2_97, %c0_98] : memref<10x10x128xf32, #tpu.memory_space<vmem>>, vector<8x8x128xf32>
    %145 = vector.shape_cast %144 : vector<8x8x128xf32> to vector<64x128xf32>
    %146 = arith.truncf %145 : vector<64x128xf32> to vector<64x128xbf16>
    %c2_99 = arith.constant 2 : index
    %c0_100 = arith.constant 0 : index
    %c0_101 = arith.constant 0 : index
    %147 = vector.load %arg3[%c2_99, %c0_100, %c0_101] : memref<9x128x128xbf16, #tpu.memory_space<vmem>>, vector<1x128x128xbf16>
    %148 = vector.shape_cast %147 : vector<1x128x128xbf16> to vector<128x128xbf16>
    %cst_102 = arith.constant dense<0.000000e+00> : vector<64x128xf32>
    %149 = tpu.matmul %146, %148, %cst_102 {dimension_numbers = #tpu.dot_dimension_numbers<[1], [0], [0], [1], [0, 0, 1, 1], [], []>} : vector<64x128xbf16>, vector<128x128xbf16>, vector<64x128xf32> -> vector<64x128xf32>
    %150 = arith.addf %143, %149 : vector<64x128xf32>
    %c1_103 = arith.constant 1 : index
    %c0_104 = arith.constant 0 : index
    %c0_105 = arith.constant 0 : index
    %151 = vector.load %arg16[%c1_103, %c0_104, %c0_105] : memref<10x10x128xf32, #tpu.memory_space<vmem>>, vector<8x8x128xf32>
    %152 = vector.shape_cast %151 : vector<8x8x128xf32> to vector<64x128xf32>
    %153 = arith.truncf %152 : vector<64x128xf32> to vector<64x128xbf16>
    %c3_106 = arith.constant 3 : index
    %c0_107 = arith.constant 0 : index
    %c0_108 = arith.constant 0 : index
    %154 = vector.load %arg3[%c3_106, %c0_107, %c0_108] : memref<9x128x128xbf16, #tpu.memory_space<vmem>>, vector<1x128x128xbf16>
    %155 = vector.shape_cast %154 : vector<1x128x128xbf16> to vector<128x128xbf16>
    %cst_109 = arith.constant dense<0.000000e+00> : vector<64x128xf32>
    %156 = tpu.matmul %153, %155, %cst_109 {dimension_numbers = #tpu.dot_dimension_numbers<[1], [0], [0], [1], [0, 0, 1, 1], [], []>} : vector<64x128xbf16>, vector<128x128xbf16>, vector<64x128xf32> -> vector<64x128xf32>
    %157 = arith.addf %150, %156 : vector<64x128xf32>
    %c1_110 = arith.constant 1 : index
    %c1_111 = arith.constant 1 : index
    %c0_112 = arith.constant 0 : index
    %158 = vector.load %arg16[%c1_110, %c1_111, %c0_112] : memref<10x10x128xf32, #tpu.memory_space<vmem>>, vector<8x8x128xf32>
    %159 = vector.shape_cast %158 : vector<8x8x128xf32> to vector<64x128xf32>
    %160 = arith.truncf %159 : vector<64x128xf32> to vector<64x128xbf16>
    %c4_113 = arith.constant 4 : index
    %c0_114 = arith.constant 0 : index
    %c0_115 = arith.constant 0 : index
    %161 = vector.load %arg3[%c4_113, %c0_114, %c0_115] : memref<9x128x128xbf16, #tpu.memory_space<vmem>>, vector<1x128x128xbf16>
    %162 = vector.shape_cast %161 : vector<1x128x128xbf16> to vector<128x128xbf16>
    %cst_116 = arith.constant dense<0.000000e+00> : vector<64x128xf32>
    %163 = tpu.matmul %160, %162, %cst_116 {dimension_numbers = #tpu.dot_dimension_numbers<[1], [0], [0], [1], [0, 0, 1, 1], [], []>} : vector<64x128xbf16>, vector<128x128xbf16>, vector<64x128xf32> -> vector<64x128xf32>
    %164 = arith.addf %157, %163 : vector<64x128xf32>
    %c1_117 = arith.constant 1 : index
    %c2_118 = arith.constant 2 : index
    %c0_119 = arith.constant 0 : index
    %165 = vector.load %arg16[%c1_117, %c2_118, %c0_119] : memref<10x10x128xf32, #tpu.memory_space<vmem>>, vector<8x8x128xf32>
    %166 = vector.shape_cast %165 : vector<8x8x128xf32> to vector<64x128xf32>
    %167 = arith.truncf %166 : vector<64x128xf32> to vector<64x128xbf16>
    %c5_120 = arith.constant 5 : index
    %c0_121 = arith.constant 0 : index
    %c0_122 = arith.constant 0 : index
    %168 = vector.load %arg3[%c5_120, %c0_121, %c0_122] : memref<9x128x128xbf16, #tpu.memory_space<vmem>>, vector<1x128x128xbf16>
    %169 = vector.shape_cast %168 : vector<1x128x128xbf16> to vector<128x128xbf16>
    %cst_123 = arith.constant dense<0.000000e+00> : vector<64x128xf32>
    %170 = tpu.matmul %167, %169, %cst_123 {dimension_numbers = #tpu.dot_dimension_numbers<[1], [0], [0], [1], [0, 0, 1, 1], [], []>} : vector<64x128xbf16>, vector<128x128xbf16>, vector<64x128xf32> -> vector<64x128xf32>
    %171 = arith.addf %164, %170 : vector<64x128xf32>
    %c2_124 = arith.constant 2 : index
    %c0_125 = arith.constant 0 : index
    %c0_126 = arith.constant 0 : index
    %172 = vector.load %arg16[%c2_124, %c0_125, %c0_126] : memref<10x10x128xf32, #tpu.memory_space<vmem>>, vector<8x8x128xf32>
    %173 = vector.shape_cast %172 : vector<8x8x128xf32> to vector<64x128xf32>
    %174 = arith.truncf %173 : vector<64x128xf32> to vector<64x128xbf16>
    %c6_127 = arith.constant 6 : index
    %c0_128 = arith.constant 0 : index
    %c0_129 = arith.constant 0 : index
    %175 = vector.load %arg3[%c6_127, %c0_128, %c0_129] : memref<9x128x128xbf16, #tpu.memory_space<vmem>>, vector<1x128x128xbf16>
    %176 = vector.shape_cast %175 : vector<1x128x128xbf16> to vector<128x128xbf16>
    %cst_130 = arith.constant dense<0.000000e+00> : vector<64x128xf32>
    %177 = tpu.matmul %174, %176, %cst_130 {dimension_numbers = #tpu.dot_dimension_numbers<[1], [0], [0], [1], [0, 0, 1, 1], [], []>} : vector<64x128xbf16>, vector<128x128xbf16>, vector<64x128xf32> -> vector<64x128xf32>
    %178 = arith.addf %171, %177 : vector<64x128xf32>
    %c2_131 = arith.constant 2 : index
    %c1_132 = arith.constant 1 : index
    %c0_133 = arith.constant 0 : index
    %179 = vector.load %arg16[%c2_131, %c1_132, %c0_133] : memref<10x10x128xf32, #tpu.memory_space<vmem>>, vector<8x8x128xf32>
    %180 = vector.shape_cast %179 : vector<8x8x128xf32> to vector<64x128xf32>
    %181 = arith.truncf %180 : vector<64x128xf32> to vector<64x128xbf16>
    %c7_134 = arith.constant 7 : index
    %c0_135 = arith.constant 0 : index
    %c0_136 = arith.constant 0 : index
    %182 = vector.load %arg3[%c7_134, %c0_135, %c0_136] : memref<9x128x128xbf16, #tpu.memory_space<vmem>>, vector<1x128x128xbf16>
    %183 = vector.shape_cast %182 : vector<1x128x128xbf16> to vector<128x128xbf16>
    %cst_137 = arith.constant dense<0.000000e+00> : vector<64x128xf32>
    %184 = tpu.matmul %181, %183, %cst_137 {dimension_numbers = #tpu.dot_dimension_numbers<[1], [0], [0], [1], [0, 0, 1, 1], [], []>} : vector<64x128xbf16>, vector<128x128xbf16>, vector<64x128xf32> -> vector<64x128xf32>
    %185 = arith.addf %178, %184 : vector<64x128xf32>
    %c2_138 = arith.constant 2 : index
    %c2_139 = arith.constant 2 : index
    %c0_140 = arith.constant 0 : index
    %186 = vector.load %arg16[%c2_138, %c2_139, %c0_140] : memref<10x10x128xf32, #tpu.memory_space<vmem>>, vector<8x8x128xf32>
    %187 = vector.shape_cast %186 : vector<8x8x128xf32> to vector<64x128xf32>
    %188 = arith.truncf %187 : vector<64x128xf32> to vector<64x128xbf16>
    %c8_141 = arith.constant 8 : index
    %c0_142 = arith.constant 0 : index
    %c0_143 = arith.constant 0 : index
    %189 = vector.load %arg3[%c8_141, %c0_142, %c0_143] : memref<9x128x128xbf16, #tpu.memory_space<vmem>>, vector<1x128x128xbf16>
    %190 = vector.shape_cast %189 : vector<1x128x128xbf16> to vector<128x128xbf16>
    %cst_144 = arith.constant dense<0.000000e+00> : vector<64x128xf32>
    %191 = tpu.matmul %188, %190, %cst_144 {dimension_numbers = #tpu.dot_dimension_numbers<[1], [0], [0], [1], [0, 0, 1, 1], [], []>} : vector<64x128xbf16>, vector<128x128xbf16>, vector<64x128xf32> -> vector<64x128xf32>
    %192 = arith.addf %185, %191 : vector<64x128xf32>
    %193 = vector.shape_cast %192 : vector<64x128xf32> to vector<1x64x128xf32>
    %cst_145 = arith.constant dense<0.000000e+00> : vector<1xf32>
    %194 = vector.multi_reduction <add>, %193, %cst_145 [1, 2] : vector<1x64x128xf32> to vector<1xf32>
    %195 = vector.shape_cast %194 : vector<1xf32> to vector<1x1x1xf32>
    %196 = vector.extract %195[0, 0, 0] : f32 from vector<1x1x1xf32>
    %197 = vector.broadcast %196 : f32 to vector<1x1xf32>
    %cst_146 = arith.constant 3.906250e-03 : f32
    %198 = vector.broadcast %cst_146 : f32 to vector<1x1xf32>
    %199 = arith.mulf %197, %198 : vector<1x1xf32>
    %200 = vector.broadcast %199 : vector<1x1xf32> to vector<64x128xf32>
    %201 = arith.subf %192, %200 : vector<64x128xf32>
    %202 = vector.broadcast %4 : vector<1x128xf32> to vector<64x128xf32>
    %203 = arith.mulf %201, %202 : vector<64x128xf32>
    %204 = arith.mulf %203, %203 : vector<64x128xf32>
    %205 = vector.shape_cast %204 : vector<64x128xf32> to vector<1x64x128xf32>
    %cst_147 = arith.constant dense<0.000000e+00> : vector<1xf32>
    %206 = vector.multi_reduction <add>, %205, %cst_147 [1, 2] : vector<1x64x128xf32> to vector<1xf32>
    %207 = vector.shape_cast %206 : vector<1xf32> to vector<1x1x1xf32>
    %208 = vector.extract %207[0, 0, 0] : f32 from vector<1x1x1xf32>
    %209 = vector.broadcast %208 : f32 to vector<1x1xf32>
    %cst_148 = arith.constant 3.906250e-03 : f32
    %210 = vector.broadcast %cst_148 : f32 to vector<1x1xf32>
    %211 = arith.mulf %209, %210 : vector<1x1xf32>
    %cst_149 = arith.constant 9.99999974E-6 : f32
    %212 = vector.broadcast %cst_149 : f32 to vector<1x1xf32>
    %213 = arith.addf %211, %212 : vector<1x1xf32>
    %214 = math.rsqrt %213 : vector<1x1xf32>
    %215 = vector.broadcast %214 : vector<1x1xf32> to vector<64x128xf32>
    %216 = arith.mulf %201, %215 : vector<64x128xf32>
    %c0_150 = arith.constant 0 : index
    %c0_151 = arith.constant 0 : index
    %217 = vector.load %arg8[%c0_150, %c0_151] : memref<1x128xf32, #tpu.memory_space<vmem>>, vector<1x128xf32>
    %218 = vector.broadcast %217 : vector<1x128xf32> to vector<64x128xf32>
    %219 = arith.mulf %216, %218 : vector<64x128xf32>
    %c0_152 = arith.constant 0 : index
    %c0_153 = arith.constant 0 : index
    %220 = vector.load %arg9[%c0_152, %c0_153] : memref<1x128xf32, #tpu.memory_space<vmem>>, vector<1x128xf32>
    %221 = vector.broadcast %220 : vector<1x128xf32> to vector<64x128xf32>
    %222 = arith.addf %219, %221 : vector<64x128xf32>
    %223 = arith.addf %22, %222 : vector<64x128xf32>
    %cst_154 = arith.constant 5.000000e-01 : f32
    %224 = vector.broadcast %cst_154 : f32 to vector<64x128xf32>
    %225 = arith.mulf %224, %223 : vector<64x128xf32>
    %cst_155 = arith.constant 0.707106769 : f32
    %226 = vector.broadcast %cst_155 : f32 to vector<64x128xf32>
    %227 = arith.mulf %223, %226 : vector<64x128xf32>
    %228 = math.erf %227 : vector<64x128xf32>
    %cst_156 = arith.constant 1.000000e+00 : f32
    %229 = vector.broadcast %cst_156 : f32 to vector<64x128xf32>
    %230 = arith.addf %229, %228 : vector<64x128xf32>
    %231 = arith.mulf %225, %230 : vector<64x128xf32>
    %232 = vector.shape_cast %231 : vector<64x128xf32> to vector<8x8x128xf32>
    %c1_157 = arith.constant 1 : index
    %c1_158 = arith.constant 1 : index
    %c0_159 = arith.constant 0 : index
    %233 = vector.load %arg16[%c1_157, %c1_158, %c0_159] : memref<10x10x128xf32, #tpu.memory_space<vmem>>, vector<8x8x128xf32>
    tpu.vector_store %arg16[%c1_157, %c1_158, %c0_159], %232 {strides = array<i32>} : memref<10x10x128xf32, #tpu.memory_space<vmem>>, vector<8x8x128xf32>,
    %cst_160 = arith.constant 0.000000e+00 : f32
    %234 = vector.broadcast %cst_160 : f32 to vector<64x128xf32>
    %c0_161 = arith.constant 0 : index
    %c0_162 = arith.constant 0 : index
    %c0_163 = arith.constant 0 : index
    %235 = vector.load %arg16[%c0_161, %c0_162, %c0_163] : memref<10x10x128xf32, #tpu.memory_space<vmem>>, vector<8x8x128xf32>
    %236 = vector.shape_cast %235 : vector<8x8x128xf32> to vector<64x128xf32>
    %237 = arith.truncf %236 : vector<64x128xf32> to vector<64x128xbf16>
    %c0_164 = arith.constant 0 : index
    %c0_165 = arith.constant 0 : index
    %c0_166 = arith.constant 0 : index
    %238 = vector.load %arg4[%c0_164, %c0_165, %c0_166] : memref<9x128x128xbf16, #tpu.memory_space<vmem>>, vector<1x128x128xbf16>
    %239 = vector.shape_cast %238 : vector<1x128x128xbf16> to vector<128x128xbf16>
    %cst_167 = arith.constant dense<0.000000e+00> : vector<64x128xf32>
    %240 = tpu.matmul %237, %239, %cst_167 {dimension_numbers = #tpu.dot_dimension_numbers<[1], [0], [0], [1], [0, 0, 1, 1], [], []>} : vector<64x128xbf16>, vector<128x128xbf16>, vector<64x128xf32> -> vector<64x128xf32>
    %241 = arith.addf %234, %240 : vector<64x128xf32>
    %c0_168 = arith.constant 0 : index
    %c1_169 = arith.constant 1 : index
    %c0_170 = arith.constant 0 : index
    %242 = vector.load %arg16[%c0_168, %c1_169, %c0_170] : memref<10x10x128xf32, #tpu.memory_space<vmem>>, vector<8x8x128xf32>
    %243 = vector.shape_cast %242 : vector<8x8x128xf32> to vector<64x128xf32>
    %244 = arith.truncf %243 : vector<64x128xf32> to vector<64x128xbf16>
    %c1_171 = arith.constant 1 : index
    %c0_172 = arith.constant 0 : index
    %c0_173 = arith.constant 0 : index
    %245 = vector.load %arg4[%c1_171, %c0_172, %c0_173] : memref<9x128x128xbf16, #tpu.memory_space<vmem>>, vector<1x128x128xbf16>
    %246 = vector.shape_cast %245 : vector<1x128x128xbf16> to vector<128x128xbf16>
    %cst_174 = arith.constant dense<0.000000e+00> : vector<64x128xf32>
    %247 = tpu.matmul %244, %246, %cst_174 {dimension_numbers = #tpu.dot_dimension_numbers<[1], [0], [0], [1], [0, 0, 1, 1], [], []>} : vector<64x128xbf16>, vector<128x128xbf16>, vector<64x128xf32> -> vector<64x128xf32>
    %248 = arith.addf %241, %247 : vector<64x128xf32>
    %c0_175 = arith.constant 0 : index
    %c2_176 = arith.constant 2 : index
    %c0_177 = arith.constant 0 : index
    %249 = vector.load %arg16[%c0_175, %c2_176, %c0_177] : memref<10x10x128xf32, #tpu.memory_space<vmem>>, vector<8x8x128xf32>
    %250 = vector.shape_cast %249 : vector<8x8x128xf32> to vector<64x128xf32>
    %251 = arith.truncf %250 : vector<64x128xf32> to vector<64x128xbf16>
    %c2_178 = arith.constant 2 : index
    %c0_179 = arith.constant 0 : index
    %c0_180 = arith.constant 0 : index
    %252 = vector.load %arg4[%c2_178, %c0_179, %c0_180] : memref<9x128x128xbf16, #tpu.memory_space<vmem>>, vector<1x128x128xbf16>
    %253 = vector.shape_cast %252 : vector<1x128x128xbf16> to vector<128x128xbf16>
    %cst_181 = arith.constant dense<0.000000e+00> : vector<64x128xf32>
    %254 = tpu.matmul %251, %253, %cst_181 {dimension_numbers = #tpu.dot_dimension_numbers<[1], [0], [0], [1], [0, 0, 1, 1], [], []>} : vector<64x128xbf16>, vector<128x128xbf16>, vector<64x128xf32> -> vector<64x128xf32>
    %255 = arith.addf %248, %254 : vector<64x128xf32>
    %c1_182 = arith.constant 1 : index
    %c0_183 = arith.constant 0 : index
    %c0_184 = arith.constant 0 : index
    %256 = vector.load %arg16[%c1_182, %c0_183, %c0_184] : memref<10x10x128xf32, #tpu.memory_space<vmem>>, vector<8x8x128xf32>
    %257 = vector.shape_cast %256 : vector<8x8x128xf32> to vector<64x128xf32>
    %258 = arith.truncf %257 : vector<64x128xf32> to vector<64x128xbf16>
    %c3_185 = arith.constant 3 : index
    %c0_186 = arith.constant 0 : index
    %c0_187 = arith.constant 0 : index
    %259 = vector.load %arg4[%c3_185, %c0_186, %c0_187] : memref<9x128x128xbf16, #tpu.memory_space<vmem>>, vector<1x128x128xbf16>
    %260 = vector.shape_cast %259 : vector<1x128x128xbf16> to vector<128x128xbf16>
    %cst_188 = arith.constant dense<0.000000e+00> : vector<64x128xf32>
    %261 = tpu.matmul %258, %260, %cst_188 {dimension_numbers = #tpu.dot_dimension_numbers<[1], [0], [0], [1], [0, 0, 1, 1], [], []>} : vector<64x128xbf16>, vector<128x128xbf16>, vector<64x128xf32> -> vector<64x128xf32>
    %262 = arith.addf %255, %261 : vector<64x128xf32>
    %c1_189 = arith.constant 1 : index
    %c1_190 = arith.constant 1 : index
    %c0_191 = arith.constant 0 : index
    %263 = vector.load %arg16[%c1_189, %c1_190, %c0_191] : memref<10x10x128xf32, #tpu.memory_space<vmem>>, vector<8x8x128xf32>
    %264 = vector.shape_cast %263 : vector<8x8x128xf32> to vector<64x128xf32>
    %265 = arith.truncf %264 : vector<64x128xf32> to vector<64x128xbf16>
    %c4_192 = arith.constant 4 : index
    %c0_193 = arith.constant 0 : index
    %c0_194 = arith.constant 0 : index
    %266 = vector.load %arg4[%c4_192, %c0_193, %c0_194] : memref<9x128x128xbf16, #tpu.memory_space<vmem>>, vector<1x128x128xbf16>
    %267 = vector.shape_cast %266 : vector<1x128x128xbf16> to vector<128x128xbf16>
    %cst_195 = arith.constant dense<0.000000e+00> : vector<64x128xf32>
    %268 = tpu.matmul %265, %267, %cst_195 {dimension_numbers = #tpu.dot_dimension_numbers<[1], [0], [0], [1], [0, 0, 1, 1], [], []>} : vector<64x128xbf16>, vector<128x128xbf16>, vector<64x128xf32> -> vector<64x128xf32>
    %269 = arith.addf %262, %268 : vector<64x128xf32>
    %c1_196 = arith.constant 1 : index
    %c2_197 = arith.constant 2 : index
    %c0_198 = arith.constant 0 : index
    %270 = vector.load %arg16[%c1_196, %c2_197, %c0_198] : memref<10x10x128xf32, #tpu.memory_space<vmem>>, vector<8x8x128xf32>
    %271 = vector.shape_cast %270 : vector<8x8x128xf32> to vector<64x128xf32>
    %272 = arith.truncf %271 : vector<64x128xf32> to vector<64x128xbf16>
    %c5_199 = arith.constant 5 : index
    %c0_200 = arith.constant 0 : index
    %c0_201 = arith.constant 0 : index
    %273 = vector.load %arg4[%c5_199, %c0_200, %c0_201] : memref<9x128x128xbf16, #tpu.memory_space<vmem>>, vector<1x128x128xbf16>
    %274 = vector.shape_cast %273 : vector<1x128x128xbf16> to vector<128x128xbf16>
    %cst_202 = arith.constant dense<0.000000e+00> : vector<64x128xf32>
    %275 = tpu.matmul %272, %274, %cst_202 {dimension_numbers = #tpu.dot_dimension_numbers<[1], [0], [0], [1], [0, 0, 1, 1], [], []>} : vector<64x128xbf16>, vector<128x128xbf16>, vector<64x128xf32> -> vector<64x128xf32>
    %276 = arith.addf %269, %275 : vector<64x128xf32>
    %c2_203 = arith.constant 2 : index
    %c0_204 = arith.constant 0 : index
    %c0_205 = arith.constant 0 : index
    %277 = vector.load %arg16[%c2_203, %c0_204, %c0_205] : memref<10x10x128xf32, #tpu.memory_space<vmem>>, vector<8x8x128xf32>
    %278 = vector.shape_cast %277 : vector<8x8x128xf32> to vector<64x128xf32>
    %279 = arith.truncf %278 : vector<64x128xf32> to vector<64x128xbf16>
    %c6_206 = arith.constant 6 : index
    %c0_207 = arith.constant 0 : index
    %c0_208 = arith.constant 0 : index
    %280 = vector.load %arg4[%c6_206, %c0_207, %c0_208] : memref<9x128x128xbf16, #tpu.memory_space<vmem>>, vector<1x128x128xbf16>
    %281 = vector.shape_cast %280 : vector<1x128x128xbf16> to vector<128x128xbf16>
    %cst_209 = arith.constant dense<0.000000e+00> : vector<64x128xf32>
    %282 = tpu.matmul %279, %281, %cst_209 {dimension_numbers = #tpu.dot_dimension_numbers<[1], [0], [0], [1], [0, 0, 1, 1], [], []>} : vector<64x128xbf16>, vector<128x128xbf16>, vector<64x128xf32> -> vector<64x128xf32>
    %283 = arith.addf %276, %282 : vector<64x128xf32>
    %c2_210 = arith.constant 2 : index
    %c1_211 = arith.constant 1 : index
    %c0_212 = arith.constant 0 : index
    %284 = vector.load %arg16[%c2_210, %c1_211, %c0_212] : memref<10x10x128xf32, #tpu.memory_space<vmem>>, vector<8x8x128xf32>
    %285 = vector.shape_cast %284 : vector<8x8x128xf32> to vector<64x128xf32>
    %286 = arith.truncf %285 : vector<64x128xf32> to vector<64x128xbf16>
    %c7_213 = arith.constant 7 : index
    %c0_214 = arith.constant 0 : index
    %c0_215 = arith.constant 0 : index
    %287 = vector.load %arg4[%c7_213, %c0_214, %c0_215] : memref<9x128x128xbf16, #tpu.memory_space<vmem>>, vector<1x128x128xbf16>
    %288 = vector.shape_cast %287 : vector<1x128x128xbf16> to vector<128x128xbf16>
    %cst_216 = arith.constant dense<0.000000e+00> : vector<64x128xf32>
    %289 = tpu.matmul %286, %288, %cst_216 {dimension_numbers = #tpu.dot_dimension_numbers<[1], [0], [0], [1], [0, 0, 1, 1], [], []>} : vector<64x128xbf16>, vector<128x128xbf16>, vector<64x128xf32> -> vector<64x128xf32>
    %290 = arith.addf %283, %289 : vector<64x128xf32>
    %c2_217 = arith.constant 2 : index
    %c2_218 = arith.constant 2 : index
    %c0_219 = arith.constant 0 : index
    %291 = vector.load %arg16[%c2_217, %c2_218, %c0_219] : memref<10x10x128xf32, #tpu.memory_space<vmem>>, vector<8x8x128xf32>
    %292 = vector.shape_cast %291 : vector<8x8x128xf32> to vector<64x128xf32>
    %293 = arith.truncf %292 : vector<64x128xf32> to vector<64x128xbf16>
    %c8_220 = arith.constant 8 : index
    %c0_221 = arith.constant 0 : index
    %c0_222 = arith.constant 0 : index
    %294 = vector.load %arg4[%c8_220, %c0_221, %c0_222] : memref<9x128x128xbf16, #tpu.memory_space<vmem>>, vector<1x128x128xbf16>
    %295 = vector.shape_cast %294 : vector<1x128x128xbf16> to vector<128x128xbf16>
    %cst_223 = arith.constant dense<0.000000e+00> : vector<64x128xf32>
    %296 = tpu.matmul %293, %295, %cst_223 {dimension_numbers = #tpu.dot_dimension_numbers<[1], [0], [0], [1], [0, 0, 1, 1], [], []>} : vector<64x128xbf16>, vector<128x128xbf16>, vector<64x128xf32> -> vector<64x128xf32>
    %297 = arith.addf %290, %296 : vector<64x128xf32>
    %298 = vector.shape_cast %297 : vector<64x128xf32> to vector<1x64x128xf32>
    %cst_224 = arith.constant dense<0.000000e+00> : vector<1xf32>
    %299 = vector.multi_reduction <add>, %298, %cst_224 [1, 2] : vector<1x64x128xf32> to vector<1xf32>
    %300 = vector.shape_cast %299 : vector<1xf32> to vector<1x1x1xf32>
    %301 = vector.extract %300[0, 0, 0] : f32 from vector<1x1x1xf32>
    %302 = vector.broadcast %301 : f32 to vector<1x1xf32>
    %cst_225 = arith.constant 0.001953125 : f32
    %303 = vector.broadcast %cst_225 : f32 to vector<1x1xf32>
    %304 = arith.mulf %302, %303 : vector<1x1xf32>
    %305 = vector.broadcast %304 : vector<1x1xf32> to vector<64x128xf32>
    %306 = arith.subf %297, %305 : vector<64x128xf32>
    %307 = vector.broadcast %8 : vector<1x128xf32> to vector<64x128xf32>
    %308 = arith.mulf %306, %307 : vector<64x128xf32>
    %309 = arith.mulf %308, %308 : vector<64x128xf32>
    %310 = vector.shape_cast %309 : vector<64x128xf32> to vector<1x64x128xf32>
    %cst_226 = arith.constant dense<0.000000e+00> : vector<1xf32>
    %311 = vector.multi_reduction <add>, %310, %cst_226 [1, 2] : vector<1x64x128xf32> to vector<1xf32>
    %312 = vector.shape_cast %311 : vector<1xf32> to vector<1x1x1xf32>
    %313 = vector.extract %312[0, 0, 0] : f32 from vector<1x1x1xf32>
    %314 = vector.broadcast %313 : f32 to vector<1x1xf32>
    %cst_227 = arith.constant 0.001953125 : f32
    %315 = vector.broadcast %cst_227 : f32 to vector<1x1xf32>
    %316 = arith.mulf %314, %315 : vector<1x1xf32>
    %cst_228 = arith.constant 9.99999974E-6 : f32
    %317 = vector.broadcast %cst_228 : f32 to vector<1x1xf32>
    %318 = arith.addf %316, %317 : vector<1x1xf32>
    %319 = math.rsqrt %318 : vector<1x1xf32>
    %320 = vector.broadcast %319 : vector<1x1xf32> to vector<64x128xf32>
    %321 = arith.mulf %306, %320 : vector<64x128xf32>
    %c0_229 = arith.constant 0 : index
    %c0_230 = arith.constant 0 : index
    %322 = vector.load %arg10[%c0_229, %c0_230] : memref<1x128xf32, #tpu.memory_space<vmem>>, vector<1x128xf32>
    %323 = vector.broadcast %322 : vector<1x128xf32> to vector<64x128xf32>
    %324 = arith.mulf %321, %323 : vector<64x128xf32>
    %c0_231 = arith.constant 0 : index
    %c0_232 = arith.constant 0 : index
    %325 = vector.load %arg11[%c0_231, %c0_232] : memref<1x128xf32, #tpu.memory_space<vmem>>, vector<1x128xf32>
    %326 = vector.broadcast %325 : vector<1x128xf32> to vector<64x128xf32>
    %327 = arith.addf %324, %326 : vector<64x128xf32>
    %cst_233 = arith.constant 5.000000e-01 : f32
    %328 = vector.broadcast %cst_233 : f32 to vector<64x128xf32>
    %329 = arith.mulf %328, %327 : vector<64x128xf32>
    %cst_234 = arith.constant 0.707106769 : f32
    %330 = vector.broadcast %cst_234 : f32 to vector<64x128xf32>
    %331 = arith.mulf %327, %330 : vector<64x128xf32>
    %332 = math.erf %331 : vector<64x128xf32>
    %cst_235 = arith.constant 1.000000e+00 : f32
    %333 = vector.broadcast %cst_235 : f32 to vector<64x128xf32>
    %334 = arith.addf %333, %332 : vector<64x128xf32>
    %335 = arith.mulf %329, %334 : vector<64x128xf32>
    %336 = vector.shape_cast %335 : vector<64x128xf32> to vector<8x8x128xf32>
    %c1_236 = arith.constant 1 : index
    %c1_237 = arith.constant 1 : index
    %c0_238 = arith.constant 0 : index
    %337 = vector.load %arg16[%c1_236, %c1_237, %c0_238] : memref<10x10x128xf32, #tpu.memory_space<vmem>>, vector<8x8x128xf32>
    tpu.vector_store %arg16[%c1_236, %c1_237, %c0_238], %336 {strides = array<i32>} : memref<10x10x128xf32, #tpu.memory_space<vmem>>, vector<8x8x128xf32>,
    %cst_239 = arith.constant 0.000000e+00 : f32
    %338 = vector.broadcast %cst_239 : f32 to vector<64x128xf32>
    %c0_240 = arith.constant 0 : index
    %c0_241 = arith.constant 0 : index
    %c0_242 = arith.constant 0 : index
    %339 = vector.load %arg16[%c0_240, %c0_241, %c0_242] : memref<10x10x128xf32, #tpu.memory_space<vmem>>, vector<8x8x128xf32>
    %340 = vector.shape_cast %339 : vector<8x8x128xf32> to vector<64x128xf32>
    %341 = arith.truncf %340 : vector<64x128xf32> to vector<64x128xbf16>
    %c0_243 = arith.constant 0 : index
    %c0_244 = arith.constant 0 : index
    %c0_245 = arith.constant 0 : index
    %342 = vector.load %arg5[%c0_243, %c0_244, %c0_245] : memref<9x128x128xbf16, #tpu.memory_space<vmem>>, vector<1x128x128xbf16>
    %343 = vector.shape_cast %342 : vector<1x128x128xbf16> to vector<128x128xbf16>
    %cst_246 = arith.constant dense<0.000000e+00> : vector<64x128xf32>
    %344 = tpu.matmul %341, %343, %cst_246 {dimension_numbers = #tpu.dot_dimension_numbers<[1], [0], [0], [1], [0, 0, 1, 1], [], []>} : vector<64x128xbf16>, vector<128x128xbf16>, vector<64x128xf32> -> vector<64x128xf32>
    %345 = arith.addf %338, %344 : vector<64x128xf32>
    %c0_247 = arith.constant 0 : index
    %c1_248 = arith.constant 1 : index
    %c0_249 = arith.constant 0 : index
    %346 = vector.load %arg16[%c0_247, %c1_248, %c0_249] : memref<10x10x128xf32, #tpu.memory_space<vmem>>, vector<8x8x128xf32>
    %347 = vector.shape_cast %346 : vector<8x8x128xf32> to vector<64x128xf32>
    %348 = arith.truncf %347 : vector<64x128xf32> to vector<64x128xbf16>
    %c1_250 = arith.constant 1 : index
    %c0_251 = arith.constant 0 : index
    %c0_252 = arith.constant 0 : index
    %349 = vector.load %arg5[%c1_250, %c0_251, %c0_252] : memref<9x128x128xbf16, #tpu.memory_space<vmem>>, vector<1x128x128xbf16>
    %350 = vector.shape_cast %349 : vector<1x128x128xbf16> to vector<128x128xbf16>
    %cst_253 = arith.constant dense<0.000000e+00> : vector<64x128xf32>
    %351 = tpu.matmul %348, %350, %cst_253 {dimension_numbers = #tpu.dot_dimension_numbers<[1], [0], [0], [1], [0, 0, 1, 1], [], []>} : vector<64x128xbf16>, vector<128x128xbf16>, vector<64x128xf32> -> vector<64x128xf32>
    %352 = arith.addf %345, %351 : vector<64x128xf32>
    %c0_254 = arith.constant 0 : index
    %c2_255 = arith.constant 2 : index
    %c0_256 = arith.constant 0 : index
    %353 = vector.load %arg16[%c0_254, %c2_255, %c0_256] : memref<10x10x128xf32, #tpu.memory_space<vmem>>, vector<8x8x128xf32>
    %354 = vector.shape_cast %353 : vector<8x8x128xf32> to vector<64x128xf32>
    %355 = arith.truncf %354 : vector<64x128xf32> to vector<64x128xbf16>
    %c2_257 = arith.constant 2 : index
    %c0_258 = arith.constant 0 : index
    %c0_259 = arith.constant 0 : index
    %356 = vector.load %arg5[%c2_257, %c0_258, %c0_259] : memref<9x128x128xbf16, #tpu.memory_space<vmem>>, vector<1x128x128xbf16>
    %357 = vector.shape_cast %356 : vector<1x128x128xbf16> to vector<128x128xbf16>
    %cst_260 = arith.constant dense<0.000000e+00> : vector<64x128xf32>
    %358 = tpu.matmul %355, %357, %cst_260 {dimension_numbers = #tpu.dot_dimension_numbers<[1], [0], [0], [1], [0, 0, 1, 1], [], []>} : vector<64x128xbf16>, vector<128x128xbf16>, vector<64x128xf32> -> vector<64x128xf32>
    %359 = arith.addf %352, %358 : vector<64x128xf32>
    %c1_261 = arith.constant 1 : index
    %c0_262 = arith.constant 0 : index
    %c0_263 = arith.constant 0 : index
    %360 = vector.load %arg16[%c1_261, %c0_262, %c0_263] : memref<10x10x128xf32, #tpu.memory_space<vmem>>, vector<8x8x128xf32>
    %361 = vector.shape_cast %360 : vector<8x8x128xf32> to vector<64x128xf32>
    %362 = arith.truncf %361 : vector<64x128xf32> to vector<64x128xbf16>
    %c3_264 = arith.constant 3 : index
    %c0_265 = arith.constant 0 : index
    %c0_266 = arith.constant 0 : index
    %363 = vector.load %arg5[%c3_264, %c0_265, %c0_266] : memref<9x128x128xbf16, #tpu.memory_space<vmem>>, vector<1x128x128xbf16>
    %364 = vector.shape_cast %363 : vector<1x128x128xbf16> to vector<128x128xbf16>
    %cst_267 = arith.constant dense<0.000000e+00> : vector<64x128xf32>
    %365 = tpu.matmul %362, %364, %cst_267 {dimension_numbers = #tpu.dot_dimension_numbers<[1], [0], [0], [1], [0, 0, 1, 1], [], []>} : vector<64x128xbf16>, vector<128x128xbf16>, vector<64x128xf32> -> vector<64x128xf32>
    %366 = arith.addf %359, %365 : vector<64x128xf32>
    %c1_268 = arith.constant 1 : index
    %c1_269 = arith.constant 1 : index
    %c0_270 = arith.constant 0 : index
    %367 = vector.load %arg16[%c1_268, %c1_269, %c0_270] : memref<10x10x128xf32, #tpu.memory_space<vmem>>, vector<8x8x128xf32>
    %368 = vector.shape_cast %367 : vector<8x8x128xf32> to vector<64x128xf32>
    %369 = arith.truncf %368 : vector<64x128xf32> to vector<64x128xbf16>
    %c4_271 = arith.constant 4 : index
    %c0_272 = arith.constant 0 : index
    %c0_273 = arith.constant 0 : index
    %370 = vector.load %arg5[%c4_271, %c0_272, %c0_273] : memref<9x128x128xbf16, #tpu.memory_space<vmem>>, vector<1x128x128xbf16>
    %371 = vector.shape_cast %370 : vector<1x128x128xbf16> to vector<128x128xbf16>
    %cst_274 = arith.constant dense<0.000000e+00> : vector<64x128xf32>
    %372 = tpu.matmul %369, %371, %cst_274 {dimension_numbers = #tpu.dot_dimension_numbers<[1], [0], [0], [1], [0, 0, 1, 1], [], []>} : vector<64x128xbf16>, vector<128x128xbf16>, vector<64x128xf32> -> vector<64x128xf32>
    %373 = arith.addf %366, %372 : vector<64x128xf32>
    %c1_275 = arith.constant 1 : index
    %c2_276 = arith.constant 2 : index
    %c0_277 = arith.constant 0 : index
    %374 = vector.load %arg16[%c1_275, %c2_276, %c0_277] : memref<10x10x128xf32, #tpu.memory_space<vmem>>, vector<8x8x128xf32>
    %375 = vector.shape_cast %374 : vector<8x8x128xf32> to vector<64x128xf32>
    %376 = arith.truncf %375 : vector<64x128xf32> to vector<64x128xbf16>
    %c5_278 = arith.constant 5 : index
    %c0_279 = arith.constant 0 : index
    %c0_280 = arith.constant 0 : index
    %377 = vector.load %arg5[%c5_278, %c0_279, %c0_280] : memref<9x128x128xbf16, #tpu.memory_space<vmem>>, vector<1x128x128xbf16>
    %378 = vector.shape_cast %377 : vector<1x128x128xbf16> to vector<128x128xbf16>
    %cst_281 = arith.constant dense<0.000000e+00> : vector<64x128xf32>
    %379 = tpu.matmul %376, %378, %cst_281 {dimension_numbers = #tpu.dot_dimension_numbers<[1], [0], [0], [1], [0, 0, 1, 1], [], []>} : vector<64x128xbf16>, vector<128x128xbf16>, vector<64x128xf32> -> vector<64x128xf32>
    %380 = arith.addf %373, %379 : vector<64x128xf32>
    %c2_282 = arith.constant 2 : index
    %c0_283 = arith.constant 0 : index
    %c0_284 = arith.constant 0 : index
    %381 = vector.load %arg16[%c2_282, %c0_283, %c0_284] : memref<10x10x128xf32, #tpu.memory_space<vmem>>, vector<8x8x128xf32>
    %382 = vector.shape_cast %381 : vector<8x8x128xf32> to vector<64x128xf32>
    %383 = arith.truncf %382 : vector<64x128xf32> to vector<64x128xbf16>
    %c6_285 = arith.constant 6 : index
    %c0_286 = arith.constant 0 : index
    %c0_287 = arith.constant 0 : index
    %384 = vector.load %arg5[%c6_285, %c0_286, %c0_287] : memref<9x128x128xbf16, #tpu.memory_space<vmem>>, vector<1x128x128xbf16>
    %385 = vector.shape_cast %384 : vector<1x128x128xbf16> to vector<128x128xbf16>
    %cst_288 = arith.constant dense<0.000000e+00> : vector<64x128xf32>
    %386 = tpu.matmul %383, %385, %cst_288 {dimension_numbers = #tpu.dot_dimension_numbers<[1], [0], [0], [1], [0, 0, 1, 1], [], []>} : vector<64x128xbf16>, vector<128x128xbf16>, vector<64x128xf32> -> vector<64x128xf32>
    %387 = arith.addf %380, %386 : vector<64x128xf32>
    %c2_289 = arith.constant 2 : index
    %c1_290 = arith.constant 1 : index
    %c0_291 = arith.constant 0 : index
    %388 = vector.load %arg16[%c2_289, %c1_290, %c0_291] : memref<10x10x128xf32, #tpu.memory_space<vmem>>, vector<8x8x128xf32>
    %389 = vector.shape_cast %388 : vector<8x8x128xf32> to vector<64x128xf32>
    %390 = arith.truncf %389 : vector<64x128xf32> to vector<64x128xbf16>
    %c7_292 = arith.constant 7 : index
    %c0_293 = arith.constant 0 : index
    %c0_294 = arith.constant 0 : index
    %391 = vector.load %arg5[%c7_292, %c0_293, %c0_294] : memref<9x128x128xbf16, #tpu.memory_space<vmem>>, vector<1x128x128xbf16>
    %392 = vector.shape_cast %391 : vector<1x128x128xbf16> to vector<128x128xbf16>
    %cst_295 = arith.constant dense<0.000000e+00> : vector<64x128xf32>
    %393 = tpu.matmul %390, %392, %cst_295 {dimension_numbers = #tpu.dot_dimension_numbers<[1], [0], [0], [1], [0, 0, 1, 1], [], []>} : vector<64x128xbf16>, vector<128x128xbf16>, vector<64x128xf32> -> vector<64x128xf32>
    %394 = arith.addf %387, %393 : vector<64x128xf32>
    %c2_296 = arith.constant 2 : index
    %c2_297 = arith.constant 2 : index
    %c0_298 = arith.constant 0 : index
    %395 = vector.load %arg16[%c2_296, %c2_297, %c0_298] : memref<10x10x128xf32, #tpu.memory_space<vmem>>, vector<8x8x128xf32>
    %396 = vector.shape_cast %395 : vector<8x8x128xf32> to vector<64x128xf32>
    %397 = arith.truncf %396 : vector<64x128xf32> to vector<64x128xbf16>
    %c8_299 = arith.constant 8 : index
    %c0_300 = arith.constant 0 : index
    %c0_301 = arith.constant 0 : index
    %398 = vector.load %arg5[%c8_299, %c0_300, %c0_301] : memref<9x128x128xbf16, #tpu.memory_space<vmem>>, vector<1x128x128xbf16>
    %399 = vector.shape_cast %398 : vector<1x128x128xbf16> to vector<128x128xbf16>
    %cst_302 = arith.constant dense<0.000000e+00> : vector<64x128xf32>
    %400 = tpu.matmul %397, %399, %cst_302 {dimension_numbers = #tpu.dot_dimension_numbers<[1], [0], [0], [1], [0, 0, 1, 1], [], []>} : vector<64x128xbf16>, vector<128x128xbf16>, vector<64x128xf32> -> vector<64x128xf32>
    %401 = arith.addf %394, %400 : vector<64x128xf32>
    %402 = vector.shape_cast %401 : vector<64x128xf32> to vector<1x64x128xf32>
    %cst_303 = arith.constant dense<0.000000e+00> : vector<1xf32>
    %403 = vector.multi_reduction <add>, %402, %cst_303 [1, 2] : vector<1x64x128xf32> to vector<1xf32>
    %404 = vector.shape_cast %403 : vector<1xf32> to vector<1x1x1xf32>
    %405 = vector.extract %404[0, 0, 0] : f32 from vector<1x1x1xf32>
    %406 = vector.broadcast %405 : f32 to vector<1x1xf32>
    %cst_304 = arith.constant 0.001953125 : f32
    %407 = vector.broadcast %cst_304 : f32 to vector<1x1xf32>
    %408 = arith.mulf %406, %407 : vector<1x1xf32>
    %409 = vector.broadcast %408 : vector<1x1xf32> to vector<64x128xf32>
    %410 = arith.subf %401, %409 : vector<64x128xf32>
    %411 = vector.broadcast %8 : vector<1x128xf32> to vector<64x128xf32>
    %412 = arith.mulf %410, %411 : vector<64x128xf32>
    %413 = arith.mulf %412, %412 : vector<64x128xf32>
    %414 = vector.shape_cast %413 : vector<64x128xf32> to vector<1x64x128xf32>
    %cst_305 = arith.constant dense<0.000000e+00> : vector<1xf32>
    %415 = vector.multi_reduction <add>, %414, %cst_305 [1, 2] : vector<1x64x128xf32> to vector<1xf32>
    %416 = vector.shape_cast %415 : vector<1xf32> to vector<1x1x1xf32>
    %417 = vector.extract %416[0, 0, 0] : f32 from vector<1x1x1xf32>
    %418 = vector.broadcast %417 : f32 to vector<1x1xf32>
    %cst_306 = arith.constant 0.001953125 : f32
    %419 = vector.broadcast %cst_306 : f32 to vector<1x1xf32>
    %420 = arith.mulf %418, %419 : vector<1x1xf32>
    %cst_307 = arith.constant 9.99999974E-6 : f32
    %421 = vector.broadcast %cst_307 : f32 to vector<1x1xf32>
    %422 = arith.addf %420, %421 : vector<1x1xf32>
    %423 = math.rsqrt %422 : vector<1x1xf32>
    %424 = vector.broadcast %423 : vector<1x1xf32> to vector<64x128xf32>
    %425 = arith.mulf %410, %424 : vector<64x128xf32>
    %c0_308 = arith.constant 0 : index
    %c0_309 = arith.constant 0 : index
    %426 = vector.load %arg12[%c0_308, %c0_309] : memref<1x128xf32, #tpu.memory_space<vmem>>, vector<1x128xf32>
    %427 = vector.broadcast %426 : vector<1x128xf32> to vector<64x128xf32>
    %428 = arith.mulf %425, %427 : vector<64x128xf32>
    %c0_310 = arith.constant 0 : index
    %c0_311 = arith.constant 0 : index
    %429 = vector.load %arg13[%c0_310, %c0_311] : memref<1x128xf32, #tpu.memory_space<vmem>>, vector<1x128xf32>
    %430 = vector.broadcast %429 : vector<1x128xf32> to vector<64x128xf32>
    %431 = arith.addf %428, %430 : vector<64x128xf32>
    %c0_312 = arith.constant 0 : index
    %c0_313 = arith.constant 0 : index
    %c0_314 = arith.constant 0 : index
    %432 = vector.load %arg14[%c0_312, %c0_313, %c0_314] : memref<1x1x128xf32, #tpu.memory_space<vmem>>, vector<1x1x128xf32>
    %433 = vector.shape_cast %432 : vector<1x1x128xf32> to vector<1x128xf32>
    %434 = vector.broadcast %433 : vector<1x128xf32> to vector<64x128xf32>
    %435 = arith.addf %431, %434 : vector<64x128xf32>
    %c0_315 = arith.constant 0 : index
    %c0_316 = arith.constant 0 : index
    %c0_317 = arith.constant 0 : index
    %436 = vector.load %arg15[%c0_315, %c0_316, %c0_317] : memref<1x64x128xf32, #tpu.memory_space<vmem>>, vector<1x64x128xf32>
    %437 = vector.shape_cast %436 : vector<1x64x128xf32> to vector<64x128xf32>
    %438 = vector.shape_cast %435 : vector<64x128xf32> to vector<1x64x128xf32>
    tpu.vector_store %arg15[%c0_315, %c0_316, %c0_317], %438 {strides = array<i32>} : memref<1x64x128xf32, #tpu.memory_space<vmem>>, vector<1x64x128xf32>,
    return
  }
  func.func @transform_0(%arg0: i32) -> (i32, i32, i32, i32, i32) {
    %c0_i32 = arith.constant 0 : i32
    %c0_i32_0 = arith.constant 0 : i32
    %c0_i32_1 = arith.constant 0 : i32
    %c0_i32_2 = arith.constant 0 : i32
    %c0_i32_3 = arith.constant 0 : i32
    return %arg0, %c0_i32, %c0_i32_0, %c0_i32_1, %c0_i32_2 : i32, i32, i32, i32, i32
  }
  func.func @transform_1(%arg0: i32) -> (i32, i32, i32) {
    %c0_i32 = arith.constant 0 : i32
    %c0_i32_0 = arith.constant 0 : i32
    %c0_i32_1 = arith.constant 0 : i32
    %c0_i32_2 = arith.constant 0 : i32
    return %c0_i32, %c0_i32_0, %c0_i32_1 : i32, i32, i32
  }
  func.func @transform_2(%arg0: i32) -> (i32, i32, i32) {
    %c0_i32 = arith.constant 0 : i32
    %c0_i32_0 = arith.constant 0 : i32
    %c0_i32_1 = arith.constant 0 : i32
    %c0_i32_2 = arith.constant 0 : i32
    return %c0_i32, %c0_i32_0, %c0_i32_1 : i32, i32, i32
  }
  func.func @transform_3(%arg0: i32) -> (i32, i32, i32) {
    %c0_i32 = arith.constant 0 : i32
    %c0_i32_0 = arith.constant 0 : i32
    %c0_i32_1 = arith.constant 0 : i32
    %c0_i32_2 = arith.constant 0 : i32
    return %c0_i32, %c0_i32_0, %c0_i32_1 : i32, i32, i32
  }
  func.func @transform_4(%arg0: i32) -> (i32, i32, i32) {
    %c0_i32 = arith.constant 0 : i32
    %c0_i32_0 = arith.constant 0 : i32
    %c0_i32_1 = arith.constant 0 : i32
    %c0_i32_2 = arith.constant 0 : i32
    return %c0_i32, %c0_i32_0, %c0_i32_1 : i32, i32, i32
  }
  func.func @transform_5(%arg0: i32) -> (i32, i32) {
    %c0_i32 = arith.constant 0 : i32
    %c0_i32_0 = arith.constant 0 : i32
    %c0_i32_1 = arith.constant 0 : i32
    return %c0_i32, %c0_i32_0 : i32, i32
  }
  func.func @transform_6(%arg0: i32) -> (i32, i32) {
    %c0_i32 = arith.constant 0 : i32
    %c0_i32_0 = arith.constant 0 : i32
    %c0_i32_1 = arith.constant 0 : i32
    return %c0_i32, %c0_i32_0 : i32, i32
  }
  func.func @transform_7(%arg0: i32) -> (i32, i32) {
    %c0_i32 = arith.constant 0 : i32
    %c0_i32_0 = arith.constant 0 : i32
    %c0_i32_1 = arith.constant 0 : i32
    return %c0_i32, %c0_i32_0 : i32, i32
  }
  func.func @transform_8(%arg0: i32) -> (i32, i32) {
    %c0_i32 = arith.constant 0 : i32
    %c0_i32_0 = arith.constant 0 : i32
    %c0_i32_1 = arith.constant 0 : i32
    return %c0_i32, %c0_i32_0 : i32, i32
  }
  func.func @transform_9(%arg0: i32) -> (i32, i32) {
    %c0_i32 = arith.constant 0 : i32
    %c0_i32_0 = arith.constant 0 : i32
    %c0_i32_1 = arith.constant 0 : i32
    return %c0_i32, %c0_i32_0 : i32, i32
  }
  func.func @transform_10(%arg0: i32) -> (i32, i32) {
    %c0_i32 = arith.constant 0 : i32
    %c0_i32_0 = arith.constant 0 : i32
    %c0_i32_1 = arith.constant 0 : i32
    return %c0_i32, %c0_i32_0 : i32, i32
  }
  func.func @transform_11(%arg0: i32) -> (i32, i32) {
    %c0_i32 = arith.constant 0 : i32
    %c0_i32_0 = arith.constant 0 : i32
    %c0_i32_1 = arith.constant 0 : i32
    return %c0_i32, %c0_i32_0 : i32, i32
  }
  func.func @transform_12(%arg0: i32) -> (i32, i32) {
    %c0_i32 = arith.constant 0 : i32
    %c0_i32_0 = arith.constant 0 : i32
    %c0_i32_1 = arith.constant 0 : i32
    return %c0_i32, %c0_i32_0 : i32, i32
  }
  func.func @transform_13(%arg0: i32) -> (i32, i32, i32) {
    %c0_i32 = arith.constant 0 : i32
    %c0_i32_0 = arith.constant 0 : i32
    %c0_i32_1 = arith.constant 0 : i32
    return %arg0, %c0_i32, %c0_i32_0 : i32, i32, i32
  }
  func.func @transform_14(%arg0: i32) -> (i32, i32, i32) {
    %c0_i32 = arith.constant 0 : i32
    %c0_i32_0 = arith.constant 0 : i32
    %c0_i32_1 = arith.constant 0 : i32
    return %arg0, %c0_i32, %c0_i32_0 : i32, i32, i32
  }
}

</mosaic_0001>

<bundles_post_ra>
// kernel: downsample_forward.1
= control target key start
LH: loop header
LB: loop body
LE: loop exit
PB: predicated region body
PF: predicated region fallthrough
CT: control target
= control target key end

     0   :  { %19 = vsyncpa [#allocation4], 0  ;;  %s10639_s0 = inlined_call_operand.vmem [shape: bf16[2,8,2,8,256], index: 0, kind: input, shape index: {}]   ;;  %s10640_s1 = inlined_call_operand.vmem [shape: bf16[9,128,128], index: 1, kind: input, shape index: {}]   ;;  %s10641_s2 = inlined_call_operand.vmem [shape: bf16[9,128,128], index: 2, kind: input, shape index: {}]   ;;  %s10642_s3 = inlined_call_operand.hbm [shape: bf16[9,128,128], index: 3, kind: input, shape index: {}]   ;;  %s10643_s4 = inlined_call_operand.hbm [shape: bf16[9,128,128], index: 4, kind: input, shape index: {}]   ;;  %s10644_s5 = inlined_call_operand.vmem [shape: f32[1,128], index: 5, kind: input, shape index: {}]   ;;  %s10645_s6 = inlined_call_operand.vmem [shape: f32[1,128], index: 6, kind: input, shape index: {}]   ;;  %s10646_s7 = inlined_call_operand.vmem [shape: f32[1,128], index: 7, kind: input, shape index: {}]   ;;  %s10647_s8 = inlined_call_operand.vmem [shape: f32[1,128], index: 8, kind: input, shape index: {}]   ;;  %s10648_s9 = inlined_call_operand.vmem [shape: f32[1,128], index: 9, kind: input, shape index: {}]   ;;  %s10649_s10 = inlined_call_operand.vmem [shape: f32[1,128], index: 10, kind: input, shape index: {}]   ;;  %s10650_s11 = inlined_call_operand.vmem [shape: f32[1,128], index: 11, kind: input, shape index: {}]   ;;  %s10651_s12 = inlined_call_operand.vmem [shape: f32[1,128], index: 12, kind: input, shape index: {}]   ;;  %s10652_s13 = inlined_call_operand.vmem [shape: f32[2,1,128], index: 13, kind: input, shape index: {}]   ;;  %s10653_s14 = inlined_call_operand.vmem [shape: f32[2,64,128], index: 14, kind: output, shape index: {}]  }
   0x1   :  { %20 = vsyncpa [#allocation6], 0  ;;  %s8344_s29 = smov 0  }
   0x2 LB: > { %s378_s16 = sshll.u32 %s10642_s3, 4  ;;  %s8353_s17 = sadd.s32 4294967295, %s8262_s29   ;;  %s8262_s29 = sphi %s8344_s29, %s26_s29   ;;  %s379_s16 = int_to_ptr.hbm [resolvable:$true] %s378_s16 }
   0x3   : > { %p6334_p0 = scmp.ge.s32.totalorder %s8262_s29, 1  ;;  %p361_p1 = scmp.lt.s32.totalorder %s8262_s29, 3 }
   0x4   : > { %p8102_p2 = scmp.eq.s32.totalorder %s8353_s17, 0  ;;  %s8264_s19 = smov [#allocation3]  }
   0x5   : > { %p8358_p3 = pnand %p6334_p0, %p361_p1  ;;  %s380_s20 = sshll.u32 %s8264_s19, 4  ;;  %s381_s20 = int_to_ptr.vmem [resolvable:$true] %s380_s20 }
   0x6   : > { %s392_s23 = sshll.u32 %s10643_s4, 4  ;;  %s8265_s24 = smov [#allocation5]   ;;  %s393_s23 = int_to_ptr.hbm [resolvable:$true] %s392_s23 }
   0x7   : > { %p8095_p4 = pneg %p8358_p3  ;;  %s394_s25 = sshll.u32 %s8265_s24, 4  ;;  %s395_s25 = int_to_ptr.vmem [resolvable:$true] %s394_s25 }
   0x8   : > { %s8266_s26 = smov 64   ;;  %s8267_s27 = smov 4  }
   0x9   : > { %p8096_p5 = pnand %p8102_p2, %p8095_p4  ;;  %448 = sbr.rel (%p8358_p3) target bundleno = 3193 (0xc79), region = 76 }
   0xb   : > { %8098 = dma.hbm_to_vmem [thread:$0]  (!%p8096_p5), %s379_s16, 9216, %s381_s20, [#allocation4], %s8266_s26, %s8266_s26, %s8267_s27  }
   0xc   : > { %8101 = dma.hbm_to_vmem [thread:$0]  (!%p8096_p5), %s393_s23, 9216, %s395_s25, [#allocation6], %s8266_s26, %s8266_s26, %s8267_s27  }
   0xe   : > { %8253 = dma.done.wait (%p8102_p2), [#allocation4], 9216  }
   0xf   : > { %8255 = vsyncadd (%p8102_p2), [#allocation4], 4294958080 }
  0x10   : > { %8257 = dma.done.wait (%p8102_p2), [#allocation6], 9216  }
  0x11   : > { %8259 = vsyncadd (%p8102_p2), [#allocation6], 4294958080  ;;  %v8268_v0 = vmov 0.0   ;;  %p503_p6 = scmp.lt.s32.totalorder %s8353_s17, 1  ;;  %v7798_v1 = vld [vmem:[%s10640_s1 + $0x78] sm:$0xff]  ;;  %v7797_v5 = vld [vmem:[%s10640_s1 + $0x70] sm:$0xff] }
  0x12   : > { %524 = vst [vmem:[#allocation2] sm:$0xff] %v8268_v0  ;;  %v7790_v2 = vld [vmem:[%s10640_s1 + $0x38] sm:$0xff]  ;;  %794 = vmatpush.bf16.msra.mxu0 %v7798_v1  ;;  %v7789_v6 = vld [vmem:[%s10640_s1 + $0x30] sm:$0xff]  ;;  %v7796_v9 = vld [vmem:[%s10640_s1 + $0x68] sm:$0xff] }
  0x13   : > { %525 = vst [vmem:[#allocation2 + $0x8] sm:$0x3] %v8268_v0  ;;  %v7806_v3 = vld [vmem:[%s10640_s1 + $0xb8] sm:$0xff]  ;;  %s10738_s17 = smov (!%p503_p6, %s8353_s17), 1  ;;  %871 = vmatpush.bf16.msra.mxu1 %v7790_v2  ;;  %v7805_v7 = vld [vmem:[%s10640_s1 + $0xb0] sm:$0xff]  ;;  %v7788_v10 = vld [vmem:[%s10640_s1 + $0x28] sm:$0xff] }
  0x14   : > { %526 = vst [vmem:[#allocation2 + $0x10] sm:$0xff] %v8268_v0  ;;  %v7814_v4 = vld [vmem:[%s10640_s1 + $0xf8] sm:$0xff]  ;;  %977 = vmatpush.bf16.msra.mxu2 %v7806_v3  ;;  %v7813_v8 = vld [vmem:[%s10640_s1 + $0xf0] sm:$0xff]  ;;  %s7781_s15 = sshll.u32 %s10738_s17, 7  ;;  %v7804_v11 = vld [vmem:[%s10640_s1 + $0xa8] sm:$0xff] }
  0x15   : > { %527 = vst [vmem:[#allocation2 + $0x18] sm:$0x3] %v8268_v0  ;;  %1091 = vmatpush.bf16.msra.mxu3 %v7814_v4  ;;  %v7812_v12 = vld [vmem:[%s10640_s1 + $0xe8] sm:$0xff]  ;;  %s8436_s27 = scalar_lea.vmem %s10639_s0, %s7781_s15  ;;  %v7795_v13 = vld [vmem:[%s10640_s1 + $0x60] sm:$0xff]  ;;  %v7794_v21 = vld [vmem:[%s10640_s1 + $0x58] sm:$0xff] }
  0x16   : > { %528 = vst [vmem:[#allocation2 + $0x20] sm:$0xff] %v8268_v0  ;;  %795 = vmatpush.bf16.msra.mxu0 %v7797_v5  ;;  %v7787_v14 = vld [vmem:[%s10640_s1 + $0x20] sm:$0xff]  ;;  %v545_v18 = vld [vmem:[%s8436_s27 + $0x8] sm:$0xff]  ;;  %v7786_v22 = vld [vmem:[%s10640_s1 + $0x18] sm:$0xff] }
  0x17   : > { %529 = vst [vmem:[#allocation2 + $0x28] sm:$0x3] %v8268_v0  ;;  %872 = vmatpush.bf16.msra.mxu1 %v7789_v6  ;;  %v544_v15 = vld [vmem:[%s8436_s27] sm:$0xff]  ;;  %v576_v23 = vunpack.c.l.bf16 %v545_v18  ;;  %v577_v24 = vunpack.c.h.bf16 %v545_v18  ;;  %v546_v25 = vld [vmem:[%s8436_s27 + $0x10] sm:$0xff]  ;;  %v547_v26 = vld [vmem:[%s8436_s27 + $0x18] sm:$0xff] }
  0x18   : > { %530 = vst [vmem:[#allocation2 + $0x30] sm:$0xff] %v8268_v0  ;;  %978 = vmatpush.bf16.msra.mxu2 %v7805_v7  ;;  %v7803_v16 = vld [vmem:[%s10640_s1 + $0xa0] sm:$0xff]  ;;  %v560_v19 = vunpack.c.l.bf16 %v544_v15  ;;  %v561_v20 = vunpack.c.h.bf16 %v544_v15  ;;  %v7802_v27 = vld [vmem:[%s10640_s1 + $0x98] sm:$0xff]  ;;  %v562_v28 = vunpack.c.l.bf16 %v546_v25  ;;  %v563_v29 = vunpack.c.h.bf16 %v546_v25  ;;  %v549_v33 = vld [vmem:[%s8436_s27 + $0x28] sm:$0xff] }
  0x19   : > { %531 = vst [vmem:[#allocation2 + $0x38] sm:$0x3] %v8268_v0  ;;  %1092 = vmatpush.bf16.msra.mxu3 %v7813_v8  ;;  %v7811_v17 = vld [vmem:[%s10640_s1 + $0xe0] sm:$0xff]  ;;  %v578_v30 = vunpack.c.l.bf16 %v547_v26  ;;  %v579_v31 = vunpack.c.h.bf16 %v547_v26  ;;  %v7810_v34 = vld [vmem:[%s10640_s1 + $0xd8] sm:$0xff]  ;;  %v550_v39 = vld [vmem:[%s8436_s27 + $0x30] sm:$0xff]  ;;  %v580_v43 = vunpack.c.l.bf16 %v549_v33  ;;  %v581_v44 = vunpack.c.h.bf16 %v549_v33 }
  0x1a   : > { %532 = vst [vmem:[#allocation2 + $0x40] sm:$0xff] %v8268_v0  ;;  %796 = vmatpush.bf16.msra.mxu0 %v7796_v9  ;;  %v548_v32 = vld [vmem:[%s8436_s27 + $0x20] sm:$0xff]  ;;  %v592_v35 = vmax.f32 %v560_v19, %v576_v23  ;;  %v593_v36 = vmax.f32 %v561_v20, %v577_v24  ;;  %v551_v40 = vld [vmem:[%s8436_s27 + $0x38] sm:$0xff]  ;;  %v553_v46 = vld [vmem:[%s8436_s27 + $0x48] sm:$0xff]  ;;  %v566_v50 = vunpack.c.l.bf16 %v550_v39  ;;  %v567_v51 = vunpack.c.h.bf16 %v550_v39 }
  0x1b   : > { %533 = vst [vmem:[#allocation2 + $0x48] sm:$0x3] %v8268_v0  ;;  %873 = vmatpush.bf16.msra.mxu1 %v7788_v10  ;;  %v564_v37 = vunpack.c.l.bf16 %v548_v32  ;;  %v565_v38 = vunpack.c.h.bf16 %v548_v32  ;;  %v594_v41 = vmax.f32 %v562_v28, %v578_v30  ;;  %v595_v42 = vmax.f32 %v563_v29, %v579_v31  ;;  %v552_v45 = vld [vmem:[%s8436_s27 + $0x40] sm:$0xff]  ;;  %v554_v47 = vld [vmem:[%s8436_s27 + $0x50] sm:$0xff]  ;;  %v555_v5 = vld [vmem:[%s8436_s27 + $0x58] sm:$0xff] }
  0x1c   : > { %534 = vst [vmem:[#allocation2 + $0x50] sm:$0xff] %v8268_v0  ;;  %979 = vmatpush.bf16.msra.mxu2 %v7804_v11  ;;  %v7793_v48 = vld [vmem:[%s10640_s1 + $0x50] sm:$0xff]  ;;  %v608_v49 = vpack.c.bf16 %v593_v36, %v592_v35  ;;  %v582_v52 = vunpack.c.l.bf16 %v551_v40  ;;  %v583_v56 = vunpack.c.h.bf16 %v551_v40  ;;  %v568_v60 = vunpack.c.l.bf16 %v552_v45  ;;  %v7784_v15 = vld [vmem:[%s10640_s1 + $0x8] sm:$0xff]  ;;  %v7791_v33 = vld [vmem:[%s10640_s1 + $0x40] sm:$0xff] }
  0x1d   : > { %535 = vst [vmem:[#allocation2 + $0x58] sm:$0x3] %v8268_v0  ;;  %1093 = vmatpush.bf16.msra.mxu3 %v7812_v12  ;;  %v609_v53 = vpack.c.bf16 %v595_v42, %v594_v41  ;;  %v596_v54 = vmax.f32 %v564_v37, %v580_v43  ;;  %v597_v55 = vmax.f32 %v565_v38, %v581_v44  ;;  %v7785_v57 = vld [vmem:[%s10640_s1 + $0x10] sm:$0xff]  ;;  %v569_v61 = vunpack.c.h.bf16 %v552_v45  ;;  %v7800_v20 = vld [vmem:[%s10640_s1 + $0x88] sm:$0xff]  ;;  %v7807_v39 = vld [vmem:[%s10640_s1 + $0xc0] sm:$0xff] }
  0x1e   : > { %536 = vst [vmem:[#allocation2 + $0x60] sm:$0xff] %v8268_v0  ;;  %797 = vmatpush.bf16.msra.mxu0 %v7795_v13  ;;  %v632_v58 = vrot.slane %v608_v49, 4  ;;  %v598_v59 = vmax.f32 %v566_v50, %v582_v52  ;;  %v7801_v62 = vld [vmem:[%s10640_s1 + $0x90] sm:$0xff]  ;;  %v599_v3 = vmax.f32 %v567_v51, %v583_v56  ;;  %v584_v4 = vunpack.c.l.bf16 %v553_v46  ;;  %v717_v29 = vld [vmem:[#allocation2 + $0x1] sm:$0xff] }
  0x1f   : > { %537 = vst [vmem:[#allocation2 + $0x68] sm:$0x3] %v8268_v0  ;;  %874 = vmatpush.bf16.msra.mxu1 %v7787_v14  ;;  %v7809_v63 = vld [vmem:[%s10640_s1 + $0xd0] sm:$0xff]  ;;  %v633_v1 = vrot.slane %v609_v53, 4  ;;  %v610_v2 = vpack.c.bf16 %v597_v55, %v596_v54  ;;  %v585_v7 = vunpack.c.h.bf16 %v553_v46  ;;  %v570_v8 = vunpack.c.l.bf16 %v554_v47  ;;  %v7792_v14 = vld [vmem:[%s10640_s1 + $0x48] sm:$0xff]  ;;  %v556_v43 = vld [vmem:[%s8436_s27 + $0x60] sm:$0xff] }
  0x20   : > { %538 = vst [vmem:[#allocation2 + $0x70] sm:$0xff] %v8268_v0  ;;  %980 = vmatpush.bf16.msra.mxu2 %v7803_v16  ;;  %v648_v6 = vunpack.c.l.bf16 %v632_v58  ;;  %v571_v9 = vunpack.c.h.bf16 %v554_v47  ;;  %v611_v12 = vpack.c.bf16 %v599_v3, %v598_v59  ;;  %v600_v13 = vmax.f32 %v568_v60, %v584_v4  ;;  %v557_v44 = vld [vmem:[%s8436_s27 + $0x68] sm:$0xff]  ;;  %v7822_v46 = vld [vmem:[%s10640_s1 + $0x138] sm:$0xff] }
  0x21   : > { %539 = vst [vmem:[#allocation2 + $0x78] sm:$0x3] %v8268_v0  ;;  %1094 = vmatpush.bf16.msra.mxu3 %v7811_v17  ;;  %v649_v10 = vunpack.c.l.bf16 %v633_v1  ;;  %v634_v11 = vrot.slane %v610_v2, 4  ;;  %v601_v17 = vmax.f32 %v569_v61, %v585_v7  ;;  %v586_v18 = vunpack.c.l.bf16 %v555_v5  ;;  %v559_v55 = vld [vmem:[%s8436_s27 + $0x78] sm:$0xff] }
  0x22   : > { %540 = vst [vmem:[#allocation2 + $0x80] sm:$0xff] %v8268_v0  ;;  %798 = vmatpush.bf16.msra.mxu0 %v7794_v21  ;;  %v656_v16 = vmax.f32 %v592_v35, %v648_v6  ;;  %v587_v19 = vunpack.c.h.bf16 %v555_v5  ;;  %v7808_v21 = vld [vmem:[%s10640_s1 + $0xc8] sm:$0xff]  ;;  %v635_v24 = vrot.slane %v611_v12, 4  ;;  %v7799_v35 = vld [vmem:[%s10640_s1 + $0x80] sm:$0xff]  ;;  %v572_v49 = vunpack.c.l.bf16 %v556_v43 }
  0x23   : > { %541 = vst [vmem:[#allocation2 + $0x88] sm:$0x3] %v8268_v0  ;;  %875 = vmatpush.bf16.msra.mxu1 %v7786_v22  ;;  %v657_v22 = vmax.f32 %v594_v41, %v649_v10  ;;  %v650_v23 = vunpack.c.l.bf16 %v634_v11  ;;  %v612_v26 = vpack.c.bf16 %v601_v17, %v600_v13  ;;  %v573_v52 = vunpack.c.h.bf16 %v556_v43  ;;  %v900_v5 = vld [vmem:[#allocation2 + $0x2] sm:$0xff] }
  0x24   : > { %542 = vst [vmem:[#allocation2 + $0x90] sm:$0xff] %v8268_v0  ;;  %981 = vmatpush.bf16.msra.mxu2 %v7802_v27  ;;  %v664_v25 = vpack.c.bf16 %v656_v16, %v656_v16  ;;  %v602_v27 = vmax.f32 %v570_v8, %v586_v18  ;;  %v603_v28 = vmax.f32 %v571_v9, %v587_v19  ;;  %v651_v32 = vunpack.c.l.bf16 %v635_v24  ;;  %v7820_v17 = vld [vmem:[%s10640_s1 + $0x128] sm:$0xff]  ;;  %v7837_v24 = vld [vmem:[%s10640_s1 + $0x1b0] sm:$0xff] }
  0x25   : > { %543 = vst [vmem:[#allocation2 + $0x98] sm:$0x3] %v8268_v0  ;;  %1095 = vmatpush.bf16.msra.mxu3 %v7810_v34  ;;  %v665_v30 = vpack.c.bf16 %v657_v22, %v657_v22  ;;  %v658_v31 = vmax.f32 %v596_v54, %v650_v23  ;;  %v7783_v34 = vld [vmem:[%s10640_s1] sm:$0xff]  ;;  %v636_v37 = vrot.slane %v612_v26, 4  ;;  %v588_v53 = vunpack.c.l.bf16 %v557_v44  ;;  %v558_v54 = vld [vmem:[%s8436_s27 + $0x70] sm:$0xff]  ;;  %v7846_v23 = vld [vmem:[%s10640_s1 + $0x1f8] sm:$0xff] }
  0x26   : > { %799 = vmatpush.bf16.msra.mxu0 %v7793_v48  ;;  %v8514_v36 = vunpack.c.l.bf16 %v664_v25  ;;  %v613_v38 = vpack.c.bf16 %v603_v28, %v602_v27  ;;  %v659_v42 = vmax.f32 %v598_v59, %v651_v32  ;;  %v589_v58 = vunpack.c.h.bf16 %v557_v44  ;;  %v7829_v28 = vld [vmem:[%s10640_s1 + $0x170] sm:$0xff]  ;;  %v7836_v32 = vld [vmem:[%s10640_s1 + $0x1a8] sm:$0xff] }
  0x27   : > { %876 = vmatpush.bf16.msra.mxu1 %v7785_v57  ;;  %v8519_v40 = vunpack.c.l.bf16 %v665_v30  ;;  %v666_v41 = vpack.c.bf16 %v658_v31, %v658_v31  ;;  %v652_v47 = vunpack.c.l.bf16 %v636_v37  ;;  %v574_v59 = vunpack.c.l.bf16 %v558_v54  ;;  %v7844_v43 = vld [vmem:[%s10640_s1 + $0x1e8] sm:$0xff] }
  0x28   : > { %982 = vmatpush.bf16.msra.mxu2 %v7801_v62  ;;  %10667 = vst [vmem:[#allocation9_spill] sm:$0xff] %v8514_v36  ;;  %v725_v45 = vpack.c.bf16 %v8514_v36, %v717_v29  ;;  %v637_v48 = vrot.slane %v613_v38, 4  ;;  %v667_v51 = vpack.c.bf16 %v659_v42, %v659_v42  ;;  %v604_v61 = vmax.f32 %v572_v49, %v588_v53  ;;  %v7845_v29 = vld [vmem:[%s10640_s1 + $0x1f0] sm:$0xff]  ;;  %v7828_v38 = vld [vmem:[%s10640_s1 + $0x168] sm:$0xff] }
  0x29   : > { %1096 = vmatpush.bf16.msra.mxu3 %v7809_v63  ;;  %10668 = vst [vmem:[#allocation10_spill] sm:$0xff] %v8519_v40  ;;  %v8529_v50 = vunpack.c.l.bf16 %v666_v41  ;;  %v660_v56 = vmax.f32 %v600_v13, %v652_v47  ;;  %v575_v62 = vunpack.c.h.bf16 %v558_v54  ;;  %v7821_v63 = vld [vmem:[%s10640_s1 + $0x130] sm:$0xff]  ;;  %v605_v3 = vmax.f32 %v573_v52, %v589_v58  ;;  %v7826_v58 = vld [vmem:[%s10640_s1 + $0x158] sm:$0xff] }
  0x2a   : > { %800 = vmatpush.bf16.msra.mxu0 %v7792_v14  ;;  %681 = vst [vmem:[#allocation2 + $0x11] sm:$0xff] %v8514_v36  ;;  %v653_v57 = vunpack.c.l.bf16 %v637_v48  ;;  %v8534_v60 = vunpack.c.l.bf16 %v667_v51  ;;  %v590_v4 = vunpack.c.l.bf16 %v559_v55  ;;  %v591_v6 = vunpack.c.h.bf16 %v559_v55  ;;  %v7817_v49 = vld [vmem:[%s10640_s1 + $0x110] sm:$0xff]  ;;  %v7827_v51 = vld [vmem:[%s10640_s1 + $0x160] sm:$0xff] }
  0x2b   : > { %877 = vmatpush.bf16.msra.mxu1 %v7784_v15  ;;  %682 = vst [vmem:[#allocation2 + $0x21] sm:$0xff] %v8519_v40  ;;  %v668_v1 = vpack.c.bf16 %v660_v56, %v660_v56  ;;  %v614_v9 = vpack.c.bf16 %v605_v3, %v604_v61  ;;  %v8582_v37 = vpack.c.bf16 %v8529_v50, %v8519_v40  ;;  %v7843_v55 = vld [vmem:[%s10640_s1 + $0x1e0] sm:$0xff]  ;;  %v7834_v56 = vld [vmem:[%s10640_s1 + $0x198] sm:$0xff] }
  0x2c   : > { %983 = vmatpush.bf16.msra.mxu2 %v7800_v20  ;;  %10669 = vst [vmem:[#allocation11_spill] sm:$0xff] %v8529_v50  ;;  %v661_v2 = vmax.f32 %v602_v27, %v653_v57  ;;  %v606_v10 = vmax.f32 %v574_v59, %v590_v4  ;;  %v607_v13 = vmax.f32 %v575_v62, %v591_v6  ;;  %v7838_v20 = vld [vmem:[%s10640_s1 + $0x1b8] sm:$0xff]  ;;  %v7819_v27 = vld [vmem:[%s10640_s1 + $0x120] sm:$0xff]  ;;  %v7816_v57 = vld [vmem:[%s10640_s1 + $0x108] sm:$0xff] }
  0x2d   : > { %1097 = vmatpush.bf16.msra.mxu3 %v7808_v21  ;;  %683 = vst [vmem:[#allocation2 + $0x31] sm:$0xff] %v8529_v50  ;;  %v8540_v7 = vunpack.c.l.bf16 %v668_v1  ;;  %v638_v21 = vrot.slane %v614_v9, 4  ;;  %v7833_v59 = vld [vmem:[%s10640_s1 + $0x190] sm:$0xff]  ;;  %v7832_v1 = vld [vmem:[%s10640_s1 + $0x188] sm:$0xff]  ;;  %v7831_v9 = vld [vmem:[%s10640_s1 + $0x180] sm:$0xff] }
  0x2e   : > { %801 = vmatpush.bf16.msra.mxu0 %v7791_v33  ;;  %10670 = vst [vmem:[#allocation12_spill] sm:$0xff] %v8534_v60  ;;  %v669_v8 = vpack.c.bf16 %v661_v2, %v661_v2  ;;  %v615_v22 = vpack.c.bf16 %v607_v13, %v606_v10  ;;  %v7825_v62 = vld [vmem:[%s10640_s1 + $0x150] sm:$0xff]  ;;  %v7824_v4 = vld [vmem:[%s10640_s1 + $0x148] sm:$0xff]  ;;  %v7823_v13 = vld [vmem:[%s10640_s1 + $0x140] sm:$0xff] }
  0x2f   : > { %878 = vmatpush.bf16.msra.mxu1 %v7783_v34  ;;  %684 = vst [vmem:[#allocation2 + $0x41] sm:$0xff] %v8534_v60  ;;  %v654_v25 = vunpack.c.l.bf16 %v638_v21  ;;  %v7841_v2 = vld [vmem:[%s10640_s1 + $0x1d0] sm:$0xff]  ;;  %v727_v3 = vpack.c.bf16 %v8540_v7, %v8534_v60 }
  0x30   : > { %984 = vmatpush.bf16.msra.mxu2 %v7799_v35  ;;  %10671 = vst [vmem:[#allocation13_spill] sm:$0xff] %v8540_v7  ;;  %v8550_v18 = vunpack.c.l.bf16 %v669_v8  ;;  %v639_v26 = vrot.slane %v615_v22, 4  ;;  %v7818_v35 = vld [vmem:[%s10640_s1 + $0x118] sm:$0xff] }
  0x31   : > { %1098 = vmatpush.bf16.msra.mxu3 %v7807_v39  ;;  %802 = vmatmul.bf16.vlgmr.msra.gmra.mxu0 %v725_v45  ;;  %v690_v11 = vld [vmem:[#allocation2 + $0x10] sm:$0xff]  ;;  %685 = vst [vmem:[#allocation2 + $0x51] sm:$0xff] %v8540_v7  ;;  %v662_v30 = vmax.f32 %v604_v61, %v654_v25  ;;  %v7842_v61 = vld [vmem:[%s10640_s1 + $0x1d8] sm:$0xff] }
  0x32   : > { %1205 = vmatpush.bf16.msrb.mxu0 %v7822_v46  ;;  %v8542_v12 = vld [vmem:[#allocation2 + $0x12] sm:$0xff]  ;;  %v697_v14 = vpack.c.bf16 %v690_v11, %v8268_v0  ;;  %v1015_v16 = vld [vmem:[#allocation2 + $0x20] sm:$0xff]  ;;  %10672 = vst [vmem:[#allocation14_spill] sm:$0xff] %v8550_v18  ;;  %v655_v31 = vunpack.c.l.bf16 %v639_v26 }
  0x33   : > { %v908_v15 = vpack.c.bf16 %v8542_v12, %v900_v5  ;;  %v1022_v19 = vpack.c.bf16 %v1015_v16, %v690_v11  ;;  %686 = vst [vmem:[#allocation2 + $0x61] sm:$0xff] %v8550_v18  ;;  %v7830_v0 = vld [vmem:[%s10640_s1 + $0x178] sm:$0xff]  ;;  %v670_v33 = vpack.c.bf16 %v662_v30, %v662_v30  ;;  %v8589_v42 = vld [vmem:[#allocation2 + $0x22] sm:$0xff]  ;;  %v1136_v30 = vpack.c.bf16 %v8519_v40, %v8514_v36 }
  0x34   : > { %879 = vmatmul.bf16.vlgmr.msra.gmra.mxu1 %v697_v14  ;;  %1434 = vmatpush.bf16.msrb.mxu2 %v7838_v20  ;;  %v663_v34 = vmax.f32 %v606_v10, %v655_v31  ;;  %v692_v44 = vld [vmem:[#allocation2 + $0x30] sm:$0xff]  ;;  %v7835_v46 = vld [vmem:[%s10640_s1 + $0x1a0] sm:$0xff]  ;;  %v7840_v11 = vld [vmem:[%s10640_s1 + $0x1c8] sm:$0xff]  ;;  %v1250_v31 = vpack.c.bf16 %v8589_v42, %v8542_v12 }
  0x35   : > { %985 = vmatmul.bf16.vlgmr.msra.gmra.mxu2 %v908_v15  ;;  %1099 = vmatmul.bf16.vlgmr.msra.gmra.mxu3 %v1022_v19  ;;  %v8587_v39 = vunpack.c.l.bf16 %v670_v33  ;;  %v8594_v45 = vld [vmem:[#allocation2 + $0x32] sm:$0xff]  ;;  %v8610_v52 = vpack.c.bf16 %v692_v44, %v1015_v16 }
  0x36   : > { %1206 = vmatpush.bf16.msrb.mxu0 %v7821_v63  ;;  %1319 = vmatpush.bf16.msrb.mxu1 %v7830_v0  ;;  %v671_v41 = vpack.c.bf16 %v663_v34, %v663_v34  ;;  %v1017_v48 = vld [vmem:[#allocation2 + $0x40] sm:$0xff]  ;;  %v8614_v53 = vpack.c.bf16 %v8594_v45, %v8589_v42  ;;  %v7854_v19 = vld [vmem:[%s10640_s1 + $0x238] sm:$0xff]  ;;  %v7853_v20 = vld [vmem:[%s10640_s1 + $0x230] sm:$0xff]  ;;  %v1137_v34 = vpack.c.bf16 %v8534_v60, %v8529_v50 }
  0x37   : > { %1548 = vmatpush.bf16.msrb.mxu3 %v7846_v23  ;;  %10673 = vst [vmem:[#allocation15_spill] sm:$0xff] %v8587_v39  ;;  %v1023_v54 = vpack.c.bf16 %v1017_v48, %v692_v44  ;;  %v7815_v63 = vld [vmem:[%s10640_s1 + $0x100] sm:$0xff]  ;;  %v728_v21 = vpack.c.bf16 %v8587_v39, %v8550_v18  ;;  %v7849_v33 = vld [vmem:[%s10640_s1 + $0x210] sm:$0xff] }
  0x38   : > { %1435 = vmatpush.bf16.msrb.mxu2 %v7837_v24  ;;  %687 = vst [vmem:[#allocation2 + $0x71] sm:$0xff] %v8587_v39  ;;  %v8600_v47 = vunpack.c.l.bf16 %v671_v41  ;;  %v904_v5 = vld [vmem:[#allocation2 + $0x42] sm:$0xff]  ;;  %v694_v6 = vld [vmem:[#allocation2 + $0x50] sm:$0xff] }
  0x39   : > { %v8653_v8 = vld [vmem:[#allocation2 + $0x52] sm:$0xff]  ;;  %v699_v14 = vpack.c.bf16 %v694_v6, %v1017_v48  ;;  %v1251_v12 = vpack.c.bf16 %v904_v5, %v8594_v45 }
  0x3a   : > { %1207 = vmatpush.bf16.msrb.mxu0 %v7820_v17  ;;  %1320 = vmatpush.bf16.msrb.mxu1 %v7829_v28  ;;  %10674 = vst [vmem:[#allocation16_spill] sm:$0xff] %v8600_v47  ;;  %v1019_v10 = vld [vmem:[#allocation2 + $0x60] sm:$0xff]  ;;  %v8665_v15 = vpack.c.bf16 %v8653_v8, %v904_v5  ;;  %v7852_v28 = vld [vmem:[%s10640_s1 + $0x228] sm:$0xff]  ;;  %v1139_v42 = vpack.c.bf16 %v8600_v47, %v8587_v39  ;;  %v1478_v44 = vld [vmem:[#allocation2 + $0x91] sm:$0xff] }
  0x3b   : > { %1549 = vmatpush.bf16.msrb.mxu3 %v7845_v29  ;;  %688 = vst [vmem:[#allocation2 + $0x81] sm:$0xff] %v8600_v47  ;;  %v1024_v16 = vpack.c.bf16 %v1019_v10, %v694_v6  ;;  %v7839_v17 = vld [vmem:[%s10640_s1 + $0x1c0] sm:$0xff]  ;;  %v1482_v48 = vpack.c.bf16 %v1478_v44, %v8600_v47 }
  0x3c   : > { %1436 = vmatpush.bf16.msrb.mxu2 %v7836_v32  ;;  %v906_v0 = vld [vmem:[#allocation2 + $0x62] sm:$0xff]  ;;  %v7850_v32 = vld [vmem:[%s10640_s1 + $0x218] sm:$0xff] }
  0x3d   : > { %v7851_v29 = vld [vmem:[%s10640_s1 + $0x220] sm:$0xff]  ;;  %v1252_v41 = vpack.c.bf16 %v906_v0, %v8653_v8 }
  0x3e   : > { %1208 = vmatpush.bf16.msrb.mxu0 %v7819_v27  ;;  %1321 = vmatpush.bf16.msrb.mxu1 %v7828_v38  ;;  %v1138_v38 = vpack.c.bf16 %v8550_v18, %v8540_v7 }
  0x3f   : > { %1550 = vmatpush.bf16.msrb.mxu3 %v7844_v43  ;;  %v696_v22 = vld [vmem:[#allocation2 + $0x70] sm:$0xff] }
  0x40   : > { %1437 = vmatpush.bf16.msrb.mxu2 %v7835_v46  ;;  %v907_v23 = vld [vmem:[#allocation2 + $0x72] sm:$0xff]  ;;  %v700_v25 = vpack.c.bf16 %v696_v22, %v1019_v10 }
  0x41   : > { %807 = vmatmul.bf16.gmra.mxu0 %v8582_v37  ;;  %v8679_v26 = vpack.c.bf16 %v907_v23, %v906_v0 }
  0x42   : > { %1209 = vmatpush.bf16.msrb.mxu0 %v7818_v35  ;;  %1322 = vmatpush.bf16.msrb.mxu1 %v7827_v51  ;;  %v1021_v24 = vld [vmem:[#allocation2 + $0x80] sm:$0xff]  ;;  %v7848_v35 = vld [vmem:[%s10640_s1 + $0x208] sm:$0xff] }
  0x43   : > { %1551 = vmatpush.bf16.msrb.mxu3 %v7843_v55  ;;  %v1025_v27 = vpack.c.bf16 %v1021_v24, %v696_v22  ;;  %v1249_v43 = vld [vmem:[#allocation2 + $0x82] sm:$0xff]  ;;  %v1368_v45 = vpack.c.bf16 0.0, %v1021_v24 }
  0x44   : > { %884 = vmatmul.bf16.gmra.mxu1 %v8610_v52  ;;  %1438 = vmatpush.bf16.msrb.mxu2 %v7834_v56  ;;  %v1253_v46 = vpack.c.bf16 %v1249_v43, %v907_v23 }
  0x45   : > { %990 = vmatmul.bf16.gmra.mxu2 %v8614_v53  ;;  %1104 = vmatmul.bf16.gmra.mxu3 %v1023_v54 }
  0x46   : > { %1210 = vmatpush.bf16.msrb.mxu0 %v7817_v49  ;;  %1323 = vmatpush.bf16.msrb.mxu1 %v7826_v58 }
  0x47   : > { %1552 = vmatpush.bf16.msrb.mxu3 %v7842_v61 }
  0x48   : > { %1439 = vmatpush.bf16.msrb.mxu2 %v7833_v59 }
  0x4a   : > { %1211 = vmatpush.bf16.msrb.mxu0 %v7816_v57  ;;  %1324 = vmatpush.bf16.msrb.mxu1 %v7825_v62 }
  0x4b   : > { %1553 = vmatpush.bf16.msrb.mxu3 %v7841_v2 }
  0x4c   : > { %1440 = vmatpush.bf16.msrb.mxu2 %v7832_v1 }
  0x4e   : > { %1212 = vmatpush.bf16.msrb.mxu0 %v7815_v63  ;;  %1325 = vmatpush.bf16.msrb.mxu1 %v7824_v4 }
  0x4f   : > { %1554 = vmatpush.bf16.msrb.mxu3 %v7840_v11 }
  0x50   : > { %1441 = vmatpush.bf16.msrb.mxu2 %v7831_v9 }
  0x51   : > { %812 = vmatmul.bf16.gmra.mxu0 %v727_v3 }
  0x52   : > { %1326 = vmatpush.bf16.msrb.mxu1 %v7823_v13  ;;  %1662 = vmatpush.bf16.msra.mxu0 %v7854_v19 }
  0x53   : > { %1555 = vmatpush.bf16.msrb.mxu3 %v7839_v17 }
  0x54   : > { %889 = vmatmul.bf16.gmra.mxu1 %v699_v14 }
  0x55   : > { %995 = vmatmul.bf16.gmra.mxu2 %v8665_v15  ;;  %1109 = vmatmul.bf16.gmra.mxu3 %v1024_v16 }
  0x56   : > { %1663 = vmatpush.bf16.msra.mxu0 %v7853_v20  ;;  %v1592_v20 = vld [vmem:[#allocation2 + $0x92] sm:$0xff] }
  0x57   : > { %v1596_v22 = vpack.c.bf16 %v1592_v20, %v1249_v43 }
  0x5a   : > { %1664 = vmatpush.bf16.msra.mxu0 %v7852_v28 }
  0x5e   : > { %1665 = vmatpush.bf16.msra.mxu0 %v7851_v29 }
  0x61   : > { %817 = vmatmul.bf16.gmra.mxu0 %v728_v21 }
  0x62   : > { %1666 = vmatpush.bf16.msra.mxu0 %v7850_v32 }
  0x64   : > { %894 = vmatmul.bf16.gmra.mxu1 %v700_v25 }
  0x65   : > { %1000 = vmatmul.bf16.gmra.mxu2 %v8679_v26  ;;  %1114 = vmatmul.bf16.gmra.mxu3 %v1025_v27 }
  0x66   : > { %1667 = vmatpush.bf16.msra.mxu0 %v7849_v33 }
  0x6a   : > { %1668 = vmatpush.bf16.msra.mxu0 %v7848_v35 }
  0x71   : > { %1213 = vmatmul.bf16.vlgmr.msrb.gmra.mxu0 %v1136_v30 }
  0x74   : > { %1327 = vmatmul.bf16.vlgmr.msrb.gmra.mxu1 %v1250_v31 }
  0x75   : > { %1442 = vmatmul.bf16.vlgmr.msrb.gmra.mxu2 %v8610_v52  ;;  %1556 = vmatmul.bf16.vlgmr.msrb.gmra.mxu3 %v8582_v37  ;;  %v7847_v37 = vld [vmem:[%s10640_s1 + $0x200] sm:$0xff] }
  0x76   : > { %1669 = vmatpush.bf16.msra.mxu0 %v7847_v37 }
  0x81   : > { %1218 = vmatmul.bf16.gmra.mxu0 %v1137_v34 }
  0x84   : > { %1332 = vmatmul.bf16.gmra.mxu1 %v1251_v12 }
  0x85   : > { %1447 = vmatmul.bf16.gmra.mxu2 %v699_v14  ;;  %1561 = vmatmul.bf16.gmra.mxu3 %v727_v3 }
  0x91   : > { %1223 = vmatmul.bf16.gmra.mxu0 %v1138_v38 }
  0x94   : > { %1337 = vmatmul.bf16.gmra.mxu1 %v1252_v41 }
  0x95   : > { %1452 = vmatmul.bf16.gmra.mxu2 %v700_v25  ;;  %1566 = vmatmul.bf16.gmra.mxu3 %v728_v21 }
  0xa1   : > { %1228 = vmatmul.bf16.gmra.mxu0 %v1139_v42 }
  0xa4   : > { %1342 = vmatmul.bf16.gmra.mxu1 %v1253_v46 }
  0xa5   : > { %1457 = vmatmul.bf16.gmra.mxu2 %v1368_v45  ;;  %1571 = vmatmul.bf16.gmra.mxu3 %v1482_v48 }
  0xae   : > { %v803_v49 = vpop.f32.mrf.mxu0 }
  0xb1   : > { %1670 = vmatmul.bf16.vlgmr.msra.gmra.mxu0 %v8614_v53  ;;  %v880_v51 = vpop.f32.mrf.mxu1 }
  0xb2   : > { %v881_v52 = vadd.f32 %v880_v51, %v803_v49 }
  0xb6   : > { %v8716_v54 = vpop.f32.mrf.mxu0 }
  0xb8   : > { %v986_v55 = vpop.f32.mrf.mxu2  ;;  %v1100_v57 = vpop.f32.mrf.mxu3 }
  0xb9   : > { %v1006_v56 = vadd.f32 %v986_v55, %v881_v52  ;;  %v8718_v58 = vpop.f32.mrf.mxu1 }
  0xbb   : > { %v1120_v59 = vadd.f32 %v1100_v57, %v1006_v56 }
  0xbe   : > { %v808_v61 = vpop.f32.mrf.mxu0 }
  0xc0   : > { %v8720_v62 = vpop.f32.mrf.mxu2  ;;  %v8723_v63 = vpop.f32.mrf.mxu3 }
  0xc1   : > { %1675 = vmatmul.bf16.gmra.mxu0 %v8665_v15  ;;  %v885_v1 = vpop.f32.mrf.mxu1 }
  0xc2   : > { %v886_v2 = vadd.f32 %v885_v1, %v808_v61 }
  0xc6   : > { %v8725_v53 = vpop.f32.mrf.mxu0 }
  0xc8   : > { %v991_v3 = vpop.f32.mrf.mxu2  ;;  %v1105_v5 = vpop.f32.mrf.mxu3 }
  0xc9   : > { %v1008_v4 = vadd.f32 %v991_v3, %v886_v2  ;;  %v887_v6 = vpop.f32.mrf.mxu1 }
  0xcb   : > { %v1122_v8 = vadd.f32 %v1105_v5, %v1008_v4 }
  0xce   : > { %v813_v9 = vpop.f32.mrf.mxu0 }
  0xd0   : > { %v993_v10 = vpop.f32.mrf.mxu2  ;;  %v1107_v11 = vpop.f32.mrf.mxu3 }
  0xd1   : > { %1680 = vmatmul.bf16.gmra.mxu0 %v8679_v26  ;;  %v890_v13 = vpop.f32.mrf.mxu1 }
  0xd2   : > { %v891_v14 = vadd.f32 %v890_v13, %v813_v9 }
  0xd6   : > { %v815_v16 = vpop.f32.mrf.mxu0 }
  0xd8   : > { %v996_v15 = vpop.f32.mrf.mxu2  ;;  %v1110_v19 = vpop.f32.mrf.mxu3 }
  0xd9   : > { %v1010_v17 = vadd.f32 %v996_v15, %v891_v14  ;;  %v892_v28 = vpop.f32.mrf.mxu1  ;;  %v883_v14 = vadd.f32 %v8718_v58, %v8716_v54 }
  0xdb   : > { %v1124_v21 = vadd.f32 %v1110_v19, %v1010_v17  ;;  %v1007_v17 = vadd.f32 %v8720_v62, %v883_v14  ;;  %v888_v19 = vadd.f32 %v887_v6, %v8725_v53 }
  0xde   : > { %v818_v0 = vpop.f32.mrf.mxu0 }
  0xe0   : > { %v998_v29 = vpop.f32.mrf.mxu2  ;;  %v1112_v30 = vpop.f32.mrf.mxu3 }
  0xe1   : > { %1685 = vmatmul.bf16.gmra.mxu0 %v1596_v22  ;;  %v895_v32 = vpop.f32.mrf.mxu1 }
  0xe2   : > { %v896_v60 = vadd.f32 %v895_v32, %v818_v0 }
  0xe6   : > { %v820_v23 = vpop.f32.mrf.mxu0 }
  0xe8   : > { %v1001_v33 = vpop.f32.mrf.mxu2  ;;  %v1115_v12 = vpop.f32.mrf.mxu3 }
  0xe9   : > { %v897_v35 = vpop.f32.mrf.mxu1  ;;  %v1012_v40 = vadd.f32 %v1001_v33, %v896_v60 }
  0xea   : > { %v898_v36 = vadd.f32 %v897_v35, %v820_v23 }
  0xee   : > { %v1214_v24 = vpop.f32.mrf.mxu0 }
  0xef   : > { %v1234_v25 = vadd.f32 %v1214_v24, %v1120_v59  ;;  %v1121_v24 = vadd.f32 %v8723_v63, %v1007_v17 }
  0xf0   : > { %v1003_v37 = vpop.f32.mrf.mxu2  ;;  %v1117_v42 = vpop.f32.mrf.mxu3 }
  0xf1   : > { %v1328_v43 = vpop.f32.mrf.mxu1 }
  0xf2   : > { %v1348_v14 = vadd.f32 %v1328_v43, %v1234_v25 }
  0xf6   : > { %v1216_v27 = vpop.f32.mrf.mxu0 }
  0xf8   : > { %v1443_v45 = vpop.f32.mrf.mxu2  ;;  %v1557_v46 = vpop.f32.mrf.mxu3 }
  0xf9   : > { %v1330_v49 = vpop.f32.mrf.mxu1 }
  0xfe   : > { %v1219_v26 = vpop.f32.mrf.mxu0 }
  0xff   : > { %v1236_v31 = vadd.f32 %v1219_v26, %v1122_v8  ;;  %v893_v26 = vadd.f32 %v892_v28, %v815_v16  ;;  %v1126_v16 = vadd.f32 %v1115_v12, %v1012_v40 }
 0x100   : > { %v1445_v51 = vpop.f32.mrf.mxu2  ;;  %v1559_v52 = vpop.f32.mrf.mxu3 }
 0x101   : > { %v1333_v56 = vpop.f32.mrf.mxu1  ;;  %v1011_v39 = vadd.f32 %v998_v29, %v893_v26  ;;  %v516_v26 = vlaneseq }
 0x102   : > { %v1350_v6 = vadd.f32 %v1333_v56, %v1236_v31 }
 0x103   : > { %v1125_v58 = vadd.f32 %v1112_v30, %v1011_v39 }
 0x106   : > { %v1221_v34 = vpop.f32.mrf.mxu0 }
 0x108   : > { %v1448_v57 = vpop.f32.mrf.mxu2  ;;  %v1562_v61 = vpop.f32.mrf.mxu3 }
 0x109   : > { %v1335_v1 = vpop.f32.mrf.mxu1 }
 0x10e   : > { %v1224_v38 = vpop.f32.mrf.mxu0 }
 0x10f   : > { %v1238_v41 = vadd.f32 %v1224_v38, %v1124_v21  ;;  %v1009_v21 = vadd.f32 %v993_v10, %v888_v19  ;;  %v1235_v38 = vadd.f32 %v1216_v27, %v1121_v24  ;;  %v1013_v10 = vadd.f32 %v1003_v37, %v898_v36 }
 0x110   : > { %v1450_v2 = vpop.f32.mrf.mxu2  ;;  %v1564_v4 = vpop.f32.mrf.mxu3  ;;  %v1463_v27 = vadd.f32 %v1443_v45, %v1348_v14 }
 0x111   : > { %v1338_v5 = vpop.f32.mrf.mxu1  ;;  %v1123_v47 = vadd.f32 %v1107_v11, %v1009_v21  ;;  %v1349_v54 = vadd.f32 %v1330_v49, %v1235_v38  ;;  %v1465_v11 = vadd.f32 %v1448_v57, %v1350_v6  ;;  %v1127_v60 = vadd.f32 %v1117_v42, %v1013_v10 }
 0x112   : > { %v1352_v0 = vadd.f32 %v1338_v5, %v1238_v41  ;;  %v1577_v23 = vadd.f32 %v1557_v46, %v1463_v27  ;;  %v8733_v38 = vand.u32 127, %v516_v26 }
 0x113   : > { %v1237_v50 = vadd.f32 %v1221_v34, %v1123_v47  ;;  %v1464_v53 = vadd.f32 %v1445_v51, %v1349_v54  ;;  %v1579_v30 = vadd.f32 %v1562_v61, %v1465_v11 }
 0x114   : > { %10675 = vst [vmem:[#allocation17_spill] sm:$0xff] %v8733_v38  ;;  %vm518_vm0 = vcmp.lt.s32.totalorder %v8733_v38, 4 }
 0x115   : > { %v1351_v19 = vadd.f32 %v1335_v1, %v1237_v50  ;;  %v1578_v21 = vadd.f32 %v1559_v52, %v1464_v53 }
 0x116   : > { %v1226_v44 = vpop.f32.mrf.mxu0 }
 0x117   : > { %v1239_v17 = vadd.f32 %v1226_v44, %v1125_v58  ;;  %v1466_v28 = vadd.f32 %v1450_v2, %v1351_v19 }
 0x118   : > { %v1453_v9 = vpop.f32.mrf.mxu2  ;;  %v1567_v13 = vpop.f32.mrf.mxu3 }
 0x119   : > { %v1340_v20 = vpop.f32.mrf.mxu1  ;;  %v1467_v25 = vadd.f32 %v1453_v9, %v1352_v0  ;;  %v1580_v31 = vadd.f32 %v1564_v4, %v1466_v28 }
 0x11a   : > { %v1353_v32 = vadd.f32 %v1340_v20, %v1239_v17 }
 0x11b   : > { %v1581_v37 = vadd.f32 %v1567_v13, %v1467_v25 }
 0x11e   : > { %v1229_v48 = vpop.f32.mrf.mxu0 }
 0x11f   : > { %v1240_v47 = vadd.f32 %v1229_v48, %v1126_v16 }
 0x120   : > { %v1455_v22 = vpop.f32.mrf.mxu2  ;;  %v1569_v18 = vpop.f32.mrf.mxu3 }
 0x121   : > { %v1343_v62 = vpop.f32.mrf.mxu1  ;;  %v1468_v36 = vadd.f32 %v1455_v22, %v1353_v32 }
 0x122   : > { %v1354_v50 = vadd.f32 %v1343_v62, %v1240_v47  ;;  %v8736_v62 = vld [vmem:[#allocation2] sm:$0xff] }
 0x123   : > { %v1582_v42 = vadd.f32 %v1569_v18, %v1468_v36  ;;  %v8739_v14 = vsel %vm518_vm0, 1.0, %v8736_v62 }
 0x124   : > { %10676 = vst [vmem:[#allocation18_spill] sm:$0xff] %v8739_v14 }
 0x126   : > { %v1231_v55 = vpop.f32.mrf.mxu0 }
 0x127   : > { %v1241_v34 = vadd.f32 %v1231_v55, %v1127_v60 }
 0x128   : > { %v1458_v63 = vpop.f32.mrf.mxu2  ;;  %v1572_v39 = vpop.f32.mrf.mxu3 }
 0x129   : > { %v1345_v12 = vpop.f32.mrf.mxu1  ;;  %v1469_v43 = vadd.f32 %v1458_v63, %v1354_v50 }
 0x12a   : > { %v1355_v49 = vadd.f32 %v1345_v12, %v1241_v34 }
 0x12b   : > { %v1583_v52 = vadd.f32 %v1572_v39, %v1469_v43 }
 0x12e   : > { %v1671_v59 = vpop.f32.mrf.mxu0 }
 0x12f   : > { %v1691_v35 = vadd.f32 %v1671_v59, %v1577_v23 }
 0x130   : > { %v1460_v41 = vpop.f32.mrf.mxu2  ;;  %v1574_v1 = vpop.f32.mrf.mxu3 }
 0x131   : > { %v1470_v56 = vadd.f32 %v1460_v41, %v1355_v49 }
 0x133   : > { %v1584_v59 = vadd.f32 %v1574_v1, %v1470_v56 }
 0x136   : > { %v1673_v3 = vpop.f32.mrf.mxu0 }
 0x137   : > { %v1692_v33 = vadd.f32 %v1673_v3, %v1578_v21 }
 0x139   : > { %v1699_v44 = vadd.f32 %v1692_v33, %v1691_v35 }
 0x13e   : > { %v1676_v8 = vpop.f32.mrf.mxu0 }
 0x13f   : > { %v1693_v40 = vadd.f32 %v1676_v8, %v1579_v30 }
 0x141   : > { %v1700_v51 = vadd.f32 %v1699_v44, %v1693_v40 }
 0x146   : > { %v1678_v15 = vpop.f32.mrf.mxu0 }
 0x147   : > { %v1694_v45 = vadd.f32 %v1678_v15, %v1580_v31 }
 0x149   : > { %v1701_v57 = vadd.f32 %v1700_v51, %v1694_v45 }
 0x14e   : > { %v1681_v7 = vpop.f32.mrf.mxu0 }
 0x14f   : > { %v1695_v46 = vadd.f32 %v1681_v7, %v1581_v37 }
 0x151   : > { %v1702_v2 = vadd.f32 %v1701_v57, %v1695_v46 }
 0x156   : > { %v1683_v29 = vpop.f32.mrf.mxu0 }
 0x157   : > { %v1696_v61 = vadd.f32 %v1683_v29, %v1582_v42 }
 0x159   : > { %v1703_v3 = vadd.f32 %v1702_v2, %v1696_v61 }
 0x15e   : > { %v1686_v48 = vpop.f32.mrf.mxu0 }
 0x15f   : > { %v1697_v55 = vadd.f32 %v1686_v48, %v1583_v52 }
 0x161   : > { %v1704_v8 = vadd.f32 %v1703_v3, %v1697_v55 }
 0x166   : > { %v1688_v4 = vpop.f32.mrf.mxu0 }
 0x167   : > { %v1698_v5 = vadd.f32 %v1688_v4, %v1584_v59  ;;  %v8764_v4 = vld [vmem:[%s10644_s5] ss:$0 sm:$0xff] }
 0x169   : > { %v1705_v9 = vadd.f32 %v1704_v8, %v1698_v5 }
 0x16b   : > { %1706 = vadd.xlane.f32.xlu0 %v1705_v9 }
 0x1de   : > { %v1707_v13 = vpop.xlane.xlu0 %1706 }
 0x1df   : > { %v1708_v15 = vrot.slane %v1707_v13, 4 }
 0x1e1   : > { %v1709_v18 = vadd.f32 %v1708_v15, %v1707_v13 }
 0x1e3   : > { %v1710_v20 = vrot.slane %v1709_v18, 2 }
 0x1e5   : > { %v1711_v22 = vadd.f32 %v1710_v20, %v1709_v18  ;;  %v8775_v18 = vld [vmem:[%s10645_s6] ss:$0 sm:$0xff] }
 0x1e7   : > { %v1712_v7 = vrot.slane %v1711_v22, 1 }
 0x1e9   : > { %v1713_v24 = vadd.f32 %v1712_v7, %v1711_v22 }
 0x1eb   : > { %8071 = vpush %v1713_v24 }
 0x21c   : > { %s8072_s24 = spop %8071 }
 0x21d   : > { %v1715_v54 = vstv %s8072_s24 }
 0x21e   : > { %v1716_v58 = vmul.f32 0.00390625, %v1715_v54 }
 0x220   : > { %v1717_v53 = vsub.f32 %v1691_v35, %v1716_v58  ;;  %v1718_v6 = vsub.f32 %v1692_v33, %v1716_v58  ;;  %v1719_v10 = vsub.f32 %v1693_v40, %v1716_v58  ;;  %v1720_v19 = vsub.f32 %v1694_v45, %v1716_v58 }
 0x221   : > { %v8741_v17 = vsub.f32 %v1695_v46, %v1716_v58  ;;  %v8746_v11 = vsub.f32 %v1696_v61, %v1716_v58  ;;  %v8749_v0 = vsub.f32 %v1697_v55, %v1716_v58  ;;  %v8753_v39 = vsub.f32 %v1698_v5, %v1716_v58 }
 0x222   : > { %v1725_v63 = vmul.f32 %v8739_v14, %v1717_v53  ;;  %v1726_v16 = vmul.f32 %v8739_v14, %v1718_v6  ;;  %v1727_v27 = vmul.f32 %v8739_v14, %v1719_v10  ;;  %v1728_v28 = vmul.f32 %v8739_v14, %v1720_v19 }
 0x223   : > { %v1729_v47 = vmul.f32 %v8739_v14, %v8741_v17  ;;  %v1730_v23 = vmul.f32 %v8739_v14, %v8746_v11  ;;  %v1731_v33 = vmul.f32 %v8739_v14, %v8749_v0  ;;  %v1732_v50 = vmul.f32 %v8739_v14, %v8753_v39 }
 0x224   : > { %v1733_v29 = vmul.f32 %v1725_v63, %v1725_v63  ;;  %v1734_v21 = vmul.f32 %v1726_v16, %v1726_v16  ;;  %v1735_v60 = vmul.f32 %v1727_v27, %v1727_v27  ;;  %v1736_v30 = vmul.f32 %v1728_v28, %v1728_v28 }
 0x225   : > { %v1737_v31 = vmul.f32 %v1729_v47, %v1729_v47  ;;  %v1738_v34 = vmul.f32 %v1730_v23, %v1730_v23  ;;  %v1739_v40 = vmul.f32 %v1731_v33, %v1731_v33  ;;  %v1740_v37 = vmul.f32 %v1732_v50, %v1732_v50 }
 0x226   : > { %v1741_v32 = vadd.f32 %v1734_v21, %v1733_v29 }
 0x228   : > { %v1742_v25 = vadd.f32 %v1741_v32, %v1735_v60 }
 0x22a   : > { %v1743_v36 = vadd.f32 %v1742_v25, %v1736_v30 }
 0x22c   : > { %v1744_v35 = vadd.f32 %v1743_v36, %v1737_v31 }
 0x22e   : > { %v1745_v12 = vadd.f32 %v1744_v35, %v1738_v34 }
 0x230   : > { %v1746_v43 = vadd.f32 %v1745_v12, %v1739_v40 }
 0x232   : > { %v1747_v44 = vadd.f32 %v1746_v43, %v1740_v37 }
 0x234   : > { %1748 = vadd.xlane.f32.xlu0 %v1747_v44 }
 0x2a7   : > { %v1749_v45 = vpop.xlane.xlu0 %1748 }
 0x2a8   : > { %v1750_v41 = vrot.slane %v1749_v45, 4 }
 0x2aa   : > { %v1751_v48 = vadd.f32 %v1750_v41, %v1749_v45 }
 0x2ac   : > { %v1752_v42 = vrot.slane %v1751_v48, 2 }
 0x2ae   : > { %v1753_v49 = vadd.f32 %v1752_v42, %v1751_v48 }
 0x2b0   : > { %v1754_v51 = vrot.slane %v1753_v49, 1 }
 0x2b2   : > { %v1755_v46 = vadd.f32 %v1754_v51, %v1753_v49 }
 0x2b4   : > { %8073 = vpush %v1755_v46 }
 0x2e5   : > { %s8074_s25 = spop %8073 }
 0x2e6   : > { %v1757_v52 = vstv %s8074_s25 }
 0x2e7   : > { %v1758_v56 = vmul.f32 0.00390625, %v1757_v52 }
 0x2e9   : > { %v1759_v57 = vadd.f32 1e-05, %v1758_v56 }
 0x2eb   : > { %8128 = vrsqrt.f32 %v1759_v57  ;;  %vm1766_vm2 = vweird.f32 %v1759_v57 }
 0x2f1   : > { %v8129_v61 = vpop.eup %8128 }
 0x2f2   : > { %v1761_v1 = vmul.f32 %v8129_v61, %v1759_v57  ;;  %vm1767_vm1 = vweird.f32 %v8129_v61 }
 0x2f3   : > { %vm1768_vm3 = vmor %vm1766_vm2, %vm1767_vm1 }
 0x2f4   : > { %v1762_v2 = vmul.f32 %v8129_v61, %v1761_v1 }
 0x2f6   : > { %v1763_v55 = vmul.f32 0.5, %v1762_v2 }
 0x2f8   : > { %v1764_v59 = vsub.f32 1.5, %v1763_v55 }
 0x2fa   : > { %v1765_v3 = vmul.f32 %v8129_v61, %v1764_v59 }
 0x2fc   : > { %v8766_v5 = vsel %vm1768_vm3, %v8129_v61, %v1765_v3 }
 0x2fd   : > { %v1770_v8 = vmul.f32 %v8766_v5, %v1717_v53  ;;  %v1771_v9 = vmul.f32 %v8766_v5, %v1718_v6  ;;  %v1772_v13 = vmul.f32 %v8766_v5, %v1719_v10  ;;  %v1773_v15 = vmul.f32 %v8766_v5, %v1720_v19 }
 0x2fe   : > { %v1774_v60 = vmul.f32 %v8766_v5, %v8741_v17  ;;  %v1775_v34 = vmul.f32 %v8766_v5, %v8746_v11 }
 0x2ff   : > { %v1782_v20 = vmul.f32 %v8764_v4, %v1770_v8  ;;  %v1783_v22 = vmul.f32 %v8764_v4, %v1771_v9  ;;  %v1784_v7 = vmul.f32 %v8764_v4, %v1772_v13  ;;  %v1785_v24 = vmul.f32 %v8764_v4, %v1773_v15 }
 0x300   : > { %v1786_v12 = vmul.f32 %v8764_v4, %v1774_v60  ;;  %v1787_v61 = vmul.f32 %v8764_v4, %v1775_v34 }
 0x301   : > { %v8782_v26 = vadd.f32 %v8775_v18, %v1782_v20  ;;  %v8785_v54 = vadd.f32 %v8775_v18, %v1783_v22  ;;  %v8788_v58 = vadd.f32 %v8775_v18, %v1784_v7  ;;  %v8791_v53 = vadd.f32 %v8775_v18, %v1785_v24 }
 0x302   : > { %v8842_v59 = vadd.f32 %v8775_v18, %v1786_v12  ;;  %v8853_v60 = vadd.f32 %v8775_v18, %v1787_v61 }
 0x303   : > { %v8794_v6 = vmul.f32 0.70710677, %v8782_v26  ;;  %v8797_v10 = vmul.f32 0.70710677, %v8785_v54  ;;  %v8800_v19 = vmul.f32 0.70710677, %v8788_v58 }
 0x304   : > { %v8803_v63 = vmul.f32 0.70710677, %v8791_v53 }
 0x305   : > { %v1818_v16 = vmul.f32 %v8794_v6, %v8794_v6  ;;  %v1858_v27 = vmul.f32 %v8797_v10, %v8797_v10  ;;  %v1898_v28 = vmul.f32 %v8800_v19, %v8800_v19 }
 0x306   : > { %v1938_v29 = vmul.f32 %v8803_v63, %v8803_v63 }
 0x307   : > { %v8813_v21 = vmin.f32 %v1818_v16, 16.0  ;;  %v8815_v47 = vmin.f32 %v1858_v27, 16.0  ;;  %v8819_v32 = vmin.f32 %v1898_v28, 16.0 }
 0x308   : > { %v8821_v23 = vmin.f32 %v1938_v29, 16.0 }
 0x309   : > { %v1820_v30 = vmul.f32 2.1237322e-06, %v8813_v21  ;;  %v1831_v25 = vmul.f32 3.8918573e-05, %v8813_v21  ;;  %v1860_v33 = vmul.f32 2.1237322e-06, %v8815_v47 }
 0x30a   : > { %v1871_v31 = vmul.f32 3.8918573e-05, %v8815_v47  ;;  %v1900_v36 = vmul.f32 2.1237322e-06, %v8819_v32  ;;  %v1911_v50 = vmul.f32 3.8918573e-05, %v8819_v32 }
 0x30b   : > { %v1821_v17 = vadd.f32 0.00028619796, %v1820_v30  ;;  %v1832_v35 = vadd.f32 0.001143296, %v1831_v25  ;;  %v1861_v40 = vadd.f32 0.00028619796, %v1860_v33 }
 0x30c   : > { %v1872_v37 = vadd.f32 0.001143296, %v1871_v31  ;;  %v1901_v43 = vadd.f32 0.00028619796, %v1900_v36  ;;  %v1912_v44 = vadd.f32 0.001143296, %v1911_v50 }
 0x30d   : > { %v1822_v45 = vmul.f32 %v1821_v17, %v8813_v21  ;;  %v1833_v41 = vmul.f32 %v1832_v35, %v8813_v21  ;;  %v1862_v48 = vmul.f32 %v1861_v40, %v8815_v47  ;;  %v1940_v42 = vmul.f32 2.1237322e-06, %v8821_v23 }
 0x30e   : > { %v1873_v49 = vmul.f32 %v1872_v37, %v8815_v47  ;;  %v1902_v11 = vmul.f32 %v1901_v43, %v8819_v32  ;;  %v1913_v51 = vmul.f32 %v1912_v44, %v8819_v32  ;;  %v1951_v46 = vmul.f32 3.8918573e-05, %v8821_v23 }
 0x30f   : > { %v1823_v52 = vadd.f32 0.0036580483, %v1822_v45  ;;  %v1834_v56 = vadd.f32 0.014752088, %v1833_v41  ;;  %v1863_v57 = vadd.f32 0.0036580483, %v1862_v48  ;;  %v1776_v17 = vmul.f32 %v8766_v5, %v8749_v0 }
 0x310   : > { %v1874_v1 = vadd.f32 0.014752088, %v1873_v49  ;;  %v1903_v2 = vadd.f32 0.0036580483, %v1902_v11  ;;  %v1914_v55 = vadd.f32 0.014752088, %v1913_v51  ;;  %v1777_v35 = vmul.f32 %v8766_v5, %v8753_v39 }
 0x311   : > { %v1824_v3 = vmul.f32 %v1823_v52, %v8813_v21  ;;  %v1835_v8 = vmul.f32 %v1834_v56, %v8813_v21  ;;  %v1941_v9 = vadd.f32 0.00028619796, %v1940_v42  ;;  %v1864_v13 = vmul.f32 %v1863_v57, %v8815_v47 }
 0x312   : > { %v1875_v15 = vmul.f32 %v1874_v1, %v8815_v47  ;;  %v1915_v20 = vmul.f32 %v1914_v55, %v8819_v32  ;;  %v1952_v22 = vadd.f32 0.001143296, %v1951_v46  ;;  %v1904_v24 = vmul.f32 %v1903_v2, %v8819_v32 }
 0x313   : > { %v1836_v7 = vadd.f32 0.112945676, %v1835_v8  ;;  %v1942_v28 = vmul.f32 %v1941_v9, %v8821_v23  ;;  %v8856_v30 = vmul.f32 0.70710677, %v8842_v59  ;;  %v1825_v25 = vadd.f32 0.05243302, %v1824_v3 }
 0x314   : > { %v1876_v16 = vadd.f32 0.112945676, %v1875_v15  ;;  %v1916_v27 = vadd.f32 0.112945676, %v1915_v20  ;;  %v1953_v29 = vmul.f32 %v1952_v22, %v8821_v23  ;;  %v1865_v31 = vadd.f32 0.05243302, %v1864_v13 }
 0x315   : > { %v1837_v33 = vmul.f32 %v1836_v7, %v8813_v21  ;;  %v1905_v12 = vadd.f32 0.05243302, %v1904_v24  ;;  %v1943_v44 = vadd.f32 0.0036580483, %v1942_v28  ;;  %v8867_v41 = vmul.f32 0.70710677, %v8853_v60 }
 0x316   : > { %v1877_v36 = vmul.f32 %v1876_v16, %v8815_v47  ;;  %v1917_v50 = vmul.f32 %v1916_v27, %v8819_v32  ;;  %v1954_v34 = vadd.f32 0.014752088, %v1953_v29  ;;  %v1826_v48 = vmul.f32 %v1825_v25, %v8813_v21 }
 0x317   : > { %v1838_v40 = vadd.f32 0.4994258, %v1837_v33  ;;  %v1978_v0 = vmul.f32 %v8856_v30, %v8856_v30  ;;  %v1866_v49 = vmul.f32 %v1865_v31, %v8815_v47  ;;  %v1788_v51 = vmul.f32 %v8764_v4, %v1776_v17 }
 0x318   : > { %v1878_v37 = vadd.f32 0.4994258, %v1877_v36  ;;  %v1918_v43 = vadd.f32 0.4994258, %v1917_v50  ;;  %v1955_v45 = vmul.f32 %v1954_v34, %v8821_v23  ;;  %v1906_v52 = vmul.f32 %v1905_v12, %v8819_v32 }
 0x319   : > { %v1839_v42 = vmul.f32 %v1838_v40, %v8813_v21  ;;  %v1789_v56 = vmul.f32 %v8764_v4, %v1777_v35  ;;  %v1944_v1 = vmul.f32 %v1943_v44, %v8821_v23  ;;  %v1827_v2 = vadd.f32 0.18741608, %v1826_v48 }
 0x31a   : > { %v1879_v39 = vmul.f32 %v1878_v37, %v8815_v47  ;;  %v1919_v5 = vmul.f32 %v1918_v43, %v8819_v32  ;;  %v1956_v11 = vadd.f32 0.112945676, %v1955_v45  ;;  %v2018_v55 = vmul.f32 %v8867_v41, %v8867_v41 }
 0x31b   : > { %v8877_v46 = vadd.f32 1.0, %v1839_v42  ;;  %v1867_v3 = vadd.f32 0.18741608, %v1866_v49  ;;  %v8891_v9 = vmin.f32 %v1978_v0, 16.0  ;;  %v8894_v4 = vadd.f32 %v8775_v18, %v1788_v51 }
 0x31c   : > { %v8881_v57 = vadd.f32 1.0, %v1879_v39  ;;  %v8883_v61 = vadd.f32 1.0, %v1919_v5  ;;  %v1957_v8 = vmul.f32 %v1956_v11, %v8821_v23  ;;  %v1907_v13 = vadd.f32 0.18741608, %v1906_v52 }
 0x31d   : > { %8130 = vrcp.f32 %v8877_v46  ;;  %v8897_v15 = vadd.f32 %v8775_v18, %v1789_v56  ;;  %v8900_v20 = vmul.f32 0.5, %v8782_v26  ;;  %v1945_v22 = vadd.f32 0.05243302, %v1944_v1 }
 0x31e   : > { %8132 = vrcp.f32 %v8881_v57  ;;  %v8904_v7 = vmul.f32 0.5, %v8785_v54  ;;  %v8907_v24 = vmul.f32 0.5, %v8788_v58  ;;  %v1828_v16 = vmul.f32 %v1827_v2, %v8813_v21 }
 0x31f   : > { %8134 = vrcp.f32 %v8883_v61  ;;  %v8910_v27 = vmin.f32 %v2018_v55, 16.0  ;;  %v8913_v28 = vmul.f32 0.5, %v8791_v53  ;;  %v1868_v18 = vmul.f32 %v1867_v3, %v8815_v47 }
 0x320   : > { %v1958_v26 = vadd.f32 0.4994258, %v1957_v8  ;;  %v1980_v29 = vmul.f32 2.1237322e-06, %v8891_v9  ;;  %v8920_v54 = vmul.f32 0.5, %v8842_v59  ;;  %v1908_v21 = vmul.f32 %v1907_v13, %v8819_v32 }
 0x321   : > { %v8923_v58 = vmul.f32 0.70710677, %v8894_v4  ;;  %v1991_v33 = vmul.f32 3.8918573e-05, %v8891_v9  ;;  %v1946_v47 = vmul.f32 %v1945_v22, %v8821_v23  ;;  %v8934_v59 = vmul.f32 0.70710677, %v8897_v15 }
 0x322   : > { %v1959_v36 = vmul.f32 %v1958_v26, %v8821_v23  ;;  %v1981_v50 = vadd.f32 0.00028619796, %v1980_v29  ;;  %v1829_v34 = vadd.f32 1.1283791, %v1828_v16  ;;  %v2020_v17 = vmul.f32 2.1237322e-06, %v8910_v27 }
 0x323   : > { %v8917_v25 = vpop.eup %8130  ;;  %v1869_v32 = vadd.f32 1.1283791, %v1868_v18  ;;  %v1992_v37 = vadd.f32 0.001143296, %v1991_v33  ;;  %v1909_v44 = vadd.f32 1.1283791, %v1908_v21  ;;  %v2058_v48 = vmul.f32 %v8923_v58, %v8923_v58 }
 0x324   : > { %v8927_v31 = vpop.eup %8132  ;;  %v1842_v53 = vmul.f32 %v8917_v25, %v8877_v46  ;;  %v8939_v40 = vadd.f32 1.0, %v1959_v36  ;;  %v1982_v12 = vmul.f32 %v1981_v50, %v8891_v9  ;;  %v1852_v0 = vand.u32 2147483648, %v8877_v46 }
 0x325   : > { %v8937_v35 = vpop.eup %8134  ;;  %v1882_v43 = vmul.f32 %v8927_v31, %v8881_v57  ;;  %v1947_v49 = vadd.f32 0.18741608, %v1946_v47  ;;  %v8951_v39 = vmul.f32 %v1829_v34, %v8794_v6  ;;  %v1850_v5 = vand.u32 2147483647, %v8877_v46 }
 0x326   : > { %v1922_v45 = vmul.f32 %v8937_v35, %v8883_v61  ;;  %v1843_v42 = vsub.f32 1.0, %v1842_v53  ;;  %8136 = vrcp.f32 %v8939_v40  ;;  %v1892_v11 = vand.u32 2147483648, %v8881_v57 }
 0x327   : > { %v2021_v51 = vadd.f32 0.00028619796, %v2020_v17  ;;  %vm1846_vm4 = vweird.f32 %v8877_v46  ;;  %v8957_v52 = vmul.f32 %v1869_v32, %v8797_v10  ;;  %v1932_v56 = vand.u32 2147483648, %v8883_v61  ;;  %v7870_v32 = vld [vmem:[%s10641_s2 + $0x78] sm:$0xff] }
 0x328   : > { %v1983_v1 = vadd.f32 0.0036580483, %v1982_v12  ;;  %v1993_v2 = vmul.f32 %v1992_v37, %v8891_v9  ;;  %v1883_v55 = vsub.f32 1.0, %v1882_v43  ;;  %v1890_v3 = vand.u32 2147483647, %v8881_v57  ;;  %2267 = vmatpush.bf16.msra.mxu1 %v7870_v32 }
 0x329   : > { %v8963_v6 = vmul.f32 %v1909_v44, %v8800_v19  ;;  %v1923_v8 = vsub.f32 1.0, %v1922_v45  ;;  %v1844_v13 = vmul.f32 %v8917_v25, %v1843_v42  ;;  %v1853_v22 = vor.u32 1.1754944e-38, %v1852_v0 }
 0x32a   : > { %vm1886_vm5 = vweird.f32 %v8881_v57  ;;  %v1948_v10 = vmul.f32 %v1947_v49, %v8821_v23  ;;  %v1994_v16 = vadd.f32 0.014752088, %v1993_v2  ;;  %v8968_v18 = vor.u32 1.1754944e-38, %v1892_v11 }
 0x32b   : > { %vm1926_vm6 = vweird.f32 %v8883_v61  ;;  %v1930_v26 = vand.u32 2147483647, %v8883_v61  ;;  %v2022_v29 = vmul.f32 %v2021_v51, %v8910_v27  ;;  %v8973_v21 = vmin.f32 %v2058_v48, 16.0 }
 0x32c   : > { %v8975_v19 = vpop.eup %8136  ;;  %vm8977_vm7 = vcmp.eq.f32.partialorder %v1850_v5, 8.507059e+37  ;;  %v8981_v53 = vor.u32 1.1754944e-38, %v1932_v56  ;;  %v1984_v23 = vmul.f32 %v1983_v1, %v8891_v9  ;;  %v1995_v47 = vmul.f32 %v1994_v16, %v8891_v9 }
 0x32d   : > { %v2031_v36 = vmul.f32 3.8918573e-05, %v8910_v27  ;;  %vm1847_vm8 = vweird.f32 %v8917_v25  ;;  %v1884_v50 = vmul.f32 %v8927_v31, %v1883_v55  ;;  %v1924_v34 = vmul.f32 %v8937_v35, %v1923_v8  ;;  %v7869_v8 = vld [vmem:[%s10641_s2 + $0x70] sm:$0xff] }
 0x32e   : > { %v1962_v17 = vmul.f32 %v8975_v19, %v8939_v40  ;;  %v1845_v12 = vadd.f32 %v8917_v25, %v1844_v13  ;;  %vm1887_vm9 = vweird.f32 %v8927_v31  ;;  %v8996_v37 = vadd.f32 1.1283791, %v1948_v10  ;;  %vm9006_vm11 = vmor %vm1846_vm4, %vm1847_vm8  ;;  %2268 = vmatpush.bf16.msra.mxu1 %v7869_v8 }
 0x32f   : > { %v1996_v43 = vadd.f32 0.112945676, %v1995_v47  ;;  %vm1927_vm10 = vweird.f32 %v8937_v35  ;;  %v1970_v45 = vand.u32 2147483647, %v8939_v40  ;;  %v2023_v48 = vadd.f32 0.0036580483, %v2022_v29  ;;  %vm9033_vm14 = vmor %vm1886_vm5, %vm1887_vm9 }
 0x330   : > { %v1963_v44 = vsub.f32 1.0, %v1962_v17  ;;  %v1985_v42 = vadd.f32 0.05243302, %v1984_v23  ;;  %v2032_v49 = vadd.f32 0.001143296, %v2031_v36  ;;  %v1885_v51 = vadd.f32 %v8927_v31, %v1884_v50  ;;  %vm9045_vm15 = vmor %vm1926_vm6, %vm1927_vm10 }
 0x331   : > { %v1997_v0 = vmul.f32 %v1996_v43, %v8891_v9  ;;  %v2060_v5 = vmul.f32 2.1237322e-06, %v8973_v21  ;;  %vm9011_vm12 = vcmp.eq.f32.partialorder %v1890_v3, 8.507059e+37  ;;  %v1925_v1 = vadd.f32 %v8937_v35, %v1924_v34 }
 0x332   : > { %vm9016_vm13 = vcmp.eq.f32.partialorder %v1930_v26, 8.507059e+37  ;;  %v1972_v55 = vand.u32 2147483648, %v8939_v40  ;;  %v2071_v46 = vmul.f32 3.8918573e-05, %v8973_v21  ;;  %v1849_v3 = vsel %vm9006_vm11, %v8917_v25, %v1845_v12 }
 0x333   : > { %v1998_v13 = vadd.f32 0.4994258, %v1997_v0  ;;  %v2033_v10 = vmul.f32 %v2032_v49, %v8910_v27  ;;  %v2061_v16 = vadd.f32 0.00028619796, %v2060_v5  ;;  %v1964_v29 = vmul.f32 %v8975_v19, %v1963_v44  ;;  %v7868_v44 = vld [vmem:[%s10641_s2 + $0x68] sm:$0xff] }
 0x334   : > { %v2024_v23 = vmul.f32 %v2023_v48, %v8910_v27  ;;  %v2072_v47 = vadd.f32 0.001143296, %v2071_v46  ;;  %v2098_v25 = vmul.f32 %v8934_v59, %v8934_v59  ;;  %v1986_v57 = vmul.f32 %v1985_v42, %v8891_v9  ;;  %v7862_v48 = vld [vmem:[%s10641_s2 + $0x38] sm:$0xff]  ;;  %2269 = vmatpush.bf16.msra.mxu1 %v7868_v44  ;;  %v7884_v44 = vld [vmem:[%s10641_s2 + $0xe8] sm:$0xff] }
 0x335   : > { %v1999_v50 = vmul.f32 %v1998_v13, %v8891_v9  ;;  %v2034_v34 = vadd.f32 0.014752088, %v2033_v10  ;;  %v2062_v17 = vmul.f32 %v2061_v16, %v8973_v21  ;;  %v1854_v32 = vsel %vm8977_vm7, %v1853_v22, %v1849_v3  ;;  %v7878_v22 = vld [vmem:[%s10641_s2 + $0xb8] sm:$0xff]  ;;  %2344 = vmatpush.bf16.msra.mxu2 %v7862_v48  ;;  %v7867_v10 = vld [vmem:[%s10641_s2 + $0x60] sm:$0xff]  ;;  %v7877_v16 = vld [vmem:[%s10641_s2 + $0xb0] sm:$0xff] }
 0x336   : > { %v1889_v12 = vsel %vm9033_vm14, %v8927_v31, %v1885_v51  ;;  %v1929_v61 = vsel %vm9045_vm15, %v8937_v35, %v1925_v1  ;;  %v2073_v43 = vmul.f32 %v2072_v47, %v8973_v21  ;;  %vm1967_vm0 = vweird.f32 %v8975_v19  ;;  %v7886_v42 = vld [vmem:[%s10641_s2 + $0xf8] sm:$0xff]  ;;  %2450 = vmatpush.bf16.msra.mxu3 %v7878_v22 }
 0x337   : > { %v9071_v31 = vadd.f32 1.0, %v1999_v50  ;;  %v2035_v35 = vmul.f32 %v2034_v34, %v8910_v27  ;;  %v9074_v33 = vmin.f32 %v2098_v25, 16.0  ;;  %v1965_v0 = vadd.f32 %v8975_v19, %v1964_v29  ;;  %2564 = vmatpush.bf16.msrb.mxu0 %v7886_v42 }
 0x338   : > { %v2025_v49 = vadd.f32 0.05243302, %v2024_v23  ;;  %v2063_v5 = vadd.f32 0.0036580483, %v2062_v17  ;;  %v2074_v11 = vadd.f32 0.014752088, %v2073_v43  ;;  %vm1966_vm1 = vweird.f32 %v8939_v40  ;;  %2270 = vmatpush.bf16.msra.mxu1 %v7867_v10 }
 0x339   : > { %vm9081_vm2 = vcmp.eq.f32.partialorder %v1970_v45, 8.507059e+37  ;;  %v1987_v1 = vadd.f32 0.18741608, %v1986_v57  ;;  %8138 = vrcp.f32 %v9071_v31  ;;  %v9087_v46 = vmul.f32 %v1854_v32, %v8951_v39  ;;  %v7861_v45 = vld [vmem:[%s10641_s2 + $0x30] sm:$0xff]  ;;  %vm9109_vm3 = vmor %vm1966_vm1, %vm1967_vm0  ;;  %v7866_v17 = vld [vmem:[%s10641_s2 + $0x58] sm:$0xff] }
 0x33a   : > { %v1973_v8 = vor.u32 1.1754944e-38, %v1972_v55  ;;  %v2036_v3 = vadd.f32 0.112945676, %v2035_v35  ;;  %v2064_v13 = vmul.f32 %v2063_v5, %v8973_v21  ;;  %v1894_v39 = vsel %vm9011_vm12, %v8968_v18, %v1889_v12  ;;  %v7885_v18 = vld [vmem:[%s10641_s2 + $0xf0] sm:$0xff]  ;;  %2345 = vmatpush.bf16.msra.mxu2 %v7861_v45  ;;  %2451 = vmatpush.bf16.msra.mxu3 %v7877_v16  ;;  %v7860_v32 = vld [vmem:[%s10641_s2 + $0x28] sm:$0xff] }
 0x33b   : > { %v1934_v55 = vsel %vm9016_vm13, %v8981_v53, %v1929_v61  ;;  %v2075_v29 = vmul.f32 %v2074_v11, %v8973_v21  ;;  %v2100_v23 = vmul.f32 2.1237322e-06, %v9074_v33  ;;  %v1969_v53 = vsel %vm9109_vm3, %v8975_v19, %v1965_v0  ;;  %2565 = vmatpush.bf16.msrb.mxu0 %v7885_v18  ;;  %v7876_v43 = vld [vmem:[%s10641_s2 + $0xa8] sm:$0xff] }
 0x33c   : > { %v2026_v56 = vmul.f32 %v2025_v49, %v8910_v27  ;;  %v2037_v40 = vmul.f32 %v2036_v3, %v8910_v27  ;;  %v2111_v2 = vmul.f32 3.8918573e-05, %v9074_v33  ;;  %v1988_v47 = vmul.f32 %v1987_v1, %v8891_v9  ;;  %2271 = vmatpush.bf16.msra.mxu1 %v7866_v17  ;;  %v7875_v3 = vld [vmem:[%s10641_s2 + $0xa0] sm:$0xff] }
 0x33d   : > { %v2065_v25 = vadd.f32 0.05243302, %v2064_v13  ;;  %v2076_v36 = vadd.f32 0.112945676, %v2075_v29  ;;  %v2101_v57 = vadd.f32 0.00028619796, %v2100_v23  ;;  %v1950_v50 = vmul.f32 %v8996_v37, %v8803_v63 }
 0x33e   : > { %v2038_v34 = vadd.f32 0.4994258, %v2037_v40  ;;  %v2112_v19 = vadd.f32 0.001143296, %v2111_v2  ;;  %v9136_v9 = vmul.f32 %v1894_v39, %v8957_v52  ;;  %v9139_v61 = vmul.f32 %v1934_v55, %v8963_v6  ;;  %2346 = vmatpush.bf16.msra.mxu2 %v7860_v32  ;;  %2452 = vmatpush.bf16.msra.mxu3 %v7876_v43  ;;  %v7883_v39 = vld [vmem:[%s10641_s2 + $0xe0] sm:$0xff] }
 0x33f   : > { %v9133_v12 = vpop.eup %8138  ;;  %v1974_v63 = vsel %vm9081_vm2, %v1973_v8, %v1969_v53  ;;  %v2077_v37 = vmul.f32 %v2076_v36, %v8973_v21  ;;  %v6763_v48 = vclamps-f32 %v9087_v46, 1.0  ;;  %v2102_v22 = vmul.f32 %v2101_v57, %v9074_v33  ;;  %2566 = vmatpush.bf16.msrb.mxu0 %v7884_v44  ;;  %v7865_v46 = vld [vmem:[%s10641_s2 + $0x50] sm:$0xff]  ;;  %v7859_v8 = vld [vmem:[%s10641_s2 + $0x20] sm:$0xff] }
 0x340   : > { %v2002_v52 = vmul.f32 %v9133_v12, %v9071_v31  ;;  %v2039_v6 = vmul.f32 %v2038_v34, %v8910_v27  ;;  %v1989_v35 = vadd.f32 1.1283791, %v1988_v47  ;;  %v2027_v42 = vadd.f32 0.18741608, %v2026_v56  ;;  %2272 = vmatpush.bf16.msra.mxu1 %v7865_v46  ;;  %v7864_v47 = vld [vmem:[%s10641_s2 + $0x48] sm:$0xff]  ;;  %v7857_v44 = vld [vmem:[%s10641_s2 + $0x10] sm:$0xff] }
 0x341   : > { %v2078_v0 = vadd.f32 0.4994258, %v2077_v37  ;;  %v2113_v49 = vmul.f32 %v2112_v19, %v9074_v33  ;;  %v1975_v5 = vmul.f32 %v1974_v63, %v1950_v50  ;;  %v2066_v1 = vmul.f32 %v2065_v25, %v8973_v21  ;;  %v7858_v25 = vld [vmem:[%s10641_s2 + $0x18] sm:$0xff] }
 0x342   : > { %v2003_v11 = vsub.f32 1.0, %v2002_v52  ;;  %v9156_v51 = vadd.f32 1.0, %v2039_v6  ;;  %v2010_v13 = vand.u32 2147483647, %v9071_v31  ;;  %v2012_v10 = vand.u32 2147483648, %v9071_v31  ;;  %2347 = vmatpush.bf16.msra.mxu2 %v7859_v8  ;;  %2453 = vmatpush.bf16.msra.mxu3 %v7875_v3  ;;  %v7882_v50 = vld [vmem:[%s10641_s2 + $0xd8] sm:$0xff] }
 0x343   : > { %v2079_v45 = vmul.f32 %v2078_v0, %v8973_v21  ;;  %v2114_v16 = vadd.f32 0.014752088, %v2113_v49  ;;  %vm2007_vm4 = vweird.f32 %v9133_v12  ;;  %v2103_v26 = vadd.f32 0.0036580483, %v2102_v22  ;;  %2567 = vmatpush.bf16.msrb.mxu0 %v7883_v39 }
 0x344   : > { %v2004_v55 = vmul.f32 %v9133_v12, %v2003_v11  ;;  %8140 = vrcp.f32 %v9156_v51  ;;  %v6764_v29 = vclamps-f32 %v9136_v9, 1.0  ;;  %v6765_v23 = vclamps-f32 %v9139_v61, 1.0  ;;  %2273 = vmatpush.bf16.msra.mxu1 %v7864_v47 }
 0x345   : > { %v2028_v18 = vmul.f32 %v2027_v42, %v8910_v27  ;;  %v9180_v53 = vadd.f32 1.0, %v2079_v45  ;;  %vm2006_vm5 = vweird.f32 %v9071_v31  ;;  %v2067_v40 = vadd.f32 0.18741608, %v2066_v1  ;;  %v7874_v27 = vld [vmem:[%s10641_s2 + $0x98] sm:$0xff]  ;;  %v7863_v42 = vld [vmem:[%s10641_s2 + $0x40] sm:$0xff]  ;;  %v7856_v1 = vld [vmem:[%s10641_s2 + $0x8] sm:$0xff] }
 0x346   : > { %v2005_v56 = vadd.f32 %v9133_v12, %v2004_v55  ;;  %v2115_v2 = vmul.f32 %v2114_v16, %v9074_v33  ;;  %v6766_v36 = vclamps-f32 %v1975_v5, 1.0  ;;  %v1990_v57 = vmul.f32 %v1989_v35, %v8856_v30  ;;  %vm2008_vm6 = vmor %vm2006_vm5, %vm2007_vm4  ;;  %2348 = vmatpush.bf16.msra.mxu2 %v7858_v25  ;;  %2454 = vmatpush.bf16.msra.mxu3 %v7874_v27 }
 0x347   : > { %v2013_v31 = vor.u32 1.1754944e-38, %v2012_v10  ;;  %8142 = vrcp.f32 %v9180_v53  ;;  %vm2011_vm7 = vcmp.eq.f32.partialorder %v2010_v13, 8.507059e+37  ;;  %v2104_v19 = vmul.f32 %v2103_v26, %v9074_v33  ;;  %2568 = vmatpush.bf16.msrb.mxu0 %v7882_v50 }
 0x348   : > { %v2009_v34 = vsel %vm2008_vm6, %v9133_v12, %v2005_v56  ;;  %v2138_v17 = vadd.f32 1.0, %v6763_v48  ;;  %v2116_v30 = vadd.f32 0.112945676, %v2115_v2  ;;  %v2139_v9 = vadd.f32 1.0, %v6764_v29  ;;  %v7873_v48 = vld [vmem:[%s10641_s2 + $0x90] sm:$0xff]  ;;  %2274 = vmatpush.bf16.msra.mxu1 %v7863_v42  ;;  %v7855_v2 = vld [vmem:[%s10641_s2] sm:$0xff] }
 0x349   : > { %v2014_v32 = vsel %vm2011_vm7, %v2013_v31, %v2009_v34  ;;  %v2140_v61 = vadd.f32 1.0, %v6765_v23  ;;  %v2029_v43 = vadd.f32 1.1283791, %v2028_v18  ;;  %vm2046_vm8 = vweird.f32 %v9156_v51  ;;  %v7894_v23 = vld [vmem:[%s10641_s2 + $0x138] sm:$0xff] }
 0x34a   : > { %v9203_v63 = vpop.eup %8140  ;;  %v2015_v37 = vmul.f32 %v2014_v32, %v1990_v57  ;;  %v2068_v12 = vmul.f32 %v2067_v40, %v8973_v21  ;;  %v2050_v6 = vand.u32 2147483647, %v9156_v51  ;;  %v2117_v22 = vmul.f32 %v2116_v30, %v9074_v33  ;;  %v7881_v21 = vld [vmem:[%s10641_s2 + $0xd0] sm:$0xff]  ;;  %2349 = vmatpush.bf16.msra.mxu2 %v7857_v44  ;;  %2455 = vmatpush.bf16.msra.mxu3 %v7873_v48  ;;  %v7879_v57 = vld [vmem:[%s10641_s2 + $0xc0] sm:$0xff] }
 0x34b   : > { %v2042_v52 = vmul.f32 %v9203_v63, %v9156_v51  ;;  %v2141_v35 = vadd.f32 1.0, %v6766_v36  ;;  %v2105_v49 = vadd.f32 0.05243302, %v2104_v19  ;;  %v9224_v5 = vmul.f32 %v2138_v17, %v8900_v20  ;;  %2569 = vmatpush.bf16.msrb.mxu0 %v7881_v21  ;;  %v7872_v20 = vld [vmem:[%s10641_s2 + $0x88] sm:$0xff] }
 0x34c   : > { %v6767_v0 = vclamps-f32 %v2015_v37, 1.0  ;;  %v9227_v11 = vmul.f32 %v2139_v9, %v8904_v7  ;;  %v2118_v3 = vadd.f32 0.4994258, %v2117_v22  ;;  %v9235_v13 = vmul.f32 %v2140_v61, %v8907_v24  ;;  %v7880_v7 = vld [vmem:[%s10641_s2 + $0xc8] sm:$0xff]  ;;  %2678 = vmatpush.bf16.msrb.mxu1 %v7894_v23 }
 0x34d   : > { %v9232_v46 = vpop.eup %8142  ;;  %v2043_v8 = vsub.f32 1.0, %v2042_v52  ;;  %v9238_v10 = vmul.f32 %v2141_v35, %v8913_v28  ;;  %v2052_v45 = vand.u32 2147483648, %v9156_v51  ;;  %v2069_v16 = vadd.f32 1.1283791, %v2068_v12  ;;  %2154 = vst [vmem:[#allocation2 + $0x11] sm:$0xff] %v9224_v5  ;;  %v2190_v28 = vld [vmem:[#allocation2 + $0x1] sm:$0xff] }
 0x34e   : > { %v2082_v24 = vmul.f32 %v9232_v46, %v9180_v53  ;;  %v2142_v39 = vadd.f32 1.0, %v6767_v0  ;;  %vm2047_vm9 = vweird.f32 %v9203_v63  ;;  %v2119_v26 = vmul.f32 %v2118_v3, %v9074_v33  ;;  %2155 = vst [vmem:[#allocation2 + $0x21] sm:$0xff] %v9227_v11  ;;  %2350 = vmatpush.bf16.msra.mxu2 %v7856_v1  ;;  %2456 = vmatpush.bf16.msra.mxu3 %v7872_v20  ;;  %v2373_v30 = vld [vmem:[#allocation2 + $0x2] sm:$0xff]  ;;  %v7893_v51 = vld [vmem:[%s10641_s2 + $0x130] sm:$0xff]  ;;  %v7902_v3 = vld [vmem:[%s10641_s2 + $0x178] sm:$0xff] }
 0x34f   : > { %v2044_v55 = vmul.f32 %v9203_v63, %v2043_v8  ;;  %v2198_v29 = vpack.c.bf16 %v9224_v5, %v2190_v28  ;;  %v2106_v56 = vmul.f32 %v2105_v49, %v9074_v33  ;;  %2156 = vst [vmem:[#allocation2 + $0x31] sm:$0xff] %v9235_v13  ;;  %v2609_v47 = vpack.c.bf16 %v9227_v11, %v9224_v5  ;;  %vm2048_vm10 = vmor %vm2046_vm8, %vm2047_vm9  ;;  %v7892_v21 = vld [vmem:[%s10641_s2 + $0x128] sm:$0xff]  ;;  %v7910_v20 = vld [vmem:[%s10641_s2 + $0x1b8] sm:$0xff] }
 0x350   : > { %v2083_v18 = vsub.f32 1.0, %v2082_v24  ;;  %v9260_v40 = vmul.f32 %v2142_v39, %v8920_v54  ;;  %v2092_v27 = vand.u32 2147483648, %v9180_v53  ;;  %v9270_v36 = vadd.f32 1.0, %v2119_v26  ;;  %2157 = vst [vmem:[#allocation2 + $0x41] sm:$0xff] %v9238_v10  ;;  %2570 = vmatpush.bf16.msrb.mxu0 %v7880_v7  ;;  %v7871_v54 = vld [vmem:[%s10641_s2 + $0x80] sm:$0xff]  ;;  %2679 = vmatpush.bf16.msrb.mxu1 %v7893_v51  ;;  %v7918_v7 = vld [vmem:[%s10641_s2 + $0x1f8] sm:$0xff] }
 0x351   : > { %v2045_v25 = vadd.f32 %v9203_v63, %v2044_v55  ;;  %v2610_v31 = vpack.c.bf16 %v9238_v10, %v9235_v13  ;;  %v2053_v50 = vor.u32 1.1754944e-38, %v2052_v45  ;;  %vm2087_vm11 = vweird.f32 %v9232_v46  ;;  %2275 = vmatmul.bf16.vlgmr.msra.gmra.mxu1 %v2198_v29  ;;  %v7901_v39 = vld [vmem:[%s10641_s2 + $0x170] sm:$0xff] }
 0x352   : > { %v2084_v34 = vmul.f32 %v9232_v46, %v2083_v18  ;;  %v2090_v19 = vand.u32 2147483647, %v9180_v53  ;;  %2158 = vst [vmem:[#allocation2 + $0x51] sm:$0xff] %v9260_v40  ;;  %v2030_v17 = vmul.f32 %v2029_v43, %v8867_v41  ;;  %vm2051_vm12 = vcmp.eq.f32.partialorder %v2050_v6, 8.507059e+37  ;;  %2351 = vmatpush.bf16.msra.mxu2 %v7855_v2  ;;  %2457 = vmatpush.bf16.msra.mxu3 %v7871_v54  ;;  %v7909_v28 = vld [vmem:[%s10641_s2 + $0x1b0] sm:$0xff]  ;;  %v7890_v2 = vld [vmem:[%s10641_s2 + $0x118] sm:$0xff] }
 0x353   : > { %v2049_v32 = vsel %vm2048_vm10, %v9203_v63, %v2045_v25  ;;  %8144 = vrcp.f32 %v9270_v36  ;;  %vm2086_vm13 = vweird.f32 %v9180_v53  ;;  %v2070_v41 = vmul.f32 %v2069_v16, %v8923_v58  ;;  %v7900_v54 = vld [vmem:[%s10641_s2 + $0x168] sm:$0xff] }
 0x354   : > { %v2054_v9 = vsel %vm2051_vm12, %v2053_v50, %v2049_v32  ;;  %v2085_v61 = vadd.f32 %v9232_v46, %v2084_v34  ;;  %vm2088_vm14 = vmor %vm2086_vm13, %vm2087_vm11  ;;  %v2093_v63 = vor.u32 1.1754944e-38, %v2092_v27  ;;  %v2107_v43 = vadd.f32 0.18741608, %v2106_v56  ;;  %2571 = vmatpush.bf16.msrb.mxu0 %v7879_v57  ;;  %v2163_v12 = vld [vmem:[#allocation2 + $0x10] sm:$0xff]  ;;  %2680 = vmatpush.bf16.msrb.mxu1 %v7892_v21  ;;  %v7908_v57 = vld [vmem:[%s10641_s2 + $0x1a8] sm:$0xff] }
 0x355   : > { %v2055_v37 = vmul.f32 %v2054_v9, %v2030_v17  ;;  %v9300_v44 = vld [vmem:[#allocation2 + $0x12] sm:$0xff]  ;;  %vm2091_vm15 = vcmp.eq.f32.partialorder %v2090_v19, 8.507059e+37  ;;  %v2170_v52 = vpack.c.bf16 %v2163_v12, %v8736_v62  ;;  %v9305_v6 = vld [vmem:[#allocation2 + $0x20] sm:$0xff]  ;;  %v1807_v49 = vmul.f32 0.5, %v8853_v60 }
 0x356   : > { %v2089_v48 = vsel %vm2088_vm14, %v9232_v46, %v2085_v61  ;;  %v2381_v53 = vpack.c.bf16 %v9300_v44, %v2373_v30  ;;  %v2495_v35 = vpack.c.bf16 %v9305_v6, %v2163_v12  ;;  %v2108_v62 = vmul.f32 %v2107_v43, %v9074_v33  ;;  %v7891_v33 = vld [vmem:[%s10641_s2 + $0x120] sm:$0xff]  ;;  %2792 = vmatpush.bf16.msrb.mxu2 %v7902_v3  ;;  %v2165_v30 = vld [vmem:[#allocation2 + $0x30] sm:$0xff]  ;;  %v7914_v21 = vld [vmem:[%s10641_s2 + $0x1d8] sm:$0xff] }
 0x357   : > { %v6768_v58 = vclamps-f32 %v2055_v37, 1.0  ;;  %v2094_v22 = vsel %vm2091_vm15, %v2093_v63, %v2089_v48  ;;  %2352 = vmatmul.bf16.vlgmr.msra.gmra.mxu2 %v2170_v52  ;;  %v1808_v45 = vmul.f32 0.5, %v8894_v4  ;;  %2906 = vmatpush.bf16.msrb.mxu3 %v7910_v20  ;;  %v2132_v26 = vand.u32 2147483648, %v9270_v36  ;;  %v7917_v4 = vld [vmem:[%s10641_s2 + $0x1f0] sm:$0xff]  ;;  %v9365_v17 = vld [vmem:[#allocation2 + $0x22] sm:$0xff] }
 0x358   : > { %v2095_v42 = vmul.f32 %v2094_v22, %v2070_v41  ;;  %2458 = vmatmul.bf16.vlgmr.msra.gmra.mxu3 %v2381_v53  ;;  %2572 = vmatmul.bf16.vlgmr.msrb.gmra.mxu0 %v2495_v35  ;;  %v2109_v55 = vadd.f32 1.1283791, %v2108_v62  ;;  %v2130_v18 = vand.u32 2147483647, %v9270_v36  ;;  %vm2126_vm1 = vweird.f32 %v9270_v36  ;;  %v9367_v51 = vld [vmem:[#allocation2 + $0x32] sm:$0xff]  ;;  %v2490_v37 = vld [vmem:[#allocation2 + $0x40] sm:$0xff] }
 0x359   : > { %v8145_v0 = vpop.eup %8144  ;;  %v2143_v1 = vadd.f32 1.0, %v6768_v58  ;;  %3020 = vmatpush.bf16.msra.mxu0 %v7918_v7  ;;  %2681 = vmatpush.bf16.msrb.mxu1 %v7891_v33  ;;  %v9352_v27 = vpack.c.bf16 %v9235_v13, %v9227_v11  ;;  %v2133_v50 = vor.u32 1.1754944e-38, %v2132_v26  ;;  %v7889_v9 = vld [vmem:[%s10641_s2 + $0x110] sm:$0xff]  ;;  %v9376_v63 = vpack.c.bf16 %v2165_v30, %v9305_v6  ;;  %v7907_v12 = vld [vmem:[%s10641_s2 + $0x1a0] sm:$0xff]  ;;  %v7888_v6 = vld [vmem:[%s10641_s2 + $0x108] sm:$0xff] }
 0x35a   : > { %v6769_v46 = vclamps-f32 %v2095_v42, 1.0  ;;  %v2122_v8 = vmul.f32 %v8145_v0, %v9270_v36  ;;  %vm2127_vm0 = vweird.f32 %v8145_v0  ;;  %2793 = vmatpush.bf16.msrb.mxu2 %v7901_v39  ;;  %v7916_v36 = vld [vmem:[%s10641_s2 + $0x1e8] sm:$0xff]  ;;  %v2110_v34 = vmul.f32 %v2109_v55, %v8934_v59  ;;  %v7899_v59 = vld [vmem:[%s10641_s2 + $0x160] sm:$0xff]  ;;  %v7898_v22 = vld [vmem:[%s10641_s2 + $0x158] sm:$0xff] }
 0x35b   : > { %v9323_v60 = vmul.f32 %v2143_v1, %v1807_v49  ;;  %2907 = vmatpush.bf16.msrb.mxu3 %v7909_v28  ;;  %vm2128_vm2 = vmor %vm2126_vm1, %vm2127_vm0  ;;  %vm2131_vm3 = vcmp.eq.f32.partialorder %v2130_v18, 8.507059e+37  ;;  %v9380_v43 = vpack.c.bf16 %v9367_v51, %v9365_v17  ;;  %v7915_v48 = vld [vmem:[%s10641_s2 + $0x1e0] sm:$0xff]  ;;  %v2496_v52 = vpack.c.bf16 %v2490_v37, %v2165_v30  ;;  %v7897_v49 = vld [vmem:[%s10641_s2 + $0x150] sm:$0xff] }
 0x35c   : > { %v2123_v16 = vsub.f32 1.0, %v2122_v8  ;;  %v2144_v24 = vadd.f32 1.0, %v6769_v46  ;;  %v1809_v53 = vmul.f32 0.5, %v8897_v15  ;;  %v7906_v15 = vld [vmem:[%s10641_s2 + $0x198] sm:$0xff]  ;;  %v7887_v42 = vld [vmem:[%s10641_s2 + $0x100] sm:$0xff]  ;;  %v7905_v62 = vld [vmem:[%s10641_s2 + $0x190] sm:$0xff]  ;;  %v2200_v46 = vpack.c.bf16 %v9260_v40, %v9238_v10 }
 0x35d   : > { %2159 = vst [vmem:[#allocation2 + $0x61] sm:$0xff] %v9323_v60  ;;  %v2611_v29 = vpack.c.bf16 %v9323_v60, %v9260_v40  ;;  %3021 = vmatpush.bf16.msra.mxu0 %v7917_v4  ;;  %2682 = vmatpush.bf16.msrb.mxu1 %v7890_v2  ;;  %v7913_v1 = vld [vmem:[%s10641_s2 + $0x1d0] sm:$0xff]  ;;  %v7896_v8 = vld [vmem:[%s10641_s2 + $0x148] sm:$0xff]  ;;  %v7903_v55 = vld [vmem:[%s10641_s2 + $0x180] sm:$0xff] }
 0x35e   : > { %v2124_v23 = vmul.f32 %v8145_v0, %v2123_v16  ;;  %v9343_v56 = vmul.f32 %v2144_v24, %v1808_v45  ;;  %2794 = vmatpush.bf16.msrb.mxu2 %v7900_v54  ;;  %v2377_v3 = vld [vmem:[#allocation2 + $0x42] sm:$0xff]  ;;  %v2167_v7 = vld [vmem:[#allocation2 + $0x50] sm:$0xff] }
 0x35f   : > { %2908 = vmatpush.bf16.msrb.mxu3 %v7908_v57  ;;  %v7904_v20 = vld [vmem:[%s10641_s2 + $0x188] sm:$0xff]  ;;  %v2378_v33 = vld [vmem:[#allocation2 + $0x52] sm:$0xff]  ;;  %v7895_v24 = vld [vmem:[%s10641_s2 + $0x140] sm:$0xff]  ;;  %v2172_v39 = vpack.c.bf16 %v2167_v7, %v2490_v37  ;;  %v2724_v5 = vpack.c.bf16 %v2377_v3, %v9367_v51 }
 0x360   : > { %v2125_v25 = vadd.f32 %v8145_v0, %v2124_v23  ;;  %2160 = vst [vmem:[#allocation2 + $0x71] sm:$0xff] %v9343_v56  ;;  %v7912_v45 = vld [vmem:[%s10641_s2 + $0x1c8] sm:$0xff]  ;;  %v9434_v28 = vpack.c.bf16 %v2378_v33, %v2377_v3  ;;  %v7911_v4 = vld [vmem:[%s10641_s2 + $0x1c0] sm:$0xff]  ;;  %v7926_v23 = vld [vmem:[%s10641_s2 + $0x238] sm:$0xff]  ;;  %v2201_v2 = vpack.c.bf16 %v9343_v56, %v9323_v60 }
 0x361   : > { %2280 = vmatmul.bf16.gmra.mxu1 %v9352_v27  ;;  %3022 = vmatpush.bf16.msra.mxu0 %v7916_v36  ;;  %v7925_v18 = vld [vmem:[%s10641_s2 + $0x230] sm:$0xff]  ;;  %v7923_v30 = vld [vmem:[%s10641_s2 + $0x220] sm:$0xff]  ;;  %v7920_v11 = vld [vmem:[%s10641_s2 + $0x208] sm:$0xff] }
 0x362   : > { %v2129_v19 = vsel %vm2128_vm2, %v8145_v0, %v2125_v25  ;;  %2683 = vmatpush.bf16.msrb.mxu1 %v7889_v9  ;;  %2795 = vmatpush.bf16.msrb.mxu2 %v7899_v59  ;;  %v2723_v9 = vpack.c.bf16 %v9365_v17, %v9300_v44  ;;  %v7921_v37 = vld [vmem:[%s10641_s2 + $0x210] sm:$0xff] }
 0x363   : > { %v2134_v32 = vsel %vm2131_vm3, %v2133_v50, %v2129_v19  ;;  %2909 = vmatpush.bf16.msrb.mxu3 %v7907_v12 }
 0x364   : > { %v2135_v61 = vmul.f32 %v2134_v32, %v2110_v34  ;;  %v2492_v16 = vld [vmem:[#allocation2 + $0x60] sm:$0xff]  ;;  %v7924_v32 = vld [vmem:[%s10641_s2 + $0x228] sm:$0xff] }
 0x365   : > { %3023 = vmatpush.bf16.msra.mxu0 %v7915_v48  ;;  %v2497_v26 = vpack.c.bf16 %v2492_v16, %v2167_v7  ;;  %v2379_v54 = vld [vmem:[#allocation2 + $0x62] sm:$0xff]  ;;  %v3064_v7 = vld [vmem:[#allocation2 + $0x92] sm:$0xff] }
 0x366   : > { %v6770_v41 = vclamps-f32 %v2135_v61, 1.0  ;;  %2684 = vmatpush.bf16.msrb.mxu1 %v7888_v6  ;;  %2796 = vmatpush.bf16.msrb.mxu2 %v7898_v22  ;;  %v7922_v61 = vld [vmem:[%s10641_s2 + $0x218] sm:$0xff]  ;;  %v2725_v13 = vpack.c.bf16 %v2379_v54, %v2378_v33 }
 0x367   : > { %2357 = vmatmul.bf16.gmra.mxu2 %v9376_v63  ;;  %2910 = vmatpush.bf16.msrb.mxu3 %v7906_v15  ;;  %v2169_v25 = vld [vmem:[#allocation2 + $0x70] sm:$0xff] }
 0x368   : > { %v2145_v58 = vadd.f32 1.0, %v6770_v41  ;;  %2463 = vmatmul.bf16.gmra.mxu3 %v9380_v43  ;;  %2577 = vmatmul.bf16.gmra.mxu0 %v2496_v52  ;;  %v2380_v57 = vld [vmem:[#allocation2 + $0x72] sm:$0xff]  ;;  %v2173_v36 = vpack.c.bf16 %v2169_v25, %v2492_v16 }
 0x369   : > { %3024 = vmatpush.bf16.msra.mxu0 %v7914_v21  ;;  %v9451_v34 = vpack.c.bf16 %v2380_v57, %v2379_v54 }
 0x36a   : > { %v9397_v35 = vmul.f32 %v2145_v58, %v1809_v53  ;;  %2685 = vmatpush.bf16.msrb.mxu1 %v7887_v42  ;;  %2797 = vmatpush.bf16.msrb.mxu2 %v7897_v49 }
 0x36b   : > { %2911 = vmatpush.bf16.msrb.mxu3 %v7905_v62 }
 0x36c   : > { %2161 = vst [vmem:[#allocation2 + $0x81] sm:$0xff] %v9397_v35  ;;  %v2612_v0 = vpack.c.bf16 %v9397_v35, %v9343_v56 }
 0x36d   : > { %3025 = vmatpush.bf16.msra.mxu0 %v7913_v1 }
 0x36e   : > { %2798 = vmatpush.bf16.msrb.mxu2 %v7896_v8  ;;  %3134 = vmatpush.bf16.msra.mxu1 %v7926_v23 }
 0x36f   : > { %2912 = vmatpush.bf16.msrb.mxu3 %v7904_v20 }
 0x371   : > { %2285 = vmatmul.bf16.gmra.mxu1 %v2200_v46  ;;  %3026 = vmatpush.bf16.msra.mxu0 %v7912_v45 }
 0x372   : > { %2799 = vmatpush.bf16.msrb.mxu2 %v7895_v24  ;;  %3135 = vmatpush.bf16.msra.mxu1 %v7925_v18 }
 0x373   : > { %2913 = vmatpush.bf16.msrb.mxu3 %v7903_v55  ;;  %v2494_v50 = vld [vmem:[#allocation2 + $0x80] sm:$0xff] }
 0x374   : > { %v2498_v19 = vpack.c.bf16 %v2494_v50, %v2169_v25  ;;  %v2722_v10 = vld [vmem:[#allocation2 + $0x82] sm:$0xff] }
 0x375   : > { %3027 = vmatpush.bf16.msra.mxu0 %v7911_v4  ;;  %v2726_v44 = vpack.c.bf16 %v2722_v10, %v2380_v57  ;;  %v3068_v24 = vpack.c.bf16 %v3064_v7, %v2722_v10 }
 0x376   : > { %3136 = vmatpush.bf16.msra.mxu1 %v7924_v32 }
 0x377   : > { %2362 = vmatmul.bf16.gmra.mxu2 %v2172_v39 }
 0x378   : > { %2468 = vmatmul.bf16.gmra.mxu3 %v9434_v28  ;;  %2582 = vmatmul.bf16.gmra.mxu0 %v2497_v26 }
 0x37a   : > { %3137 = vmatpush.bf16.msra.mxu1 %v7923_v30 }
 0x37e   : > { %3138 = vmatpush.bf16.msra.mxu1 %v7922_v61 }
 0x381   : > { %2290 = vmatmul.bf16.gmra.mxu1 %v2201_v2 }
 0x382   : > { %3139 = vmatpush.bf16.msra.mxu1 %v7921_v37 }
 0x386   : > { %3140 = vmatpush.bf16.msra.mxu1 %v7920_v11 }
 0x387   : > { %2367 = vmatmul.bf16.gmra.mxu2 %v2173_v36 }
 0x388   : > { %2473 = vmatmul.bf16.gmra.mxu3 %v9451_v34  ;;  %2587 = vmatmul.bf16.gmra.mxu0 %v2498_v19 }
 0x391   : > { %2686 = vmatmul.bf16.vlgmr.msrb.gmra.mxu1 %v2609_v47  ;;  %v7919_v47 = vld [vmem:[%s10641_s2 + $0x200] sm:$0xff] }
 0x392   : > { %3141 = vmatpush.bf16.msra.mxu1 %v7919_v47 }
 0x397   : > { %2800 = vmatmul.bf16.vlgmr.msrb.gmra.mxu2 %v2723_v9 }
 0x398   : > { %2914 = vmatmul.bf16.vlgmr.msrb.gmra.mxu3 %v9376_v63  ;;  %3028 = vmatmul.bf16.vlgmr.msra.gmra.mxu0 %v9352_v27  ;;  %v8185_v27 = vld [vmem:[#allocation2] sm:$0xff] }
 0x399   : > { %v2840_v17 = vpack.c.bf16 %v8185_v27, %v2494_v50 }
 0x3a1   : > { %2691 = vmatmul.bf16.gmra.mxu1 %v2610_v31  ;;  %v2950_v31 = vld [vmem:[#allocation2 + $0x91] sm:$0xff] }
 0x3a2   : > { %v2954_v51 = vpack.c.bf16 %v2950_v31, %v9397_v35 }
 0x3a7   : > { %2805 = vmatmul.bf16.gmra.mxu2 %v2724_v5 }
 0x3a8   : > { %2919 = vmatmul.bf16.gmra.mxu3 %v2172_v39  ;;  %3033 = vmatmul.bf16.gmra.mxu0 %v2200_v46 }
 0x3b1   : > { %2696 = vmatmul.bf16.gmra.mxu1 %v2611_v29 }
 0x3b7   : > { %2810 = vmatmul.bf16.gmra.mxu2 %v2725_v13 }
 0x3b8   : > { %2924 = vmatmul.bf16.gmra.mxu3 %v2173_v36  ;;  %3038 = vmatmul.bf16.gmra.mxu0 %v2201_v2 }
 0x3c1   : > { %2701 = vmatmul.bf16.gmra.mxu1 %v2612_v0 }
 0x3c7   : > { %2815 = vmatmul.bf16.gmra.mxu2 %v2726_v44 }
 0x3c8   : > { %2929 = vmatmul.bf16.gmra.mxu3 %v2840_v17  ;;  %3043 = vmatmul.bf16.gmra.mxu0 %v2954_v51 }
 0x3ce   : > { %v2276_v40 = vpop.f32.mrf.mxu1 }
 0x3d1   : > { %3142 = vmatmul.bf16.vlgmr.msra.gmra.mxu1 %v9380_v43 }
 0x3d5   : > { %v2573_v60 = vpop.f32.mrf.mxu0 }
 0x3d6   : > { %v9491_v29 = vpop.f32.mrf.mxu1 }
 0x3da   : > { %v2353_v59 = vpop.f32.mrf.mxu2 }
 0x3db   : > { %v2459_v41 = vpop.f32.mrf.mxu3  ;;  %v2354_v56 = vadd.f32 %v2353_v59, %v2276_v40 }
 0x3dd   : > { %v2479_v63 = vadd.f32 %v2459_v41, %v2354_v56  ;;  %v9493_v48 = vpop.f32.mrf.mxu0 }
 0x3de   : > { %v2281_v12 = vpop.f32.mrf.mxu1 }
 0x3df   : > { %v2593_v52 = vadd.f32 %v2573_v60, %v2479_v63 }
 0x3e1   : > { %3147 = vmatmul.bf16.gmra.mxu1 %v9434_v28 }
 0x3e2   : > { %v9496_v53 = vpop.f32.mrf.mxu2 }
 0x3e3   : > { %v9498_v58 = vpop.f32.mrf.mxu3 }
 0x3e5   : > { %v2578_v43 = vpop.f32.mrf.mxu0 }
 0x3e6   : > { %v9500_v6 = vpop.f32.mrf.mxu1 }
 0x3ea   : > { %v2358_v22 = vpop.f32.mrf.mxu2 }
 0x3eb   : > { %v2464_v35 = vpop.f32.mrf.mxu3  ;;  %v2359_v15 = vadd.f32 %v2358_v22, %v2281_v12  ;;  %v2356_v22 = vadd.f32 %v9496_v53, %v9491_v29 }
 0x3ed   : > { %v2481_v21 = vadd.f32 %v2464_v35, %v2359_v15  ;;  %v2580_v1 = vpop.f32.mrf.mxu0 }
 0x3ee   : > { %v2286_v42 = vpop.f32.mrf.mxu1 }
 0x3ef   : > { %v2595_v0 = vadd.f32 %v2578_v43, %v2481_v21 }
 0x3f1   : > { %3152 = vmatmul.bf16.gmra.mxu1 %v9451_v34 }
 0x3f2   : > { %v2360_v49 = vpop.f32.mrf.mxu2 }
 0x3f3   : > { %v2466_v62 = vpop.f32.mrf.mxu3  ;;  %v2361_v15 = vadd.f32 %v2360_v49, %v9500_v6 }
 0x3f5   : > { %v2583_v45 = vpop.f32.mrf.mxu0 }
 0x3f6   : > { %v2288_v46 = vpop.f32.mrf.mxu1 }
 0x3fa   : > { %v2363_v8 = vpop.f32.mrf.mxu2 }
 0x3fb   : > { %v2364_v3 = vadd.f32 %v2363_v8, %v2286_v42  ;;  %v2469_v20 = vpop.f32.mrf.mxu3  ;;  %v2482_v8 = vadd.f32 %v2466_v62, %v2361_v15 }
 0x3fd   : > { %v2483_v33 = vadd.f32 %v2469_v20, %v2364_v3  ;;  %v2585_v25 = vpop.f32.mrf.mxu0 }
 0x3fe   : > { %v2291_v16 = vpop.f32.mrf.mxu1 }
 0x3ff   : > { %v2597_v39 = vadd.f32 %v2583_v45, %v2483_v33 }
 0x401   : > { %3157 = vmatmul.bf16.gmra.mxu1 %v3068_v24  ;;  %v2596_v24 = vadd.f32 %v2580_v1, %v2482_v8 }
 0x402   : > { %v2365_v4 = vpop.f32.mrf.mxu2 }
 0x403   : > { %v2471_v18 = vpop.f32.mrf.mxu3  ;;  %v2366_v3 = vadd.f32 %v2365_v4, %v2288_v46 }
 0x405   : > { %v2588_v34 = vpop.f32.mrf.mxu0 }
 0x406   : > { %v2293_v28 = vpop.f32.mrf.mxu1 }
 0x40a   : > { %v2368_v57 = vpop.f32.mrf.mxu2 }
 0x40b   : > { %v2474_v50 = vpop.f32.mrf.mxu3  ;;  %v2369_v33 = vadd.f32 %v2368_v57, %v2291_v16 }
 0x40d   : > { %v2590_v61 = vpop.f32.mrf.mxu0  ;;  %v2485_v6 = vadd.f32 %v2474_v50, %v2369_v33 }
 0x40e   : > { %v2687_v55 = vpop.f32.mrf.mxu1 }
 0x40f   : > { %v2707_v26 = vadd.f32 %v2687_v55, %v2593_v52  ;;  %v2484_v55 = vadd.f32 %v2471_v18, %v2366_v3 }
 0x411   : > { %v2598_v62 = vadd.f32 %v2585_v25, %v2484_v55 }
 0x412   : > { %v2370_v19 = vpop.f32.mrf.mxu2 }
 0x413   : > { %v2476_v9 = vpop.f32.mrf.mxu3 }
 0x415   : > { %v3029_v47 = vpop.f32.mrf.mxu0 }
 0x416   : > { %v2689_v23 = vpop.f32.mrf.mxu1 }
 0x41a   : > { %v2801_v37 = vpop.f32.mrf.mxu2 }
 0x41b   : > { %v2915_v11 = vpop.f32.mrf.mxu3  ;;  %v2821_v49 = vadd.f32 %v2801_v37, %v2707_v26 }
 0x41d   : > { %v3031_v27 = vpop.f32.mrf.mxu0 }
 0x41e   : > { %v2692_v2 = vpop.f32.mrf.mxu1 }
 0x41f   : > { %v2709_v54 = vadd.f32 %v2692_v2, %v2595_v0  ;;  %v2480_v0 = vadd.f32 %v9498_v58, %v2356_v22 }
 0x421   : > { %v2594_v20 = vadd.f32 %v9493_v48, %v2480_v0  ;;  %v2935_v48 = vadd.f32 %v2915_v11, %v2821_v49 }
 0x422   : > { %v2803_v13 = vpop.f32.mrf.mxu2 }
 0x423   : > { %v2917_v31 = vpop.f32.mrf.mxu3  ;;  %v2708_v45 = vadd.f32 %v2689_v23, %v2594_v20  ;;  %v2599_v23 = vadd.f32 %v2588_v34, %v2485_v6  ;;  %v3049_v26 = vadd.f32 %v3029_v47, %v2935_v48 }
 0x425   : > { %v3034_v60 = vpop.f32.mrf.mxu0  ;;  %v2822_v2 = vadd.f32 %v2803_v13, %v2708_v45 }
 0x426   : > { %v2694_v36 = vpop.f32.mrf.mxu1 }
 0x427   : > { %v2710_v29 = vadd.f32 %v2694_v36, %v2596_v24  ;;  %v2936_v58 = vadd.f32 %v2917_v31, %v2822_v2 }
 0x429   : > { %v3050_v36 = vadd.f32 %v3031_v27, %v2936_v58  ;;  %v10693_v58 = vld [vmem:[#allocation18_spill] sm:$0xff] }
 0x42a   : > { %v2806_v17 = vpop.f32.mrf.mxu2 }
 0x42b   : > { %v2920_v51 = vpop.f32.mrf.mxu3  ;;  %v2823_v14 = vadd.f32 %v2806_v17, %v2709_v54 }
 0x42d   : > { %v3036_v63 = vpop.f32.mrf.mxu0  ;;  %v2937_v15 = vadd.f32 %v2920_v51, %v2823_v14 }
 0x42e   : > { %v2697_v32 = vpop.f32.mrf.mxu1 }
 0x42f   : > { %v2711_v30 = vadd.f32 %v2697_v32, %v2597_v39  ;;  %v2371_v32 = vadd.f32 %v2370_v19, %v2293_v28  ;;  %v3051_v37 = vadd.f32 %v3034_v60, %v2937_v15 }
 0x431   : > { %v2486_v46 = vadd.f32 %v2476_v9, %v2371_v32 }
 0x432   : > { %v2808_v59 = vpop.f32.mrf.mxu2 }
 0x433   : > { %v2922_v56 = vpop.f32.mrf.mxu3  ;;  %v2824_v22 = vadd.f32 %v2808_v59, %v2710_v29  ;;  %v2600_v0 = vadd.f32 %v2590_v61, %v2486_v46 }
 0x435   : > { %v3039_v35 = vpop.f32.mrf.mxu0  ;;  %v2938_v1 = vadd.f32 %v2922_v56, %v2824_v22 }
 0x436   : > { %v2699_v5 = vpop.f32.mrf.mxu1 }
 0x437   : > { %v2712_v16 = vadd.f32 %v2699_v5, %v2598_v62  ;;  %v3052_v9 = vadd.f32 %v3036_v63, %v2938_v1 }
 0x43a   : > { %v2811_v12 = vpop.f32.mrf.mxu2 }
 0x43b   : > { %v2925_v43 = vpop.f32.mrf.mxu3  ;;  %v2825_v4 = vadd.f32 %v2811_v12, %v2711_v30 }
 0x43d   : > { %v3041_v53 = vpop.f32.mrf.mxu0  ;;  %v2939_v19 = vadd.f32 %v2925_v43, %v2825_v4 }
 0x43e   : > { %v2702_v10 = vpop.f32.mrf.mxu1 }
 0x43f   : > { %v2713_v28 = vadd.f32 %v2702_v10, %v2599_v23  ;;  %v3053_v34 = vadd.f32 %v3039_v35, %v2939_v19 }
 0x442   : > { %v2813_v21 = vpop.f32.mrf.mxu2 }
 0x443   : > { %v2927_v7 = vpop.f32.mrf.mxu3  ;;  %v2826_v13 = vadd.f32 %v2813_v21, %v2712_v16 }
 0x445   : > { %v3044_v31 = vpop.f32.mrf.mxu0  ;;  %v2940_v30 = vadd.f32 %v2927_v7, %v2826_v13 }
 0x446   : > { %v2704_v44 = vpop.f32.mrf.mxu1 }
 0x447   : > { %v2714_v11 = vadd.f32 %v2704_v44, %v2600_v0  ;;  %v3054_v61 = vadd.f32 %v3041_v53, %v2940_v30 }
 0x44a   : > { %v2816_v38 = vpop.f32.mrf.mxu2 }
 0x44b   : > { %v2930_v57 = vpop.f32.mrf.mxu3  ;;  %v2827_v50 = vadd.f32 %v2816_v38, %v2713_v28 }
 0x44d   : > { %v2941_v17 = vadd.f32 %v2930_v57, %v2827_v50  ;;  %v3046_v8 = vpop.f32.mrf.mxu0 }
 0x44e   : > { %v3143_v40 = vpop.f32.mrf.mxu1 }
 0x44f   : > { %v3163_v14 = vadd.f32 %v3143_v40, %v3049_v26  ;;  %v3055_v43 = vadd.f32 %v3044_v31, %v2941_v17 }
 0x452   : > { %v2818_v25 = vpop.f32.mrf.mxu2 }
 0x453   : > { %v2828_v51 = vadd.f32 %v2818_v25, %v2714_v11  ;;  %v2932_v38 = vpop.f32.mrf.mxu3 }
 0x455   : > { %v2942_v47 = vadd.f32 %v2932_v38, %v2828_v51 }
 0x456   : > { %v3145_v41 = vpop.f32.mrf.mxu1 }
 0x457   : > { %v3164_v54 = vadd.f32 %v3145_v41, %v3050_v36  ;;  %v3056_v40 = vadd.f32 %v3046_v8, %v2942_v47  ;;  %v9531_v8 = vld [vmem:[%s10646_s7] ss:$0 sm:$0xff] }
 0x459   : > { %v3171_v59 = vadd.f32 %v3164_v54, %v3163_v14 }
 0x45e   : > { %v3148_v52 = vpop.f32.mrf.mxu1 }
 0x45f   : > { %v3165_v5 = vadd.f32 %v3148_v52, %v3051_v37 }
 0x461   : > { %v3172_v27 = vadd.f32 %v3171_v59, %v3165_v5 }
 0x466   : > { %v3150_v42 = vpop.f32.mrf.mxu1 }
 0x467   : > { %v3166_v56 = vadd.f32 %v3150_v42, %v3052_v9 }
 0x469   : > { %v3173_v41 = vadd.f32 %v3172_v27, %v3166_v56 }
 0x46e   : > { %v3153_v39 = vpop.f32.mrf.mxu1 }
 0x46f   : > { %v3167_v12 = vadd.f32 %v3153_v39, %v3053_v34 }
 0x471   : > { %v3174_v21 = vadd.f32 %v3173_v41, %v3167_v12 }
 0x476   : > { %v3155_v18 = vpop.f32.mrf.mxu1 }
 0x477   : > { %v3168_v60 = vadd.f32 %v3155_v18, %v3054_v61 }
 0x479   : > { %v3175_v44 = vadd.f32 %v3174_v21, %v3168_v60 }
 0x47e   : > { %v3158_v10 = vpop.f32.mrf.mxu1 }
 0x47f   : > { %v3169_v63 = vadd.f32 %v3158_v10, %v3055_v43 }
 0x481   : > { %v3176_v3 = vadd.f32 %v3175_v44, %v3169_v63 }
 0x486   : > { %v3160_v52 = vpop.f32.mrf.mxu1 }
 0x487   : > { %v3170_v35 = vadd.f32 %v3160_v52, %v3056_v40 }
 0x489   : > { %v3177_v20 = vadd.f32 %v3176_v3, %v3170_v35 }
 0x48b   : > { %3178 = vadd.xlane.f32.xlu1 %v3177_v20  ;;  %v9542_v20 = vld [vmem:[%s10647_s8] ss:$0 sm:$0xff] }
 0x4fe   : > { %v3179_v42 = vpop.xlane.xlu1 %3178 }
 0x4ff   : > { %v3180_v7 = vrot.slane %v3179_v42, 4 }
 0x501   : > { %v3181_v33 = vadd.f32 %v3180_v7, %v3179_v42 }
 0x503   : > { %v3182_v45 = vrot.slane %v3181_v33, 2 }
 0x505   : > { %v3183_v24 = vadd.f32 %v3182_v45, %v3181_v33 }
 0x507   : > { %v3184_v39 = vrot.slane %v3183_v24, 1 }
 0x509   : > { %v3185_v55 = vadd.f32 %v3184_v39, %v3183_v24 }
 0x50b   : > { %8075 = vpush %v3185_v55 }
 0x53c   : > { %s8076_s20 = spop %8075 }
 0x53d   : > { %v3187_v2 = vstv %s8076_s20 }
 0x53e   : > { %v3188_v32 = vmul.f32 0.00390625, %v3187_v2 }
 0x540   : > { %v3189_v29 = vsub.f32 %v3163_v14, %v3188_v32  ;;  %v3190_v53 = vsub.f32 %v3164_v54, %v3188_v32  ;;  %v3191_v6 = vsub.f32 %v3165_v5, %v3188_v32  ;;  %v3192_v49 = vsub.f32 %v3166_v56, %v3188_v32 }
 0x541   : > { %v9508_v22 = vsub.f32 %v3167_v12, %v3188_v32  ;;  %v9513_v48 = vsub.f32 %v3168_v60, %v3188_v32  ;;  %v9516_v1 = vsub.f32 %v3169_v63, %v3188_v32  ;;  %v9520_v28 = vsub.f32 %v3170_v35, %v3188_v32  ;;  %v10694_v32 = vld [vmem:[#allocation9_spill] sm:$0xff] }
 0x542   : > { %v3197_v62 = vmul.f32 %v10693_v58, %v3189_v29  ;;  %v3198_v46 = vmul.f32 %v10693_v58, %v3190_v53  ;;  %v3199_v4 = vmul.f32 %v10693_v58, %v3191_v6  ;;  %v3200_v15 = vmul.f32 %v10693_v58, %v3192_v49 }
 0x543   : > { %v3201_v57 = vmul.f32 %v10693_v58, %v9508_v22  ;;  %v3202_v36 = vmul.f32 %v10693_v58, %v9513_v48  ;;  %v3203_v50 = vmul.f32 %v10693_v58, %v9516_v1  ;;  %v3204_v37 = vmul.f32 %v10693_v58, %v9520_v28 }
 0x544   : > { %v3205_v16 = vmul.f32 %v3197_v62, %v3197_v62  ;;  %v3206_v23 = vmul.f32 %v3198_v46, %v3198_v46  ;;  %v3207_v18 = vmul.f32 %v3199_v4, %v3199_v4  ;;  %v3208_v19 = vmul.f32 %v3200_v15, %v3200_v15  ;;  %v10697_v62 = vld [vmem:[#allocation12_spill] sm:$0xff] }
 0x545   : > { %v3209_v26 = vmul.f32 %v3201_v57, %v3201_v57  ;;  %v3210_v31 = vmul.f32 %v3202_v36, %v3202_v36  ;;  %v3211_v9 = vmul.f32 %v3203_v50, %v3203_v50  ;;  %v3212_v11 = vmul.f32 %v3204_v37, %v3204_v37 }
 0x546   : > { %v3213_v13 = vadd.f32 %v3206_v23, %v3205_v16 }
 0x548   : > { %v3214_v0 = vadd.f32 %v3213_v13, %v3207_v18 }
 0x54a   : > { %v3215_v54 = vadd.f32 %v3214_v0, %v3208_v19 }
 0x54c   : > { %v3216_v25 = vadd.f32 %v3215_v54, %v3209_v26 }
 0x54e   : > { %v3217_v30 = vadd.f32 %v3216_v25, %v3210_v31 }
 0x550   : > { %v3218_v14 = vadd.f32 %v3217_v30, %v3211_v9 }
 0x552   : > { %v3219_v5 = vadd.f32 %v3218_v14, %v3212_v11 }
 0x554   : > { %3220 = vadd.xlane.f32.xlu1 %v3219_v5 }
 0x5c7   : > { %v3221_v34 = vpop.xlane.xlu1 %3220 }
 0x5c8   : > { %v3222_v17 = vrot.slane %v3221_v34, 4 }
 0x5ca   : > { %v3223_v51 = vadd.f32 %v3222_v17, %v3221_v34 }
 0x5cc   : > { %v3224_v59 = vrot.slane %v3223_v51, 2 }
 0x5ce   : > { %v3225_v56 = vadd.f32 %v3224_v59, %v3223_v51 }
 0x5d0   : > { %v3226_v10 = vrot.slane %v3225_v56, 1 }
 0x5d2   : > { %v3227_v27 = vadd.f32 %v3226_v10, %v3225_v56 }
 0x5d4   : > { %8077 = vpush %v3227_v27 }
 0x605   : > { %s8078_s21 = spop %8077 }
 0x606   : > { %v3229_v12 = vstv %s8078_s21  ;;  %s510_s21 = scalar_lea.vmem %s10652_s13, %s10738_s17 }
 0x607   : > { %v3230_v61 = vmul.f32 0.00390625, %v3229_v12 }
 0x609   : > { %v3231_v38 = vadd.f32 1e-05, %v3230_v61 }
 0x60b   : > { %8146 = vrsqrt.f32 %v3231_v38  ;;  %vm3238_vm5 = vweird.f32 %v3231_v38 }
 0x611   : > { %v8147_v47 = vpop.eup %8146 }
 0x612   : > { %v3233_v41 = vmul.f32 %v8147_v47, %v3231_v38  ;;  %vm3239_vm4 = vweird.f32 %v8147_v47 }
 0x613   : > { %vm3240_vm6 = vmor %vm3238_vm5, %vm3239_vm4 }
 0x614   : > { %v3234_v60 = vmul.f32 %v8147_v47, %v3233_v41 }
 0x616   : > { %v3235_v43 = vmul.f32 0.5, %v3234_v60 }
 0x618   : > { %v3236_v21 = vsub.f32 1.5, %v3235_v43 }
 0x61a   : > { %v3237_v63 = vmul.f32 %v8147_v47, %v3236_v21 }
 0x61c   : > { %v9533_v44 = vsel %vm3240_vm6, %v8147_v47, %v3237_v63 }
 0x61d   : > { %v3242_v40 = vmul.f32 %v9533_v44, %v3189_v29  ;;  %v3243_v52 = vmul.f32 %v9533_v44, %v3190_v53  ;;  %v3244_v35 = vmul.f32 %v9533_v44, %v3191_v6  ;;  %v3245_v3 = vmul.f32 %v9533_v44, %v3192_v49  ;;  %v10695_v53 = vld [vmem:[#allocation10_spill] sm:$0xff]  ;;  %v10696_v49 = vld [vmem:[#allocation11_spill] sm:$0xff] }
 0x61e   : > { %v3246_v23 = vmul.f32 %v9533_v44, %v9508_v22  ;;  %v3247_v0 = vmul.f32 %v9533_v44, %v9513_v48 }
 0x61f   : > { %v3254_v42 = vmul.f32 %v9531_v8, %v3242_v40  ;;  %v3255_v7 = vmul.f32 %v9531_v8, %v3243_v52  ;;  %v3256_v33 = vmul.f32 %v9531_v8, %v3244_v35  ;;  %v3257_v45 = vmul.f32 %v9531_v8, %v3245_v3 }
 0x620   : > { %v3258_v26 = vmul.f32 %v9531_v8, %v3246_v23  ;;  %v3259_v14 = vmul.f32 %v9531_v8, %v3247_v0 }
 0x621   : > { %v3266_v24 = vadd.f32 %v9542_v20, %v3254_v42  ;;  %v3267_v39 = vadd.f32 %v9542_v20, %v3255_v7  ;;  %v3268_v55 = vadd.f32 %v9542_v20, %v3256_v33  ;;  %v3269_v2 = vadd.f32 %v9542_v20, %v3257_v45  ;;  %v10698_v7 = vld [vmem:[#allocation13_spill] sm:$0xff] }
 0x622   : > { %v3270_v51 = vadd.f32 %v9542_v20, %v3258_v26  ;;  %v3271_v52 = vadd.f32 %v9542_v20, %v3259_v14  ;;  %v10699_v26 = vld [vmem:[#allocation14_spill] sm:$0xff] }
 0x623   : > { %v9553_v29 = vadd.f32 %v3266_v24, %v10694_v32  ;;  %v9556_v6 = vadd.f32 %v3267_v39, %v10695_v53  ;;  %v9559_v58 = vadd.f32 %v3268_v55, %v10696_v49  ;;  %v9562_v46 = vadd.f32 %v3269_v2, %v10697_v62 }
 0x624   : > { %v9615_v33 = vadd.f32 %v3270_v51, %v10698_v7  ;;  %v3248_v49 = vmul.f32 %v9533_v44, %v9516_v1  ;;  %v3249_v62 = vmul.f32 %v9533_v44, %v9520_v28 }
 0x625   : > { %v9565_v4 = vmul.f32 0.70710677, %v9553_v29  ;;  %v9568_v15 = vmul.f32 0.70710677, %v9556_v6  ;;  %v9571_v16 = vmul.f32 0.70710677, %v9559_v58 }
 0x626   : > { %v9576_v57 = vmul.f32 0.70710677, %v9562_v46  ;;  %v3261_v14 = vmul.f32 %v9531_v8, %v3249_v62  ;;  %v9679_v62 = vmul.f32 0.5, %v9556_v6  ;;  %v9695_v6 = vmul.f32 0.5, %v9615_v33 }
 0x627   : > { %v3298_v18 = vmul.f32 %v9565_v4, %v9565_v4  ;;  %v3338_v13 = vmul.f32 %v9568_v15, %v9568_v15  ;;  %v3378_v36 = vmul.f32 %v9571_v16, %v9571_v16 }
 0x628   : > { %v3418_v19 = vmul.f32 %v9576_v57, %v9576_v57 }
 0x629   : > { %v9588_v50 = vmin.f32 %v3298_v18, 16.0  ;;  %v9590_v22 = vmin.f32 %v3338_v13, 16.0  ;;  %v9593_v54 = vmin.f32 %v3378_v36, 16.0 }
 0x62a   : > { %v9595_v37 = vmin.f32 %v3418_v19, 16.0 }
 0x62b   : > { %v3300_v31 = vmul.f32 2.1237322e-06, %v9588_v50  ;;  %v3311_v25 = vmul.f32 3.8918573e-05, %v9588_v50  ;;  %v3340_v9 = vmul.f32 2.1237322e-06, %v9590_v22 }
 0x62c   : > { %v3351_v30 = vmul.f32 3.8918573e-05, %v9590_v22  ;;  %v3380_v48 = vmul.f32 2.1237322e-06, %v9593_v54  ;;  %v3391_v11 = vmul.f32 3.8918573e-05, %v9593_v54 }
 0x62d   : > { %v3301_v5 = vadd.f32 0.00028619796, %v3300_v31  ;;  %v3312_v34 = vadd.f32 0.001143296, %v3311_v25  ;;  %v3341_v17 = vadd.f32 0.00028619796, %v3340_v9  ;;  %v9630_v31 = vadd.f32 %v3271_v52, %v10699_v26 }
 0x62e   : > { %v3352_v59 = vadd.f32 0.001143296, %v3351_v30  ;;  %v3381_v56 = vadd.f32 0.00028619796, %v3380_v48  ;;  %v3392_v10 = vadd.f32 0.001143296, %v3391_v11  ;;  %v3260_v11 = vmul.f32 %v9531_v8, %v3248_v49 }
 0x62f   : > { %v3302_v27 = vmul.f32 %v3301_v5, %v9588_v50  ;;  %v3313_v12 = vmul.f32 %v3312_v34, %v9588_v50  ;;  %v3342_v61 = vmul.f32 %v3341_v17, %v9590_v22  ;;  %v3420_v38 = vmul.f32 2.1237322e-06, %v9595_v37 }
 0x630   : > { %v3353_v47 = vmul.f32 %v3352_v59, %v9590_v22  ;;  %v3382_v41 = vmul.f32 %v3381_v56, %v9593_v54  ;;  %v3393_v60 = vmul.f32 %v3392_v10, %v9593_v54  ;;  %v3431_v43 = vmul.f32 3.8918573e-05, %v9595_v37 }
 0x631   : > { %v3303_v21 = vadd.f32 0.0036580483, %v3302_v27  ;;  %v3314_v63 = vadd.f32 0.014752088, %v3313_v12  ;;  %v3343_v40 = vadd.f32 0.0036580483, %v3342_v61 }
 0x632   : > { %v3354_v35 = vadd.f32 0.014752088, %v3353_v47  ;;  %v3383_v3 = vadd.f32 0.0036580483, %v3382_v41  ;;  %v3394_v42 = vadd.f32 0.014752088, %v3393_v60  ;;  %v3272_v60 = vadd.f32 %v9542_v20, %v3260_v11 }
 0x633   : > { %v3304_v45 = vmul.f32 %v3303_v21, %v9588_v50  ;;  %v3315_v24 = vmul.f32 %v3314_v63, %v9588_v50  ;;  %v3421_v39 = vadd.f32 0.00028619796, %v3420_v38  ;;  %v3344_v55 = vmul.f32 %v3343_v40, %v9590_v22 }
 0x634   : > { %v3355_v2 = vmul.f32 %v3354_v35, %v9590_v22  ;;  %v3395_v32 = vmul.f32 %v3394_v42, %v9593_v54  ;;  %v3432_v53 = vadd.f32 0.001143296, %v3431_v43  ;;  %v3384_v18 = vmul.f32 %v3383_v3, %v9593_v54 }
 0x635   : > { %v3316_v23 = vadd.f32 0.112945676, %v3315_v24  ;;  %v3422_v19 = vmul.f32 %v3421_v39, %v9595_v37  ;;  %v9633_v25 = vmul.f32 0.70710677, %v9615_v33  ;;  %v3305_v9 = vadd.f32 0.05243302, %v3304_v45 }
 0x636   : > { %v3356_v13 = vadd.f32 0.112945676, %v3355_v2  ;;  %v3396_v36 = vadd.f32 0.112945676, %v3395_v32  ;;  %v3433_v0 = vmul.f32 %v3432_v53, %v9595_v37  ;;  %v3345_v30 = vadd.f32 0.05243302, %v3344_v55 }
 0x637   : > { %v3317_v1 = vmul.f32 %v3316_v23, %v9588_v50  ;;  %v3385_v34 = vadd.f32 0.05243302, %v3384_v18  ;;  %v3423_v59 = vadd.f32 0.0036580483, %v3422_v19  ;;  %v9642_v10 = vmul.f32 0.70710677, %v9630_v31 }
 0x638   : > { %v3357_v28 = vmul.f32 %v3356_v13, %v9590_v22  ;;  %v3397_v44 = vmul.f32 %v3396_v36, %v9593_v54  ;;  %v3434_v48 = vadd.f32 0.014752088, %v3433_v0  ;;  %v3306_v27 = vmul.f32 %v3305_v9, %v9588_v50  ;;  %v10701_v2 = vld [vmem:[#allocation16_spill] sm:$0xff] }
 0x639   : > { %v3318_v5 = vadd.f32 0.4994258, %v3317_v1  ;;  %v3458_v61 = vmul.f32 %v9633_v25, %v9633_v25  ;;  %v3346_v38 = vmul.f32 %v3345_v30, %v9590_v22  ;;  %v3386_v21 = vmul.f32 %v3385_v34, %v9593_v54 }
 0x63a   : > { %v3358_v17 = vadd.f32 0.4994258, %v3357_v28  ;;  %v3398_v51 = vadd.f32 0.4994258, %v3397_v44  ;;  %v3435_v56 = vmul.f32 %v3434_v48, %v9595_v37  ;;  %v3273_v63 = vadd.f32 %v9542_v20, %v3261_v14  ;;  %v10700_v20 = vld [vmem:[#allocation15_spill] sm:$0xff] }
 0x63b   : > { %v3319_v12 = vmul.f32 %v3318_v5, %v9588_v50  ;;  %v3424_v35 = vmul.f32 %v3423_v59, %v9595_v37  ;;  %v3307_v3 = vadd.f32 0.18741608, %v3306_v27  ;;  %v3498_v42 = vmul.f32 %v9642_v10, %v9642_v10 }
 0x63c   : > { %v3359_v8 = vmul.f32 %v3358_v17, %v9590_v22  ;;  %v3399_v47 = vmul.f32 %v3398_v51, %v9593_v54  ;;  %v3436_v41 = vadd.f32 0.112945676, %v3435_v56  ;;  %v3347_v7 = vadd.f32 0.18741608, %v3346_v38 }
 0x63d   : > { %v9652_v43 = vadd.f32 1.0, %v3319_v12  ;;  %v9666_v24 = vmin.f32 %v3458_v61, 16.0  ;;  %v9669_v39 = vadd.f32 %v3272_v60, %v10700_v20  ;;  %v3387_v55 = vadd.f32 0.18741608, %v3386_v21 }
 0x63e   : > { %v9656_v40 = vadd.f32 1.0, %v3359_v8  ;;  %v9658_v52 = vadd.f32 1.0, %v3399_v47  ;;  %v3437_v45 = vmul.f32 %v3436_v41, %v9595_v37  ;;  %v9672_v32 = vadd.f32 %v3273_v63, %v10701_v2 }
 0x63f   : > { %8148 = vrcp.f32 %v9652_v43  ;;  %v9675_v53 = vmul.f32 0.5, %v9553_v29  ;;  %v3425_v49 = vadd.f32 0.05243302, %v3424_v35  ;;  %v9682_v23 = vmul.f32 0.5, %v9559_v58 }
 0x640   : > { %8150 = vrcp.f32 %v9656_v40  ;;  %v3308_v18 = vmul.f32 %v3307_v3, %v9588_v50  ;;  %v9685_v13 = vmin.f32 %v3498_v42, 16.0  ;;  %v9688_v36 = vmul.f32 0.5, %v9562_v46 }
 0x641   : > { %8152 = vrcp.f32 %v9658_v52  ;;  %v3348_v19 = vmul.f32 %v3347_v7, %v9590_v22  ;;  %v3438_v29 = vadd.f32 0.4994258, %v3437_v45  ;;  %v3460_v0 = vmul.f32 2.1237322e-06, %v9666_v24 }
 0x642   : > { %v9698_v58 = vmul.f32 0.70710677, %v9669_v39  ;;  %v3388_v50 = vmul.f32 %v3387_v55, %v9593_v54  ;;  %v3471_v9 = vmul.f32 3.8918573e-05, %v9666_v24  ;;  %v3426_v22 = vmul.f32 %v3425_v49, %v9595_v37 }
 0x643   : > { %v3439_v30 = vmul.f32 %v3438_v29, %v9595_v37  ;;  %v3461_v28 = vadd.f32 0.00028619796, %v3460_v0  ;;  %v9709_v33 = vmul.f32 0.70710677, %v9672_v32  ;;  %v3309_v44 = vadd.f32 1.1283791, %v3308_v18 }
 0x644   : > { %v3500_v48 = vmul.f32 2.1237322e-06, %v9685_v13  ;;  %v3349_v54 = vadd.f32 1.1283791, %v3348_v19  ;;  %v3472_v34 = vadd.f32 0.001143296, %v3471_v9  ;;  %v3538_v56 = vmul.f32 %v9698_v58, %v9698_v58 }
 0x645   : > { %v9692_v26 = vpop.eup %8148  ;;  %v9714_v14 = vadd.f32 1.0, %v3439_v30  ;;  %v3462_v5 = vmul.f32 %v3461_v28, %v9666_v24  ;;  %v3389_v51 = vadd.f32 1.1283791, %v3388_v50  ;;  %v3332_v12 = vand.u32 2147483648, %v9652_v43  ;;  %v7942_v28 = vld [vmem:[#allocation3 + $0x78] sm:$0xff] }
 0x646   : > { %v9702_v1 = vpop.eup %8150  ;;  %v3322_v46 = vmul.f32 %v9692_v26, %v9652_v43  ;;  %v3427_v61 = vadd.f32 0.18741608, %v3426_v22  ;;  %v9726_v38 = vmul.f32 %v3309_v44, %v9565_v4  ;;  %v3330_v8 = vand.u32 2147483647, %v9652_v43  ;;  %3747 = vmatpush.bf16.msra.mxu2 %v7942_v28  ;;  %v7940_v28 = vld [vmem:[#allocation3 + $0x68] sm:$0xff] }
 0x647   : > { %v9712_v11 = vpop.eup %8152  ;;  %v3362_v17 = vmul.f32 %v9702_v1, %v9656_v40  ;;  %8154 = vrcp.f32 %v9714_v14  ;;  %v3372_v47 = vand.u32 2147483648, %v9656_v40  ;;  %v3501_v41 = vadd.f32 0.00028619796, %v3500_v48 }
 0x648   : > { %v3402_v59 = vmul.f32 %v9712_v11, %v9658_v52  ;;  %v3323_v27 = vsub.f32 1.0, %v3322_v46  ;;  %vm3326_vm7 = vweird.f32 %v9652_v43  ;;  %v9732_v60 = vmul.f32 %v3349_v54, %v9568_v15 }
 0x649   : > { %v3412_v21 = vand.u32 2147483648, %v9658_v52  ;;  %v3463_v63 = vadd.f32 0.0036580483, %v3462_v5  ;;  %v3473_v35 = vmul.f32 %v3472_v34, %v9666_v24  ;;  %v3363_v3 = vsub.f32 1.0, %v3362_v17 }
 0x64a   : > { %v3370_v42 = vand.u32 2147483647, %v9656_v40  ;;  %v9738_v4 = vmul.f32 %v3389_v51, %v9571_v16  ;;  %v3403_v7 = vsub.f32 1.0, %v3402_v59  ;;  %v3324_v45 = vmul.f32 %v9692_v26, %v3323_v27 }
 0x64b   : > { %v3333_v20 = vor.u32 1.1754944e-38, %v3332_v12  ;;  %vm3366_vm8 = vweird.f32 %v9656_v40  ;;  %v3428_v15 = vmul.f32 %v3427_v61, %v9595_v37  ;;  %v3474_v55 = vadd.f32 0.014752088, %v3473_v35 }
 0x64c   : > { %v9743_v2 = vor.u32 1.1754944e-38, %v3372_v47  ;;  %vm3406_vm9 = vweird.f32 %v9658_v52  ;;  %v3410_v49 = vand.u32 2147483647, %v9658_v52  ;;  %v3502_v18 = vmul.f32 %v3501_v41, %v9685_v13 }
 0x64d   : > { %v9748_v19 = vmin.f32 %v3538_v56, 16.0  ;;  %v9750_v16 = vpop.eup %8154  ;;  %vm9752_vm10 = vcmp.eq.f32.partialorder %v3330_v8, 8.507059e+37  ;;  %v9756_v0 = vor.u32 1.1754944e-38, %v3412_v21  ;;  %v3464_v37 = vmul.f32 %v3463_v63, %v9666_v24  ;;  %v7941_v63 = vld [vmem:[#allocation3 + $0x70] sm:$0xff] }
 0x64e   : > { %v3475_v50 = vmul.f32 %v3474_v55, %v9666_v24  ;;  %v3511_v9 = vmul.f32 3.8918573e-05, %v9685_v13  ;;  %vm3327_vm11 = vweird.f32 %v9692_v26  ;;  %v3364_v46 = vmul.f32 %v9702_v1, %v3363_v3  ;;  %3748 = vmatpush.bf16.msra.mxu2 %v7941_v63  ;;  %v7939_v63 = vld [vmem:[#allocation3 + $0x60] sm:$0xff] }
 0x64f   : > { %v3404_v22 = vmul.f32 %v9712_v11, %v3403_v7  ;;  %v3442_v30 = vmul.f32 %v9750_v16, %v9714_v14  ;;  %v3325_v44 = vadd.f32 %v9692_v26, %v3324_v45  ;;  %vm3367_vm12 = vweird.f32 %v9702_v1  ;;  %vm9778_vm14 = vmor %vm3326_vm7, %vm3327_vm11  ;;  %v7957_v45 = vld [vmem:[#allocation3 + $0xf0] sm:$0xff] }
 0x650   : > { %v9768_v48 = vadd.f32 1.1283791, %v3428_v15  ;;  %v3476_v54 = vadd.f32 0.112945676, %v3475_v50  ;;  %vm3407_vm13 = vweird.f32 %v9712_v11  ;;  %v3450_v34 = vand.u32 2147483647, %v9714_v14  ;;  %vm9802_vm1 = vmor %vm3366_vm8, %vm3367_vm12 }
 0x651   : > { %v3443_v5 = vsub.f32 1.0, %v3442_v30  ;;  %v3503_v17 = vadd.f32 0.0036580483, %v3502_v18  ;;  %v3465_v51 = vadd.f32 0.05243302, %v3464_v37  ;;  %v3365_v61 = vadd.f32 %v9702_v1, %v3364_v46  ;;  %vm9814_vm2 = vmor %vm3406_vm9, %vm3407_vm13 }
 0x652   : > { %v3477_v59 = vmul.f32 %v3476_v54, %v9666_v24  ;;  %v3512_v56 = vadd.f32 0.001143296, %v3511_v9  ;;  %v3540_v27 = vmul.f32 2.1237322e-06, %v9748_v19  ;;  %vm9783_vm15 = vcmp.eq.f32.partialorder %v3370_v42, 8.507059e+37  ;;  %v7950_v54 = vld [vmem:[#allocation3 + $0xb8] sm:$0xff]  ;;  %3749 = vmatpush.bf16.msra.mxu2 %v7940_v28 }
 0x653   : > { %v3405_v47 = vadd.f32 %v9712_v11, %v3404_v22  ;;  %vm9788_vm0 = vcmp.eq.f32.partialorder %v3410_v49, 8.507059e+37  ;;  %v3452_v21 = vand.u32 2147483648, %v9714_v14  ;;  %v3551_v43 = vmul.f32 3.8918573e-05, %v9748_v19  ;;  %3930 = vmatpush.bf16.msrb.mxu0 %v7950_v54 }
 0x654   : > { %v3329_v35 = vsel %vm9778_vm14, %v9692_v26, %v3325_v44  ;;  %v3478_v3 = vadd.f32 0.4994258, %v3477_v59  ;;  %v3513_v42 = vmul.f32 %v3512_v56, %v9685_v13  ;;  %v3541_v7 = vadd.f32 0.00028619796, %v3540_v27  ;;  %v7934_v44 = vld [vmem:[#allocation3 + $0x38] sm:$0xff] }
 0x655   : > { %v3444_v15 = vmul.f32 %v9750_v16, %v3443_v5  ;;  %v3504_v55 = vmul.f32 %v3503_v17, %v9685_v13  ;;  %v3552_v49 = vadd.f32 0.001143296, %v3551_v43  ;;  %v3578_v26 = vmul.f32 %v9709_v33, %v9709_v33  ;;  %v7958_v17 = vld [vmem:[#allocation3 + $0xf8] sm:$0xff]  ;;  %3824 = vmatpush.bf16.msra.mxu3 %v7934_v44 }
 0x656   : > { %v3466_v40 = vmul.f32 %v3465_v51, %v9666_v24  ;;  %v3479_v37 = vmul.f32 %v3478_v3, %v9666_v24  ;;  %v3514_v50 = vadd.f32 0.014752088, %v3513_v42  ;;  %v3542_v9 = vmul.f32 %v3541_v7, %v9748_v19  ;;  %4044 = vmatpush.bf16.msrb.mxu1 %v7958_v17  ;;  %v7949_v3 = vld [vmem:[#allocation3 + $0xb0] sm:$0xff]  ;;  %3750 = vmatpush.bf16.msra.mxu2 %v7939_v63  ;;  %v7955_v63 = vld [vmem:[#allocation3 + $0xe0] sm:$0xff] }
 0x657   : > { %v3334_v46 = vsel %vm9752_vm10, %v3333_v20, %v3329_v35  ;;  %v3369_v22 = vsel %vm9802_vm1, %v9702_v1, %v3365_v61  ;;  %v3409_v52 = vsel %vm9814_vm2, %v9712_v11, %v3405_v47  ;;  %v3553_v30 = vmul.f32 %v3552_v49, %v9748_v19  ;;  %v7933_v35 = vld [vmem:[#allocation3 + $0x30] sm:$0xff]  ;;  %3931 = vmatpush.bf16.msrb.mxu0 %v7949_v3  ;;  %v7931_v11 = vld [vmem:[#allocation3 + $0x20] sm:$0xff] }
 0x658   : > { %vm3447_vm3 = vweird.f32 %v9750_v16  ;;  %v9831_v5 = vadd.f32 1.0, %v3479_v37  ;;  %v3515_v29 = vmul.f32 %v3514_v50, %v9685_v13  ;;  %v9834_v20 = vmin.f32 %v3578_v26, 16.0  ;;  %v7932_v37 = vld [vmem:[#allocation3 + $0x28] sm:$0xff] }
 0x659   : > { %v3445_v1 = vadd.f32 %v9750_v16, %v3444_v15  ;;  %v3505_v51 = vadd.f32 0.05243302, %v3504_v55  ;;  %v3543_v59 = vadd.f32 0.0036580483, %v3542_v9  ;;  %v3554_v56 = vadd.f32 0.014752088, %v3553_v30  ;;  %3825 = vmatpush.bf16.msra.mxu3 %v7933_v35 }
 0x65a   : > { %vm3446_vm4 = vweird.f32 %v9714_v14  ;;  %vm9838_vm5 = vcmp.eq.f32.partialorder %v3450_v34, 8.507059e+37  ;;  %v3467_v27 = vadd.f32 0.18741608, %v3466_v40  ;;  %8156 = vrcp.f32 %v9831_v5  ;;  %4045 = vmatpush.bf16.msrb.mxu1 %v7957_v45  ;;  %v7938_v40 = vld [vmem:[#allocation3 + $0x58] sm:$0xff]  ;;  %v7956_v30 = vld [vmem:[#allocation3 + $0xe8] sm:$0xff] }
 0x65b   : > { %v9844_v12 = vmul.f32 %v3334_v46, %v9726_v38  ;;  %v3453_v61 = vor.u32 1.1754944e-38, %v3452_v21  ;;  %v3516_v47 = vadd.f32 0.112945676, %v3515_v29  ;;  %v3544_v43 = vmul.f32 %v3543_v59, %v9748_v19  ;;  %vm9857_vm6 = vmor %vm3446_vm4, %vm3447_vm3  ;;  %3751 = vmatpush.bf16.msra.mxu2 %v7938_v40 }
 0x65c   : > { %v3374_v34 = vsel %vm9783_vm15, %v9743_v2, %v3369_v22  ;;  %v3414_v42 = vsel %vm9788_vm0, %v9756_v0, %v3409_v52  ;;  %v3555_v21 = vmul.f32 %v3554_v56, %v9748_v19  ;;  %v3580_v7 = vmul.f32 2.1237322e-06, %v9834_v20  ;;  %v7948_v52 = vld [vmem:[#allocation3 + $0xa8] sm:$0xff]  ;;  %v7937_v56 = vld [vmem:[#allocation3 + $0x50] sm:$0xff] }
 0x65d   : > { %v3449_v2 = vsel %vm9857_vm6, %v9750_v16, %v3445_v1  ;;  %v3506_v8 = vmul.f32 %v3505_v51, %v9685_v13  ;;  %v3517_v0 = vmul.f32 %v3516_v47, %v9685_v13  ;;  %v3591_v41 = vmul.f32 3.8918573e-05, %v9834_v20  ;;  %3826 = vmatpush.bf16.msra.mxu3 %v7932_v37  ;;  %3932 = vmatpush.bf16.msrb.mxu0 %v7948_v52 }
 0x65e   : > { %v3468_v14 = vmul.f32 %v3467_v27, %v9666_v24  ;;  %v3545_v15 = vadd.f32 0.05243302, %v3544_v43  ;;  %v3556_v55 = vadd.f32 0.112945676, %v3555_v21  ;;  %v3581_v49 = vadd.f32 0.00028619796, %v3580_v7  ;;  %4046 = vmatpush.bf16.msrb.mxu1 %v7956_v30 }
 0x65f   : > { %v3430_v26 = vmul.f32 %v9768_v48, %v9576_v57  ;;  %v3518_v18 = vadd.f32 0.4994258, %v3517_v0  ;;  %v3592_v16 = vadd.f32 0.001143296, %v3591_v41  ;;  %v9875_v9 = vmul.f32 %v3374_v34, %v9732_v60  ;;  %v7947_v27 = vld [vmem:[#allocation3 + $0xa0] sm:$0xff]  ;;  %3752 = vmatpush.bf16.msra.mxu2 %v7937_v56  ;;  %v7930_v0 = vld [vmem:[#allocation3 + $0x18] sm:$0xff] }
 0x660   : > { %v9872_v50 = vpop.eup %8156  ;;  %v9878_v46 = vmul.f32 %v3414_v42, %v9738_v4  ;;  %v3454_v24 = vsel %vm9838_vm5, %v3453_v61, %v3449_v2  ;;  %v3557_v22 = vmul.f32 %v3556_v55, %v9748_v19  ;;  %v7187_v57 = vclamps-f32 %v9844_v12, 1.0  ;;  %v7946_v41 = vld [vmem:[#allocation3 + $0x98] sm:$0xff] }
 0x661   : > { %v3482_v48 = vmul.f32 %v9872_v50, %v9831_v5  ;;  %v3519_v28 = vmul.f32 %v3518_v18, %v9685_v13  ;;  %v3582_v60 = vmul.f32 %v3581_v49, %v9834_v20  ;;  %v3469_v4 = vadd.f32 1.1283791, %v3468_v14  ;;  %3827 = vmatpush.bf16.msra.mxu3 %v7931_v11  ;;  %3933 = vmatpush.bf16.msrb.mxu0 %v7947_v27  ;;  %v7954_v55 = vld [vmem:[#allocation3 + $0xd8] sm:$0xff]  ;;  %v7944_v27 = vld [vmem:[#allocation3 + $0x88] sm:$0xff] }
 0x662   : > { %v3507_v44 = vadd.f32 0.18741608, %v3506_v8  ;;  %v3558_v54 = vadd.f32 0.4994258, %v3557_v22  ;;  %v3593_v29 = vmul.f32 %v3592_v16, %v9834_v20  ;;  %v3455_v17 = vmul.f32 %v3454_v24, %v3430_v26  ;;  %4047 = vmatpush.bf16.msrb.mxu1 %v7955_v63  ;;  %v7936_v8 = vld [vmem:[#allocation3 + $0x48] sm:$0xff]  ;;  %v7929_v24 = vld [vmem:[#allocation3 + $0x10] sm:$0xff] }
 0x663   : > { %v3483_v1 = vsub.f32 1.0, %v3482_v48  ;;  %v9889_v51 = vadd.f32 1.0, %v3519_v28  ;;  %v3546_v59 = vmul.f32 %v3545_v15, %v9748_v19  ;;  %v3490_v12 = vand.u32 2147483647, %v9831_v5  ;;  %3753 = vmatpush.bf16.msra.mxu2 %v7936_v8  ;;  %v7945_v22 = vld [vmem:[#allocation3 + $0x90] sm:$0xff] }
 0x664   : > { %v3492_v61 = vand.u32 2147483648, %v9831_v5  ;;  %v3559_v47 = vmul.f32 %v3558_v54, %v9748_v19  ;;  %v3594_v43 = vadd.f32 0.014752088, %v3593_v29  ;;  %vm3487_vm7 = vweird.f32 %v9872_v50  ;;  %v7953_v28 = vld [vmem:[#allocation3 + $0xd0] sm:$0xff] }
 0x665   : > { %v3484_v35 = vmul.f32 %v9872_v50, %v3483_v1  ;;  %8158 = vrcp.f32 %v9889_v51  ;;  %v3583_v3 = vadd.f32 0.0036580483, %v3582_v60  ;;  %v7188_v34 = vclamps-f32 %v9875_v9, 1.0  ;;  %3828 = vmatpush.bf16.msra.mxu3 %v7930_v0  ;;  %3934 = vmatpush.bf16.msrb.mxu0 %v7946_v41  ;;  %v7935_v60 = vld [vmem:[#allocation3 + $0x40] sm:$0xff] }
 0x666   : > { %v7189_v42 = vclamps-f32 %v9878_v46, 1.0  ;;  %v3508_v38 = vmul.f32 %v3507_v44, %v9685_v13  ;;  %v9901_v21 = vadd.f32 1.0, %v3559_v47  ;;  %vm3486_vm8 = vweird.f32 %v9831_v5  ;;  %4048 = vmatpush.bf16.msrb.mxu1 %v7954_v55  ;;  %v7943_v0 = vld [vmem:[#allocation3 + $0x80] sm:$0xff] }
 0x667   : > { %v3485_v7 = vadd.f32 %v9872_v50, %v3484_v35  ;;  %v3547_v45 = vadd.f32 0.18741608, %v3546_v59  ;;  %v3595_v2 = vmul.f32 %v3594_v43, %v9834_v20  ;;  %v7190_v14 = vclamps-f32 %v3455_v17, 1.0  ;;  %vm3488_vm9 = vmor %vm3486_vm8, %vm3487_vm7  ;;  %3754 = vmatpush.bf16.msra.mxu2 %v7935_v60  ;;  %v3670_v43 = vld [vmem:[#allocation2 + $0x1] sm:$0xff]  ;;  %v7966_v35 = vld [vmem:[#allocation3 + $0x138] sm:$0xff] }
 0x668   : > { %v3470_v15 = vmul.f32 %v3469_v4, %v9633_v25  ;;  %v3493_v13 = vor.u32 1.1754944e-38, %v3492_v61  ;;  %8160 = vrcp.f32 %v9901_v21  ;;  %vm3491_vm10 = vcmp.eq.f32.partialorder %v3490_v12, 8.507059e+37 }
 0x669   : > { %v3489_v49 = vsel %vm3488_vm9, %v9872_v50, %v3485_v7  ;;  %v3584_v5 = vmul.f32 %v3583_v3, %v9834_v20  ;;  %v3618_v26 = vadd.f32 1.0, %v7187_v57  ;;  %v3596_v16 = vadd.f32 0.112945676, %v3595_v2  ;;  %3829 = vmatpush.bf16.msra.mxu3 %v7929_v24  ;;  %3935 = vmatpush.bf16.msrb.mxu0 %v7945_v22 }
 0x66a   : > { %v3494_v18 = vsel %vm3491_vm10, %v3493_v13, %v3489_v49  ;;  %v3619_v40 = vadd.f32 1.0, %v7188_v34  ;;  %v3620_v37 = vadd.f32 1.0, %v7189_v42  ;;  %v3509_v46 = vadd.f32 1.1283791, %v3508_v38  ;;  %4049 = vmatpush.bf16.msrb.mxu1 %v7953_v28  ;;  %v7927_v38 = vld [vmem:[#allocation3] sm:$0xff] }
 0x66b   : > { %v9912_v25 = vpop.eup %8158  ;;  %v3495_v9 = vmul.f32 %v3494_v18, %v3470_v15  ;;  %vm3526_vm11 = vweird.f32 %v9889_v51  ;;  %v3548_v50 = vmul.f32 %v3547_v45, %v9748_v19  ;;  %v3530_v30 = vand.u32 2147483647, %v9889_v51  ;;  %v7928_v19 = vld [vmem:[#allocation3 + $0x8] sm:$0xff]  ;;  %4158 = vmatpush.bf16.msrb.mxu2 %v7966_v35 }
 0x66c   : > { %v3522_v52 = vmul.f32 %v9912_v25, %v9889_v51  ;;  %v3597_v57 = vmul.f32 %v3596_v16, %v9834_v20  ;;  %v3621_v48 = vadd.f32 1.0, %v7190_v14  ;;  %v3585_v44 = vadd.f32 0.05243302, %v3584_v5  ;;  %v3853_v5 = vld [vmem:[#allocation2 + $0x2] sm:$0xff] }
 0x66d   : > { %v7191_v4 = vclamps-f32 %v3495_v9, 1.0  ;;  %v9921_v54 = vmul.f32 %v3618_v26, %v9675_v53  ;;  %v9924_v29 = vmul.f32 %v3619_v40, %v9679_v62  ;;  %v9929_v56 = vmul.f32 %v3620_v37, %v9682_v23  ;;  %v7952_v53 = vld [vmem:[#allocation3 + $0xc8] sm:$0xff]  ;;  %3830 = vmatpush.bf16.msra.mxu3 %v7928_v19  ;;  %3936 = vmatpush.bf16.msrb.mxu0 %v7944_v27  ;;  %v7990_v27 = vld [vmem:[#allocation3 + $0x1f8] sm:$0xff] }
 0x66e   : > { %v9926_v17 = vpop.eup %8160  ;;  %v3523_v1 = vsub.f32 1.0, %v3522_v52  ;;  %v3598_v59 = vadd.f32 0.4994258, %v3597_v57  ;;  %v9932_v11 = vmul.f32 %v3621_v48, %v9688_v36  ;;  %v3532_v12 = vand.u32 2147483648, %v9889_v51  ;;  %4050 = vmatpush.bf16.msrb.mxu1 %v7952_v53  ;;  %v7965_v51 = vld [vmem:[#allocation3 + $0x130] sm:$0xff]  ;;  %v7964_v57 = vld [vmem:[#allocation3 + $0x128] sm:$0xff] }
 0x66f   : > { %v3549_v62 = vadd.f32 1.1283791, %v3548_v50  ;;  %v3562_v61 = vmul.f32 %v9926_v17, %v9901_v21  ;;  %v3622_v47 = vadd.f32 1.0, %v7191_v4  ;;  %3634 = vst [vmem:[#allocation2 + $0x11] sm:$0xff] %v9921_v54  ;;  %vm3527_vm12 = vweird.f32 %v9912_v25  ;;  %v9976_v50 = vld [vmem:[#allocation2] sm:$0xff]  ;;  %4159 = vmatpush.bf16.msrb.mxu2 %v7965_v51  ;;  %v7961_v51 = vld [vmem:[#allocation3 + $0x110] sm:$0xff] }
 0x670   : > { %v3524_v23 = vmul.f32 %v9912_v25, %v3523_v1  ;;  %v3599_v36 = vmul.f32 %v3598_v59, %v9834_v20  ;;  %3635 = vst [vmem:[#allocation2 + $0x21] sm:$0xff] %v9924_v29  ;;  %v3678_v63 = vpack.c.bf16 %v9921_v54, %v3670_v43  ;;  %v3586_v34 = vmul.f32 %v3585_v44, %v9834_v20  ;;  %vm3528_vm13 = vmor %vm3526_vm11, %vm3527_vm12  ;;  %v7974_v1 = vld [vmem:[#allocation3 + $0x178] sm:$0xff] }
 0x671   : > { %v3563_v3 = vsub.f32 1.0, %v3562_v61  ;;  %v9945_v42 = vmul.f32 %v3622_v47, %v9695_v6  ;;  %3636 = vst [vmem:[#allocation2 + $0x31] sm:$0xff] %v9929_v56  ;;  %v4089_v7 = vpack.c.bf16 %v9924_v29, %v9921_v54  ;;  %v3572_v2 = vand.u32 2147483648, %v9901_v21  ;;  %v7951_v6 = vld [vmem:[#allocation3 + $0xc0] sm:$0xff]  ;;  %3831 = vmatpush.bf16.msra.mxu3 %v7927_v38  ;;  %3937 = vmatpush.bf16.msrb.mxu0 %v7943_v0  ;;  %v7982_v59 = vld [vmem:[#allocation3 + $0x1b8] sm:$0xff]  ;;  %v7980_v0 = vld [vmem:[#allocation3 + $0x1a8] sm:$0xff] }
 0x672   : > { %v3525_v45 = vadd.f32 %v9912_v25, %v3524_v23  ;;  %v9952_v8 = vadd.f32 1.0, %v3599_v36  ;;  %3637 = vst [vmem:[#allocation2 + $0x41] sm:$0xff] %v9932_v11  ;;  %v4090_v41 = vpack.c.bf16 %v9932_v11, %v9929_v56  ;;  %v3533_v14 = vor.u32 1.1754944e-38, %v3532_v12  ;;  %3755 = vmatmul.bf16.vlgmr.msra.gmra.mxu2 %v3678_v63  ;;  %4051 = vmatpush.bf16.msrb.mxu1 %v7951_v6  ;;  %v7963_v12 = vld [vmem:[#allocation3 + $0x120] sm:$0xff]  ;;  %v7989_v36 = vld [vmem:[#allocation3 + $0x1f0] sm:$0xff]  ;;  %v7992_v54 = vld [vmem:[#allocation3 + $0x208] sm:$0xff] }
 0x673   : > { %v3564_v15 = vmul.f32 %v9926_v17, %v3563_v3  ;;  %vm3567_vm14 = vweird.f32 %v9926_v17  ;;  %v3570_v13 = vand.u32 2147483647, %v9901_v21  ;;  %3638 = vst [vmem:[#allocation2 + $0x51] sm:$0xff] %v9945_v42  ;;  %v3510_v55 = vmul.f32 %v3509_v46, %v9642_v10  ;;  %4160 = vmatpush.bf16.msrb.mxu2 %v7964_v57  ;;  %v7986_v57 = vld [vmem:[#allocation3 + $0x1d8] sm:$0xff] }
 0x674   : > { %v3529_v49 = vsel %vm3528_vm13, %v9912_v25, %v3525_v45  ;;  %vm3531_vm15 = vcmp.eq.f32.partialorder %v3530_v30, 8.507059e+37  ;;  %8162 = vrcp.f32 %v9952_v8  ;;  %vm3566_vm0 = vweird.f32 %v9901_v21  ;;  %10718 = vst [vmem:[#allocation18_spill] sm:$0xff] %v9976_v50 }
 0x675   : > { %v3534_v26 = vsel %vm3531_vm15, %v3533_v14, %v3529_v49  ;;  %v3565_v18 = vadd.f32 %v9926_v17, %v3564_v15  ;;  %v3550_v40 = vmul.f32 %v3549_v62, %v9698_v58  ;;  %vm3568_vm1 = vmor %vm3566_vm0, %vm3567_vm14  ;;  %v3573_v10 = vor.u32 1.1754944e-38, %v3572_v2  ;;  %4272 = vmatpush.bf16.msrb.mxu3 %v7974_v1  ;;  %4386 = vmatpush.bf16.msra.mxu0 %v7982_v59  ;;  %v7972_v2 = vld [vmem:[#allocation3 + $0x168] sm:$0xff] }
 0x676   : > { %v3535_v16 = vmul.f32 %v3534_v26, %v3510_v55  ;;  %v3587_v37 = vadd.f32 0.18741608, %v3586_v34  ;;  %v3643_v25 = vld [vmem:[#allocation2 + $0x10] sm:$0xff]  ;;  %vm3571_vm2 = vcmp.eq.f32.partialorder %v3570_v13, 8.507059e+37  ;;  %v3287_v60 = vmul.f32 0.5, %v9630_v31  ;;  %4500 = vmatpush.bf16.msra.mxu1 %v7990_v27  ;;  %v7962_v34 = vld [vmem:[#allocation3 + $0x118] sm:$0xff] }
 0x677   : > { %v9973_v9 = vld [vmem:[#allocation2 + $0x12] sm:$0xff]  ;;  %v3569_v46 = vsel %vm3568_vm1, %v9926_v17, %v3565_v18  ;;  %v3650_v21 = vpack.c.bf16 %v3643_v25, %v9976_v50  ;;  %v9980_v58 = vld [vmem:[#allocation2 + $0x20] sm:$0xff]  ;;  %v3288_v62 = vmul.f32 0.5, %v9669_v39  ;;  %v3612_v23 = vand.u32 2147483648, %v9952_v8  ;;  %4161 = vmatpush.bf16.msrb.mxu2 %v7963_v12  ;;  %v7988_v14 = vld [vmem:[#allocation3 + $0x1e8] sm:$0xff] }
 0x678   : > { %v3861_v24 = vpack.c.bf16 %v9973_v9, %v3853_v5  ;;  %v7192_v22 = vclamps-f32 %v3535_v16, 1.0  ;;  %v3574_v52 = vsel %vm3571_vm2, %v3573_v10, %v3569_v46  ;;  %v3975_v30 = vpack.c.bf16 %v9980_v58, %v3643_v25  ;;  %v7973_v31 = vld [vmem:[#allocation3 + $0x170] sm:$0xff]  ;;  %v7971_v16 = vld [vmem:[#allocation3 + $0x160] sm:$0xff]  ;;  %v7976_v1 = vld [vmem:[#allocation3 + $0x188] sm:$0xff] }
 0x679   : > { %v3575_v48 = vmul.f32 %v3574_v52, %v3550_v40  ;;  %3832 = vmatmul.bf16.vlgmr.msra.gmra.mxu3 %v3650_v21  ;;  %v3588_v4 = vmul.f32 %v3587_v37, %v9834_v20  ;;  %v7981_v20 = vld [vmem:[#allocation3 + $0x1b0] sm:$0xff]  ;;  %v3610_v39 = vand.u32 2147483647, %v9952_v8  ;;  %vm3606_vm4 = vweird.f32 %v9952_v8  ;;  %v3970_v18 = vld [vmem:[#allocation2 + $0x40] sm:$0xff]  ;;  %v7984_v12 = vld [vmem:[#allocation3 + $0x1c8] sm:$0xff] }
 0x67a   : > { %3938 = vmatmul.bf16.vlgmr.msrb.gmra.mxu0 %v3861_v24  ;;  %v8163_v28 = vpop.eup %8162  ;;  %v3623_v44 = vadd.f32 1.0, %v7192_v22  ;;  %4052 = vmatmul.bf16.vlgmr.msrb.gmra.mxu1 %v3975_v30  ;;  %v10000_v45 = vpack.c.bf16 %v9929_v56, %v9924_v29  ;;  %v3613_v6 = vor.u32 1.1754944e-38, %v3612_v23  ;;  %v3645_v49 = vld [vmem:[#allocation2 + $0x30] sm:$0xff]  ;;  %v7979_v37 = vld [vmem:[#allocation3 + $0x1a0] sm:$0xff]  ;;  %v3289_v21 = vmul.f32 0.5, %v9672_v32  ;;  %v7960_v22 = vld [vmem:[#allocation3 + $0x108] sm:$0xff] }
 0x67b   : > { %v7193_v19 = vclamps-f32 %v3575_v48, 1.0  ;;  %v3602_v17 = vmul.f32 %v8163_v28, %v9952_v8  ;;  %v3589_v43 = vadd.f32 1.1283791, %v3588_v4  ;;  %vm3607_vm3 = vweird.f32 %v8163_v28  ;;  %4273 = vmatpush.bf16.msrb.mxu3 %v7973_v31  ;;  %4387 = vmatpush.bf16.msra.mxu0 %v7981_v20  ;;  %v10004_v8 = vld [vmem:[#allocation2 + $0x22] sm:$0xff]  ;;  %v10006_v5 = vld [vmem:[#allocation2 + $0x32] sm:$0xff] }
 0x67c   : > { %v9986_v53 = vmul.f32 %v3623_v44, %v3287_v60  ;;  %vm3608_vm5 = vmor %vm3606_vm4, %vm3607_vm3  ;;  %4501 = vmatpush.bf16.msra.mxu1 %v7989_v36  ;;  %vm3611_vm6 = vcmp.eq.f32.partialorder %v3610_v39, 8.507059e+37  ;;  %4162 = vmatpush.bf16.msrb.mxu2 %v7962_v34  ;;  %v10013_v10 = vpack.c.bf16 %v10006_v5, %v10004_v8  ;;  %v7987_v25 = vld [vmem:[#allocation3 + $0x1e0] sm:$0xff]  ;;  %v3976_v46 = vpack.c.bf16 %v3970_v18, %v3645_v49  ;;  %v7978_v30 = vld [vmem:[#allocation3 + $0x198] sm:$0xff] }
 0x67d   : > { %v3603_v61 = vsub.f32 1.0, %v3602_v17  ;;  %v3624_v47 = vadd.f32 1.0, %v7193_v19  ;;  %v3590_v15 = vmul.f32 %v3589_v43, %v9709_v33  ;;  %v10009_v33 = vpack.c.bf16 %v3645_v49, %v9980_v58  ;;  %v7970_v58 = vld [vmem:[#allocation3 + $0x158] sm:$0xff]  ;;  %v7959_v48 = vld [vmem:[#allocation3 + $0x100] sm:$0xff]  ;;  %v7977_v60 = vld [vmem:[#allocation3 + $0x190] sm:$0xff] }
 0x67e   : > { %3639 = vst [vmem:[#allocation2 + $0x61] sm:$0xff] %v9986_v53  ;;  %v4091_v63 = vpack.c.bf16 %v9986_v53, %v9945_v42  ;;  %v7985_v4 = vld [vmem:[#allocation3 + $0x1d0] sm:$0xff]  ;;  %v3680_v44 = vpack.c.bf16 %v9945_v42, %v9932_v11  ;;  %v7968_v19 = vld [vmem:[#allocation3 + $0x148] sm:$0xff]  ;;  %v7975_v20 = vld [vmem:[#allocation3 + $0x180] sm:$0xff]  ;;  %v4203_v49 = vpack.c.bf16 %v10004_v8, %v9973_v9 }
 0x67f   : > { %v3604_v35 = vmul.f32 %v8163_v28, %v3603_v61  ;;  %v9994_v3 = vmul.f32 %v3624_v47, %v3288_v62  ;;  %4274 = vmatpush.bf16.msrb.mxu3 %v7972_v2  ;;  %4388 = vmatpush.bf16.msra.mxu0 %v7980_v0  ;;  %v3857_v17 = vld [vmem:[#allocation2 + $0x42] sm:$0xff]  ;;  %v3647_v59 = vld [vmem:[#allocation2 + $0x50] sm:$0xff]  ;;  %v7998_v36 = vld [vmem:[#allocation3 + $0x238] sm:$0xff] }
 0x680   : > { %4502 = vmatpush.bf16.msra.mxu1 %v7988_v14  ;;  %4163 = vmatpush.bf16.msrb.mxu2 %v7961_v51  ;;  %v3858_v27 = vld [vmem:[#allocation2 + $0x52] sm:$0xff]  ;;  %v7967_v61 = vld [vmem:[#allocation3 + $0x140] sm:$0xff]  ;;  %v3652_v47 = vpack.c.bf16 %v3647_v59, %v3970_v18  ;;  %v4204_v18 = vpack.c.bf16 %v3857_v17, %v10006_v5 }
 0x681   : > { %v3605_v38 = vadd.f32 %v8163_v28, %v3604_v35  ;;  %3640 = vst [vmem:[#allocation2 + $0x71] sm:$0xff] %v9994_v3  ;;  %v10025_v31 = vpack.c.bf16 %v3858_v27, %v3857_v17  ;;  %v7983_v23 = vld [vmem:[#allocation3 + $0x1c0] sm:$0xff]  ;;  %v7997_v35 = vld [vmem:[#allocation3 + $0x230] sm:$0xff]  ;;  %v3681_v39 = vpack.c.bf16 %v9994_v3, %v9986_v53  ;;  %v7994_v51 = vld [vmem:[#allocation3 + $0x218] sm:$0xff] }
 0x682   : > { %3760 = vmatmul.bf16.gmra.mxu2 %v10000_v45  ;;  %v7991_v29 = vld [vmem:[#allocation3 + $0x200] sm:$0xff]  ;;  %v4430_v11 = vld [vmem:[#allocation2 + $0x91] sm:$0xff] }
 0x683   : > { %v3609_v13 = vsel %vm3608_vm5, %v8163_v28, %v3605_v38  ;;  %4275 = vmatpush.bf16.msrb.mxu3 %v7971_v16  ;;  %4389 = vmatpush.bf16.msra.mxu0 %v7979_v37  ;;  %v7969_v28 = vld [vmem:[#allocation3 + $0x150] sm:$0xff] }
 0x684   : > { %v3614_v55 = vsel %vm3611_vm6, %v3613_v6, %v3609_v13  ;;  %4503 = vmatpush.bf16.msra.mxu1 %v7987_v25  ;;  %4164 = vmatpush.bf16.msrb.mxu2 %v7960_v22  ;;  %v7996_v13 = vld [vmem:[#allocation3 + $0x228] sm:$0xff]  ;;  %v4544_v17 = vld [vmem:[#allocation2 + $0x92] sm:$0xff] }
 0x685   : > { %v3615_v26 = vmul.f32 %v3614_v55, %v3590_v15  ;;  %v3972_v62 = vld [vmem:[#allocation2 + $0x60] sm:$0xff] }
 0x686   : > { %v3977_v43 = vpack.c.bf16 %v3972_v62, %v3647_v59  ;;  %v3859_v38 = vld [vmem:[#allocation2 + $0x62] sm:$0xff] }
 0x687   : > { %v7194_v40 = vclamps-f32 %v3615_v26, 1.0  ;;  %4276 = vmatpush.bf16.msrb.mxu3 %v7970_v58  ;;  %4390 = vmatpush.bf16.msra.mxu0 %v7978_v30  ;;  %v7995_v55 = vld [vmem:[#allocation3 + $0x220] sm:$0xff]  ;;  %v7993_v26 = vld [vmem:[#allocation3 + $0x210] sm:$0xff] }
 0x688   : > { %4504 = vmatpush.bf16.msra.mxu1 %v7986_v57  ;;  %4165 = vmatpush.bf16.msrb.mxu2 %v7959_v48  ;;  %v3649_v34 = vld [vmem:[#allocation2 + $0x70] sm:$0xff] }
 0x689   : > { %v3625_v24 = vadd.f32 1.0, %v7194_v40  ;;  %3837 = vmatmul.bf16.gmra.mxu3 %v10009_v33  ;;  %v3860_v2 = vld [vmem:[#allocation2 + $0x72] sm:$0xff]  ;;  %v3653_v6 = vpack.c.bf16 %v3649_v34, %v3972_v62 }
 0x68a   : > { %3943 = vmatmul.bf16.gmra.mxu0 %v10013_v10  ;;  %4057 = vmatmul.bf16.gmra.mxu1 %v3976_v46  ;;  %v3864_v14 = vpack.c.bf16 %v3860_v2, %v3859_v38 }
 0x68b   : > { %v10018_v52 = vmul.f32 %v3625_v24, %v3289_v21  ;;  %4277 = vmatpush.bf16.msrb.mxu3 %v7969_v28  ;;  %4391 = vmatpush.bf16.msra.mxu0 %v7977_v60 }
 0x68c   : > { %4505 = vmatpush.bf16.msra.mxu1 %v7985_v4  ;;  %4614 = vmatpush.bf16.msra.mxu2 %v7998_v36 }
 0x68d   : > { %3641 = vst [vmem:[#allocation2 + $0x81] sm:$0xff] %v10018_v52  ;;  %v4092_v32 = vpack.c.bf16 %v10018_v52, %v9994_v3 }
 0x68f   : > { %4278 = vmatpush.bf16.msrb.mxu3 %v7968_v19  ;;  %4392 = vmatpush.bf16.msra.mxu0 %v7976_v1 }
 0x690   : > { %4506 = vmatpush.bf16.msra.mxu1 %v7984_v12  ;;  %4615 = vmatpush.bf16.msra.mxu2 %v7997_v35 }
 0x692   : > { %3765 = vmatmul.bf16.gmra.mxu2 %v3680_v44 }
 0x693   : > { %4279 = vmatpush.bf16.msrb.mxu3 %v7967_v61  ;;  %4393 = vmatpush.bf16.msra.mxu0 %v7975_v20 }
 0x694   : > { %4507 = vmatpush.bf16.msra.mxu1 %v7983_v23  ;;  %v3974_v0 = vld [vmem:[#allocation2 + $0x80] sm:$0xff]  ;;  %4616 = vmatpush.bf16.msra.mxu2 %v7996_v13 }
 0x695   : > { %v3978_v15 = vpack.c.bf16 %v3974_v0, %v3649_v34  ;;  %v4202_v56 = vld [vmem:[#allocation2 + $0x82] sm:$0xff]  ;;  %v4320_v9 = vpack.c.bf16 %v9976_v50, %v3974_v0 }
 0x698   : > { %4617 = vmatpush.bf16.msra.mxu2 %v7995_v55 }
 0x699   : > { %3842 = vmatmul.bf16.gmra.mxu3 %v3652_v47 }
 0x69a   : > { %3948 = vmatmul.bf16.gmra.mxu0 %v10025_v31  ;;  %4062 = vmatmul.bf16.gmra.mxu1 %v3977_v43 }
 0x69c   : > { %4618 = vmatpush.bf16.msra.mxu2 %v7994_v51 }
 0x6a0   : > { %4619 = vmatpush.bf16.msra.mxu2 %v7993_v26 }
 0x6a2   : > { %3770 = vmatmul.bf16.gmra.mxu2 %v3681_v39 }
 0x6a4   : > { %4620 = vmatpush.bf16.msra.mxu2 %v7992_v54 }
 0x6a8   : > { %4621 = vmatpush.bf16.msra.mxu2 %v7991_v29 }
 0x6a9   : > { %3847 = vmatmul.bf16.gmra.mxu3 %v3653_v6 }
 0x6aa   : > { %3953 = vmatmul.bf16.gmra.mxu0 %v3864_v14  ;;  %4067 = vmatmul.bf16.gmra.mxu1 %v3978_v15 }
 0x6b2   : > { %4166 = vmatmul.bf16.vlgmr.msrb.gmra.mxu2 %v4089_v7  ;;  %v4205_v7 = vpack.c.bf16 %v3859_v38, %v3858_v27  ;;  %v4548_v27 = vpack.c.bf16 %v4544_v17, %v4202_v56 }
 0x6b9   : > { %4280 = vmatmul.bf16.vlgmr.msrb.gmra.mxu3 %v4203_v49 }
 0x6ba   : > { %4394 = vmatmul.bf16.vlgmr.msra.gmra.mxu0 %v10009_v33  ;;  %4508 = vmatmul.bf16.vlgmr.msra.gmra.mxu1 %v10000_v45  ;;  %v4434_v45 = vpack.c.bf16 %v4430_v11, %v10018_v52 }
 0x6c2   : > { %4171 = vmatmul.bf16.gmra.mxu2 %v4090_v41  ;;  %v4206_v41 = vpack.c.bf16 %v4202_v56, %v3860_v2 }
 0x6c9   : > { %4285 = vmatmul.bf16.gmra.mxu3 %v4204_v18 }
 0x6ca   : > { %4399 = vmatmul.bf16.gmra.mxu0 %v3652_v47  ;;  %4513 = vmatmul.bf16.gmra.mxu1 %v3680_v44 }
 0x6d2   : > { %4176 = vmatmul.bf16.gmra.mxu2 %v4091_v63 }
 0x6d9   : > { %4290 = vmatmul.bf16.gmra.mxu3 %v4205_v7 }
 0x6da   : > { %4404 = vmatmul.bf16.gmra.mxu0 %v3653_v6  ;;  %4518 = vmatmul.bf16.gmra.mxu1 %v3681_v39 }
 0x6e2   : > { %4181 = vmatmul.bf16.gmra.mxu2 %v4092_v32 }
 0x6e9   : > { %4295 = vmatmul.bf16.gmra.mxu3 %v4206_v41 }
 0x6ea   : > { %4409 = vmatmul.bf16.gmra.mxu0 %v4320_v9  ;;  %4523 = vmatmul.bf16.gmra.mxu1 %v4434_v45 }
 0x6f2   : > { %4622 = vmatmul.bf16.vlgmr.msra.gmra.mxu2 %v10013_v10 }
 0x6f5   : > { %v3756_v53 = vpop.f32.mrf.mxu2 }
 0x6f7   : > { %v3939_v42 = vpop.f32.mrf.mxu0  ;;  %v4053_v63 = vpop.f32.mrf.mxu1 }
 0x6fc   : > { %v3833_v8 = vpop.f32.mrf.mxu3 }
 0x6fd   : > { %v3834_v5 = vadd.f32 %v3833_v8, %v3756_v53  ;;  %v10050_v16 = vpop.f32.mrf.mxu2 }
 0x6ff   : > { %v3959_v3 = vadd.f32 %v3939_v42, %v3834_v5  ;;  %v10052_v40 = vpop.f32.mrf.mxu0  ;;  %v10054_v37 = vpop.f32.mrf.mxu1 }
 0x701   : > { %v4073_v33 = vadd.f32 %v4053_v63, %v3959_v3 }
 0x702   : > { %4627 = vmatmul.bf16.gmra.mxu2 %v10025_v31 }
 0x704   : > { %v10057_v25 = vpop.f32.mrf.mxu3 }
 0x705   : > { %v3761_v46 = vpop.f32.mrf.mxu2 }
 0x707   : > { %v3944_v21 = vpop.f32.mrf.mxu0  ;;  %v4058_v10 = vpop.f32.mrf.mxu1 }
 0x70c   : > { %v3838_v24 = vpop.f32.mrf.mxu3 }
 0x70d   : > { %v3839_v22 = vadd.f32 %v3838_v24, %v3761_v46  ;;  %v3763_v58 = vpop.f32.mrf.mxu2 }
 0x70f   : > { %v3961_v52 = vadd.f32 %v3944_v21, %v3839_v22  ;;  %v3946_v57 = vpop.f32.mrf.mxu0  ;;  %v10059_v32 = vpop.f32.mrf.mxu1  ;;  %v3836_v21 = vadd.f32 %v10057_v25, %v10050_v16 }
 0x711   : > { %v4075_v30 = vadd.f32 %v4058_v10, %v3961_v52 }
 0x712   : > { %4632 = vmatmul.bf16.gmra.mxu2 %v3864_v14 }
 0x714   : > { %v3840_v48 = vpop.f32.mrf.mxu3 }
 0x715   : > { %v3766_v28 = vpop.f32.mrf.mxu2  ;;  %v3841_v24 = vadd.f32 %v3840_v48, %v3763_v58 }
 0x717   : > { %v3949_v44 = vpop.f32.mrf.mxu0  ;;  %v4063_v59 = vpop.f32.mrf.mxu1 }
 0x71c   : > { %v3843_v60 = vpop.f32.mrf.mxu3 }
 0x71d   : > { %v3844_v4 = vadd.f32 %v3843_v60, %v3766_v28  ;;  %v3768_v19 = vpop.f32.mrf.mxu2  ;;  %v3962_v28 = vadd.f32 %v3946_v57, %v3841_v24 }
 0x71f   : > { %v3963_v1 = vadd.f32 %v3949_v44, %v3844_v4  ;;  %v3951_v23 = vpop.f32.mrf.mxu0  ;;  %v4065_v35 = vpop.f32.mrf.mxu1 }
 0x721   : > { %v4077_v12 = vadd.f32 %v4063_v59, %v3963_v1  ;;  %v4076_v59 = vadd.f32 %v10059_v32, %v3962_v28 }
 0x722   : > { %4637 = vmatmul.bf16.gmra.mxu2 %v4548_v27 }
 0x724   : > { %v3845_v20 = vpop.f32.mrf.mxu3 }
 0x725   : > { %v3771_v62 = vpop.f32.mrf.mxu2  ;;  %v3846_v60 = vadd.f32 %v3845_v20, %v3768_v19 }
 0x727   : > { %v3954_v38 = vpop.f32.mrf.mxu0  ;;  %v4068_v0 = vpop.f32.mrf.mxu1 }
 0x72c   : > { %v3848_v34 = vpop.f32.mrf.mxu3 }
 0x72d   : > { %v3773_v61 = vpop.f32.mrf.mxu2  ;;  %v3849_v17 = vadd.f32 %v3848_v34, %v3771_v62 }
 0x72f   : > { %v3956_v13 = vpop.f32.mrf.mxu0  ;;  %v4070_v55 = vpop.f32.mrf.mxu1  ;;  %v3965_v48 = vadd.f32 %v3954_v38, %v3849_v17 }
 0x731   : > { %v4079_v34 = vadd.f32 %v4068_v0, %v3965_v48 }
 0x734   : > { %v3850_v6 = vpop.f32.mrf.mxu3 }
 0x735   : > { %v4167_v47 = vpop.f32.mrf.mxu2 }
 0x736   : > { %v4187_v31 = vadd.f32 %v4167_v47, %v4073_v33 }
 0x737   : > { %v4395_v26 = vpop.f32.mrf.mxu0  ;;  %v4509_v18 = vpop.f32.mrf.mxu1 }
 0x73c   : > { %v4281_v49 = vpop.f32.mrf.mxu3 }
 0x73d   : > { %v4169_v43 = vpop.f32.mrf.mxu2 }
 0x73f   : > { %v4397_v7 = vpop.f32.mrf.mxu0  ;;  %v4511_v11 = vpop.f32.mrf.mxu1 }
 0x744   : > { %v4283_v54 = vpop.f32.mrf.mxu3 }
 0x745   : > { %v4172_v36 = vpop.f32.mrf.mxu2 }
 0x746   : > { %v4189_v39 = vadd.f32 %v4172_v36, %v4075_v30  ;;  %v3960_v30 = vadd.f32 %v10052_v40, %v3836_v21  ;;  %v3851_v36 = vadd.f32 %v3850_v6, %v3773_v61 }
 0x747   : > { %v4400_v9 = vpop.f32.mrf.mxu0  ;;  %v4514_v42 = vpop.f32.mrf.mxu1 }
 0x748   : > { %v4074_v4 = vadd.f32 %v10054_v37, %v3960_v30  ;;  %v3966_v20 = vadd.f32 %v3956_v13, %v3851_v36  ;;  %v10719_v36 = vld [vmem:[#allocation17_spill] sm:$0xff] }
 0x749   : > { %vm521_vm7 = vcmp.lt.s32.totalorder %v10719_v36, 8 }
 0x74a   : > { %v4188_v1 = vadd.f32 %v4169_v43, %v4074_v4  ;;  %v4080_v30 = vadd.f32 %v4070_v55, %v3966_v20 }
 0x74c   : > { %v4286_v41 = vpop.f32.mrf.mxu3  ;;  %v4302_v47 = vadd.f32 %v4283_v54, %v4188_v1 }
 0x74d   : > { %v4174_v2 = vpop.f32.mrf.mxu2  ;;  %v4303_v50 = vadd.f32 %v4286_v41, %v4189_v39 }
 0x74e   : > { %v4190_v16 = vadd.f32 %v4174_v2, %v4076_v59  ;;  %v4416_v57 = vadd.f32 %v4397_v7, %v4302_v47 }
 0x74f   : > { %v4402_v8 = vpop.f32.mrf.mxu0  ;;  %v4516_v5 = vpop.f32.mrf.mxu1  ;;  %v4417_v62 = vadd.f32 %v4400_v9, %v4303_v50 }
 0x750   : > { %v4530_v2 = vadd.f32 %v4511_v11, %v4416_v57 }
 0x754   : > { %v4288_v53 = vpop.f32.mrf.mxu3 }
 0x755   : > { %v4177_v14 = vpop.f32.mrf.mxu2  ;;  %v4304_v40 = vadd.f32 %v4288_v53, %v4190_v16 }
 0x756   : > { %v4191_v15 = vadd.f32 %v4177_v14, %v4077_v12  ;;  %v3964_v12 = vadd.f32 %v3951_v23, %v3846_v60  ;;  %v4301_v14 = vadd.f32 %v4281_v49, %v4187_v31  ;;  %v4531_v49 = vadd.f32 %v4514_v42, %v4417_v62 }
 0x757   : > { %v4405_v46 = vpop.f32.mrf.mxu0  ;;  %v4519_v10 = vpop.f32.mrf.mxu1  ;;  %v4418_v32 = vadd.f32 %v4402_v8, %v4304_v40 }
 0x758   : > { %v4078_v19 = vadd.f32 %v4065_v35, %v3964_v12  ;;  %v4415_v21 = vadd.f32 %v4395_v26, %v4301_v14 }
 0x759   : > { %v4532_v13 = vadd.f32 %v4516_v5, %v4418_v32 }
 0x75a   : > { %v4529_v31 = vadd.f32 %v4509_v18, %v4415_v21 }
 0x75c   : > { %v4291_v3 = vpop.f32.mrf.mxu3 }
 0x75d   : > { %v4179_v51 = vpop.f32.mrf.mxu2  ;;  %v4305_v37 = vadd.f32 %v4291_v3, %v4191_v15 }
 0x75e   : > { %v4192_v43 = vadd.f32 %v4179_v51, %v4078_v19 }
 0x75f   : > { %v4407_v44 = vpop.f32.mrf.mxu0  ;;  %v4521_v25 = vpop.f32.mrf.mxu1  ;;  %v4419_v6 = vadd.f32 %v4405_v46, %v4305_v37 }
 0x761   : > { %v4533_v0 = vadd.f32 %v4519_v10, %v4419_v6 }
 0x764   : > { %v4293_v22 = vpop.f32.mrf.mxu3 }
 0x765   : > { %v4182_v29 = vpop.f32.mrf.mxu2  ;;  %v4306_v54 = vadd.f32 %v4293_v22, %v4192_v43 }
 0x766   : > { %v4193_v61 = vadd.f32 %v4182_v29, %v4079_v34 }
 0x767   : > { %v4410_v24 = vpop.f32.mrf.mxu0  ;;  %v4524_v7 = vpop.f32.mrf.mxu1  ;;  %v4420_v15 = vadd.f32 %v4407_v44, %v4306_v54 }
 0x769   : > { %v4534_v55 = vadd.f32 %v4521_v25, %v4420_v15 }
 0x76c   : > { %v4296_v58 = vpop.f32.mrf.mxu3 }
 0x76d   : > { %v4184_v56 = vpop.f32.mrf.mxu2  ;;  %v4307_v38 = vadd.f32 %v4296_v58, %v4193_v61  ;;  %v10720_v58 = vld [vmem:[#allocation18_spill] sm:$0xff] }
 0x76e   : > { %v4194_v26 = vadd.f32 %v4184_v56, %v4080_v30  ;;  %v10068_v48 = vsel %vm521_vm7, 1.0, %v10720_v58 }
 0x76f   : > { %v4421_v41 = vadd.f32 %v4410_v24, %v4307_v38  ;;  %v4412_v46 = vpop.f32.mrf.mxu0  ;;  %v4526_v60 = vpop.f32.mrf.mxu1 }
 0x771   : > { %v4535_v22 = vadd.f32 %v4524_v7, %v4421_v41 }
 0x774   : > { %v4298_v35 = vpop.f32.mrf.mxu3 }
 0x775   : > { %v4623_v45 = vpop.f32.mrf.mxu2  ;;  %v4308_v9 = vadd.f32 %v4298_v35, %v4194_v26 }
 0x776   : > { %v4643_v50 = vadd.f32 %v4623_v45, %v4529_v31 }
 0x777   : > { %v4422_v18 = vadd.f32 %v4412_v46, %v4308_v9 }
 0x779   : > { %v4536_v45 = vadd.f32 %v4526_v60, %v4422_v18 }
 0x77d   : > { %v4625_v63 = vpop.f32.mrf.mxu2 }
 0x77e   : > { %v4644_v39 = vadd.f32 %v4625_v63, %v4530_v2 }
 0x780   : > { %v4651_v53 = vadd.f32 %v4644_v39, %v4643_v50 }
 0x785   : > { %v4628_v33 = vpop.f32.mrf.mxu2 }
 0x786   : > { %v4645_v51 = vadd.f32 %v4628_v33, %v4531_v49 }
 0x788   : > { %v4652_v11 = vadd.f32 %v4651_v53, %v4645_v51 }
 0x78d   : > { %v4630_v52 = vpop.f32.mrf.mxu2 }
 0x78e   : > { %v4646_v8 = vadd.f32 %v4630_v52, %v4532_v13 }
 0x790   : > { %v4653_v63 = vadd.f32 %v4652_v11, %v4646_v8 }
 0x795   : > { %v4633_v27 = vpop.f32.mrf.mxu2 }
 0x796   : > { %v4647_v3 = vadd.f32 %v4633_v27, %v4533_v0 }
 0x798   : > { %v4654_v28 = vadd.f32 %v4653_v63, %v4647_v3 }
 0x79d   : > { %v4635_v23 = vpop.f32.mrf.mxu2 }
 0x79e   : > { %v4648_v42 = vadd.f32 %v4635_v23, %v4534_v55 }
 0x7a0   : > { %v4655_v56 = vadd.f32 %v4654_v28, %v4648_v42 }
 0x7a5   : > { %v4638_v29 = vpop.f32.mrf.mxu2 }
 0x7a6   : > { %v4649_v5 = vadd.f32 %v4638_v29, %v4535_v22 }
 0x7a8   : > { %v4656_v4 = vadd.f32 %v4655_v56, %v4649_v5 }
 0x7ad   : > { %v4640_v33 = vpop.f32.mrf.mxu2 }
 0x7ae   : > { %v4650_v10 = vadd.f32 %v4640_v33, %v4536_v45  ;;  %v10093_v45 = vld [vmem:[%s10648_s9] ss:$0 sm:$0xff] }
 0x7b0   : > { %v4657_v44 = vadd.f32 %v4656_v4, %v4650_v10 }
 0x7b2   : > { %4658 = vadd.xlane.f32.xlu2 %v4657_v44 }
 0x825   : > { %v4659_v52 = vpop.xlane.xlu2 %4658 }
 0x826   : > { %v4660_v17 = vrot.slane %v4659_v52, 4 }
 0x828   : > { %v4661_v1 = vadd.f32 %v4660_v17, %v4659_v52  ;;  %v10104_v17 = vld [vmem:[%s10649_s10] ss:$0 sm:$0xff] }
 0x82a   : > { %v4662_v59 = vrot.slane %v4661_v1, 2 }
 0x82c   : > { %v4663_v27 = vadd.f32 %v4662_v59, %v4661_v1 }
 0x82e   : > { %v4664_v12 = vrot.slane %v4663_v27, 1 }
 0x830   : > { %v4665_v47 = vadd.f32 %v4664_v12, %v4663_v27 }
 0x832   : > { %8079 = vpush %v4665_v47 }
 0x863   : > { %s8080_s26 = spop %8079 }
 0x864   : > { %v4667_v16 = vstv %s8080_s26 }
 0x865   : > { %v4668_v25 = vmul.f32 0.001953125, %v4667_v16 }
 0x867   : > { %v4669_v14 = vsub.f32 %v4643_v50, %v4668_v25  ;;  %v4670_v40 = vsub.f32 %v4644_v39, %v4668_v25  ;;  %v4671_v57 = vsub.f32 %v4645_v51, %v4668_v25  ;;  %v4672_v19 = vsub.f32 %v4646_v8, %v4668_v25 }
 0x868   : > { %v10070_v20 = vsub.f32 %v4647_v3, %v4668_v25  ;;  %v10075_v43 = vsub.f32 %v4648_v42, %v4668_v25  ;;  %v10078_v23 = vsub.f32 %v4649_v5, %v4668_v25  ;;  %v10082_v6 = vsub.f32 %v4650_v10, %v4668_v25 }
 0x869   : > { %v4677_v37 = vmul.f32 %v10068_v48, %v4669_v14  ;;  %v4678_v21 = vmul.f32 %v10068_v48, %v4670_v40  ;;  %v4679_v62 = vmul.f32 %v10068_v48, %v4671_v57  ;;  %v4680_v34 = vmul.f32 %v10068_v48, %v4672_v19 }
 0x86a   : > { %v4681_v54 = vmul.f32 %v10068_v48, %v10070_v20  ;;  %v4682_v30 = vmul.f32 %v10068_v48, %v10075_v43  ;;  %v4683_v39 = vmul.f32 %v10068_v48, %v10078_v23  ;;  %v4684_v35 = vmul.f32 %v10068_v48, %v10082_v6 }
 0x86b   : > { %v4685_v32 = vmul.f32 %v4677_v37, %v4677_v37  ;;  %v4686_v24 = vmul.f32 %v4678_v21, %v4678_v21  ;;  %v4687_v61 = vmul.f32 %v4679_v62, %v4679_v62  ;;  %v4688_v38 = vmul.f32 %v4680_v34, %v4680_v34 }
 0x86c   : > { %v4689_v49 = vmul.f32 %v4681_v54, %v4681_v54  ;;  %v4690_v13 = vmul.f32 %v4682_v30, %v4682_v30  ;;  %v4691_v26 = vmul.f32 %v4683_v39, %v4683_v39  ;;  %v4692_v51 = vmul.f32 %v4684_v35, %v4684_v35 }
 0x86d   : > { %v4693_v2 = vadd.f32 %v4686_v24, %v4685_v32 }
 0x86f   : > { %v4694_v31 = vadd.f32 %v4693_v2, %v4687_v61 }
 0x871   : > { %v4695_v7 = vadd.f32 %v4694_v31, %v4688_v38 }
 0x873   : > { %v4696_v15 = vadd.f32 %v4695_v7, %v4689_v49 }
 0x875   : > { %v4697_v50 = vadd.f32 %v4696_v15, %v4690_v13 }
 0x877   : > { %v4698_v0 = vadd.f32 %v4697_v50, %v4691_v26 }
 0x879   : > { %v4699_v41 = vadd.f32 %v4698_v0, %v4692_v51 }
 0x87b   : > { %4700 = vadd.xlane.f32.xlu2 %v4699_v41 }
 0x8ee   : > { %v4701_v9 = vpop.xlane.xlu2 %4700 }
 0x8ef   : > { %v4702_v53 = vrot.slane %v4701_v9, 4 }
 0x8f1   : > { %v4703_v8 = vadd.f32 %v4702_v53, %v4701_v9 }
 0x8f3   : > { %v4704_v29 = vrot.slane %v4703_v8, 2 }
 0x8f5   : > { %v4705_v11 = vadd.f32 %v4704_v29, %v4703_v8 }
 0x8f7   : > { %v4706_v3 = vrot.slane %v4705_v11, 1 }
 0x8f9   : > { %v4707_v55 = vadd.f32 %v4706_v3, %v4705_v11 }
 0x8fb   : > { %8081 = vpush %v4707_v55 }
 0x92c   : > { %s8082_s28 = spop %8081 }
 0x92d   : > { %v4709_v46 = vstv %s8082_s28  ;;  %s7782_s28 = sshll.u32 %s10738_s17, 6 }
 0x92e   : > { %v4710_v18 = vmul.f32 0.001953125, %v4709_v46 }
 0x930   : > { %v4711_v63 = vadd.f32 1e-05, %v4710_v18 }
 0x932   : > { %8164 = vrsqrt.f32 %v4711_v63  ;;  %vm4718_vm9 = vweird.f32 %v4711_v63 }
 0x938   : > { %v8165_v42 = vpop.eup %8164 }
 0x939   : > { %v4713_v22 = vmul.f32 %v8165_v42, %v4711_v63  ;;  %vm4719_vm8 = vweird.f32 %v8165_v42 }
 0x93a   : > { %vm4720_vm10 = vmor %vm4718_vm9, %vm4719_vm8 }
 0x93b   : > { %v4714_v28 = vmul.f32 %v8165_v42, %v4713_v22 }
 0x93d   : > { %v4715_v5 = vmul.f32 0.5, %v4714_v28 }
 0x93f   : > { %v4716_v60 = vsub.f32 1.5, %v4715_v5 }
 0x941   : > { %v4717_v56 = vmul.f32 %v8165_v42, %v4716_v60 }
 0x943   : > { %v10095_v33 = vsel %vm4720_vm10, %v8165_v42, %v4717_v56 }
 0x944   : > { %v4722_v10 = vmul.f32 %v10095_v33, %v4669_v14  ;;  %v4723_v4 = vmul.f32 %v10095_v33, %v4670_v40  ;;  %v4724_v44 = vmul.f32 %v10095_v33, %v4671_v57  ;;  %v4725_v52 = vmul.f32 %v10095_v33, %v4672_v19 }
 0x945   : > { %v4726_v24 = vmul.f32 %v10095_v33, %v10070_v20  ;;  %v4727_v7 = vmul.f32 %v10095_v33, %v10075_v43 }
 0x946   : > { %v4734_v1 = vmul.f32 %v10093_v45, %v4722_v10  ;;  %v4735_v59 = vmul.f32 %v10093_v45, %v4723_v4  ;;  %v4736_v27 = vmul.f32 %v10093_v45, %v4724_v44  ;;  %v4737_v12 = vmul.f32 %v10093_v45, %v4725_v52 }
 0x947   : > { %v4738_v15 = vmul.f32 %v10093_v45, %v4726_v24  ;;  %v4739_v18 = vmul.f32 %v10093_v45, %v4727_v7  ;;  %v4729_v7 = vmul.f32 %v10095_v33, %v10082_v6 }
 0x948   : > { %v10111_v47 = vadd.f32 %v10104_v17, %v4734_v1  ;;  %v10114_v36 = vadd.f32 %v10104_v17, %v4735_v59  ;;  %v10117_v16 = vadd.f32 %v10104_v17, %v4736_v27  ;;  %v10120_v25 = vadd.f32 %v10104_v17, %v4737_v12 }
 0x949   : > { %v10171_v28 = vadd.f32 %v10104_v17, %v4738_v15 }
 0x94a   : > { %v10123_v58 = vmul.f32 0.70710677, %v10111_v47  ;;  %v10126_v14 = vmul.f32 0.70710677, %v10114_v36  ;;  %v10129_v40 = vmul.f32 0.70710677, %v10117_v16 }
 0x94b   : > { %v10132_v57 = vmul.f32 0.70710677, %v10120_v25 }
 0x94c   : > { %v4770_v19 = vmul.f32 %v10123_v58, %v10123_v58  ;;  %v4810_v37 = vmul.f32 %v10126_v14, %v10126_v14  ;;  %v4850_v21 = vmul.f32 %v10129_v40, %v10129_v40 }
 0x94d   : > { %v4890_v62 = vmul.f32 %v10132_v57, %v10132_v57 }
 0x94e   : > { %v10142_v34 = vmin.f32 %v4770_v19, 16.0  ;;  %v10144_v32 = vmin.f32 %v4810_v37, 16.0  ;;  %v10148_v54 = vmin.f32 %v4850_v21, 16.0  ;;  %v10182_v21 = vadd.f32 %v10104_v17, %v4739_v18 }
 0x94f   : > { %v10150_v61 = vmin.f32 %v4890_v62, 16.0  ;;  %v10185_v62 = vmul.f32 0.70710677, %v10171_v28 }
 0x950   : > { %v4772_v2 = vmul.f32 2.1237322e-06, %v10142_v34  ;;  %v4783_v30 = vmul.f32 3.8918573e-05, %v10142_v34  ;;  %v4812_v38 = vmul.f32 2.1237322e-06, %v10144_v32 }
 0x951   : > { %v4823_v31 = vmul.f32 3.8918573e-05, %v10144_v32  ;;  %v4852_v39 = vmul.f32 2.1237322e-06, %v10148_v54  ;;  %v4863_v49 = vmul.f32 3.8918573e-05, %v10148_v54 }
 0x952   : > { %v4773_v20 = vadd.f32 0.00028619796, %v4772_v2  ;;  %v4784_v35 = vadd.f32 0.001143296, %v4783_v30  ;;  %v4813_v13 = vadd.f32 0.00028619796, %v4812_v38 }
 0x953   : > { %v4824_v26 = vadd.f32 0.001143296, %v4823_v31  ;;  %v4853_v50 = vadd.f32 0.00028619796, %v4852_v39  ;;  %v4864_v51 = vadd.f32 0.001143296, %v4863_v49  ;;  %v4728_v49 = vmul.f32 %v10095_v33, %v10078_v23 }
 0x954   : > { %v4774_v0 = vmul.f32 %v4773_v20, %v10142_v34  ;;  %v4785_v41 = vmul.f32 %v4784_v35, %v10142_v34  ;;  %v4814_v9 = vmul.f32 %v4813_v13, %v10144_v32  ;;  %v4892_v53 = vmul.f32 2.1237322e-06, %v10150_v61 }
 0x955   : > { %v4825_v8 = vmul.f32 %v4824_v26, %v10144_v32  ;;  %v4854_v43 = vmul.f32 %v4853_v50, %v10148_v54  ;;  %v4865_v29 = vmul.f32 %v4864_v51, %v10148_v54  ;;  %v4903_v11 = vmul.f32 3.8918573e-05, %v10150_v61 }
 0x956   : > { %v4775_v3 = vadd.f32 0.0036580483, %v4774_v0  ;;  %v4786_v55 = vadd.f32 0.014752088, %v4785_v41  ;;  %v4815_v46 = vadd.f32 0.0036580483, %v4814_v9  ;;  %v4930_v23 = vmul.f32 %v10185_v62, %v10185_v62 }
 0x957   : > { %v4826_v63 = vadd.f32 0.014752088, %v4825_v8  ;;  %v4855_v42 = vadd.f32 0.0036580483, %v4854_v43  ;;  %v4866_v22 = vadd.f32 0.014752088, %v4865_v29  ;;  %v4740_v8 = vmul.f32 %v10093_v45, %v4728_v49 }
 0x958   : > { %v4776_v5 = vmul.f32 %v4775_v3, %v10142_v34  ;;  %v4787_v60 = vmul.f32 %v4786_v55, %v10142_v34  ;;  %v4893_v56 = vadd.f32 0.00028619796, %v4892_v53  ;;  %v4816_v10 = vmul.f32 %v4815_v46, %v10144_v32 }
 0x959   : > { %v4827_v4 = vmul.f32 %v4826_v63, %v10144_v32  ;;  %v4867_v44 = vmul.f32 %v4866_v22, %v10148_v54  ;;  %v4904_v52 = vadd.f32 0.001143296, %v4903_v11  ;;  %v4856_v59 = vmul.f32 %v4855_v42, %v10148_v54 }
 0x95a   : > { %v4788_v1 = vadd.f32 0.112945676, %v4787_v60  ;;  %v4894_v19 = vmul.f32 %v4893_v56, %v10150_v61  ;;  %v4777_v24 = vadd.f32 0.05243302, %v4776_v5  ;;  %v4817_v30 = vadd.f32 0.05243302, %v4816_v10 }
 0x95b   : > { %v4828_v27 = vadd.f32 0.112945676, %v4827_v4  ;;  %v4868_v12 = vadd.f32 0.112945676, %v4867_v44  ;;  %v4905_v37 = vmul.f32 %v4904_v52, %v10150_v61  ;;  %v4857_v35 = vadd.f32 0.05243302, %v4856_v59 }
 0x95c   : > { %v4789_v2 = vmul.f32 %v4788_v1, %v10142_v34  ;;  %v4895_v26 = vadd.f32 0.0036580483, %v4894_v19  ;;  %v10196_v51 = vmul.f32 0.70710677, %v10182_v21  ;;  %v4778_v0 = vmul.f32 %v4777_v24, %v10142_v34 }
 0x95d   : > { %v4829_v38 = vmul.f32 %v4828_v27, %v10144_v32  ;;  %v4869_v31 = vmul.f32 %v4868_v12, %v10148_v54  ;;  %v4906_v39 = vadd.f32 0.014752088, %v4905_v37  ;;  %v4818_v9 = vmul.f32 %v4817_v30, %v10144_v32 }
 0x95e   : > { %v4790_v20 = vadd.f32 0.4994258, %v4789_v2  ;;  %v4858_v29 = vmul.f32 %v4857_v35, %v10148_v54  ;;  %v4741_v11 = vmul.f32 %v10093_v45, %v4729_v7  ;;  %v4896_v46 = vmul.f32 %v4895_v26, %v10150_v61 }
 0x95f   : > { %v4830_v13 = vadd.f32 0.4994258, %v4829_v38  ;;  %v4870_v15 = vadd.f32 0.4994258, %v4869_v31  ;;  %v4907_v50 = vmul.f32 %v4906_v39, %v10150_v61  ;;  %v4779_v18 = vadd.f32 0.18741608, %v4778_v0 }
 0x960   : > { %v4791_v41 = vmul.f32 %v4790_v20, %v10142_v34  ;;  %v4970_v63 = vmul.f32 %v10196_v51, %v10196_v51  ;;  %v4819_v42 = vadd.f32 0.18741608, %v4818_v9  ;;  %v10220_v5 = vmin.f32 %v4930_v23, 16.0 }
 0x961   : > { %v4831_v6 = vmul.f32 %v4830_v13, %v10144_v32  ;;  %v4871_v33 = vmul.f32 %v4870_v15, %v10148_v54  ;;  %v4908_v53 = vadd.f32 0.112945676, %v4907_v50  ;;  %v10223_v45 = vadd.f32 %v10104_v17, %v4740_v8 }
 0x962   : > { %v10206_v43 = vadd.f32 1.0, %v4791_v41  ;;  %v4859_v60 = vadd.f32 0.18741608, %v4858_v29  ;;  %v10226_v56 = vadd.f32 %v10104_v17, %v4741_v11  ;;  %v10229_v10 = vmul.f32 0.5, %v10111_v47 }
 0x963   : > { %v10210_v3 = vadd.f32 1.0, %v4831_v6  ;;  %v10212_v55 = vadd.f32 1.0, %v4871_v33  ;;  %v4909_v22 = vmul.f32 %v4908_v53, %v10150_v61  ;;  %v4897_v4 = vadd.f32 0.05243302, %v4896_v46 }
 0x964   : > { %8166 = vrcp.f32 %v10206_v43  ;;  %v10233_v44 = vmul.f32 0.5, %v10114_v36  ;;  %v10236_v52 = vmul.f32 0.5, %v10117_v16  ;;  %v4780_v1 = vmul.f32 %v4779_v18, %v10142_v34 }
 0x965   : > { %8168 = vrcp.f32 %v10210_v3  ;;  %v10239_v59 = vmin.f32 %v4970_v63, 16.0  ;;  %v10242_v27 = vmul.f32 0.5, %v10120_v25  ;;  %v4820_v17 = vmul.f32 %v4819_v42, %v10144_v32 }
 0x966   : > { %8170 = vrcp.f32 %v10212_v55  ;;  %v4910_v47 = vadd.f32 0.4994258, %v4909_v22  ;;  %v4932_v12 = vmul.f32 2.1237322e-06, %v10220_v5  ;;  %v10249_v36 = vmul.f32 0.5, %v10171_v28 }
 0x967   : > { %v10252_v16 = vmul.f32 0.70710677, %v10223_v45  ;;  %v4860_v34 = vmul.f32 %v4859_v60, %v10148_v54  ;;  %v4943_v37 = vmul.f32 3.8918573e-05, %v10220_v5  ;;  %v4898_v32 = vmul.f32 %v4897_v4, %v10150_v61 }
 0x968   : > { %v4911_v2 = vmul.f32 %v4910_v47, %v10150_v61  ;;  %v4933_v30 = vadd.f32 0.00028619796, %v4932_v12  ;;  %v10263_v28 = vmul.f32 0.70710677, %v10226_v56  ;;  %v4781_v38 = vadd.f32 1.1283791, %v4780_v1 }
 0x969   : > { %v4972_v31 = vmul.f32 2.1237322e-06, %v10239_v59  ;;  %v4821_v54 = vadd.f32 1.1283791, %v4820_v17  ;;  %v4944_v20 = vadd.f32 0.001143296, %v4943_v37  ;;  %v5010_v26 = vmul.f32 %v10252_v16, %v10252_v16 }
 0x96a   : > { %v10246_v19 = vpop.eup %8166  ;;  %v10268_v49 = vadd.f32 1.0, %v4911_v2  ;;  %v4934_v7 = vmul.f32 %v4933_v30, %v10220_v5  ;;  %v4861_v13 = vadd.f32 1.1283791, %v4860_v34  ;;  %v4804_v0 = vand.u32 2147483648, %v10206_v43 }
 0x96b   : > { %v10256_v24 = vpop.eup %8168  ;;  %v4794_v25 = vmul.f32 %v10246_v19, %v10206_v43  ;;  %v4899_v41 = vadd.f32 0.18741608, %v4898_v32  ;;  %v10280_v23 = vmul.f32 %v4781_v38, %v10123_v58  ;;  %v4802_v9 = vand.u32 2147483647, %v10206_v43  ;;  %v8014_v38 = vld [vmem:[#allocation5 + $0x78] sm:$0xff] }
 0x96c   : > { %v10266_v39 = vpop.eup %8170  ;;  %v4834_v35 = vmul.f32 %v10256_v24, %v10210_v3  ;;  %8172 = vrcp.f32 %v10268_v49  ;;  %v4844_v6 = vand.u32 2147483648, %v10210_v3  ;;  %v4973_v33 = vadd.f32 0.00028619796, %v4972_v31  ;;  %5219 = vmatpush.bf16.msra.mxu3 %v8014_v38 }
 0x96d   : > { %v4874_v15 = vmul.f32 %v10266_v39, %v10212_v55  ;;  %v4795_v50 = vsub.f32 1.0, %v4794_v25  ;;  %vm4798_vm11 = vweird.f32 %v10206_v43  ;;  %v10286_v53 = vmul.f32 %v4821_v54, %v10126_v14 }
 0x96e   : > { %v4884_v8 = vand.u32 2147483648, %v10212_v55  ;;  %v4935_v29 = vadd.f32 0.0036580483, %v4934_v7  ;;  %v4945_v11 = vmul.f32 %v4944_v20, %v10220_v5  ;;  %v4835_v46 = vsub.f32 1.0, %v4834_v35 }
 0x96f   : > { %v4842_v18 = vand.u32 2147483647, %v10210_v3  ;;  %v10292_v58 = vmul.f32 %v4861_v13, %v10129_v40  ;;  %v4875_v63 = vsub.f32 1.0, %v4874_v15  ;;  %v4796_v42 = vmul.f32 %v10246_v19, %v4795_v50 }
 0x970   : > { %v4805_v22 = vor.u32 1.1754944e-38, %v4804_v0  ;;  %vm4838_vm12 = vweird.f32 %v10210_v3  ;;  %v4900_v14 = vmul.f32 %v4899_v41, %v10150_v61  ;;  %v4946_v60 = vadd.f32 0.014752088, %v4945_v11  ;;  %v8013_v11 = vld [vmem:[#allocation5 + $0x70] sm:$0xff] }
 0x971   : > { %v10297_v4 = vor.u32 1.1754944e-38, %v4844_v6  ;;  %vm4878_vm13 = vweird.f32 %v10212_v55  ;;  %v4882_v1 = vand.u32 2147483647, %v10212_v55  ;;  %v4974_v17 = vmul.f32 %v4973_v33, %v10239_v59  ;;  %5220 = vmatpush.bf16.msra.mxu3 %v8013_v11 }
 0x972   : > { %v10302_v47 = vmin.f32 %v5010_v26, 16.0  ;;  %v10304_v40 = vpop.eup %8172  ;;  %vm10306_vm14 = vcmp.eq.f32.partialorder %v4802_v9, 8.507059e+37  ;;  %v10310_v34 = vor.u32 1.1754944e-38, %v4884_v8  ;;  %v4936_v61 = vmul.f32 %v4935_v29, %v10220_v5 }
 0x973   : > { %v4947_v37 = vmul.f32 %v4946_v60, %v10220_v5  ;;  %v4983_v25 = vmul.f32 3.8918573e-05, %v10239_v59  ;;  %vm4799_vm15 = vweird.f32 %v10246_v19  ;;  %v4836_v32 = vmul.f32 %v10256_v24, %v4835_v46 }
 0x974   : > { %v4876_v2 = vmul.f32 %v10266_v39, %v4875_v63  ;;  %v4914_v30 = vmul.f32 %v10304_v40, %v10268_v49  ;;  %v4797_v31 = vadd.f32 %v10246_v19, %v4796_v42  ;;  %vm4839_vm0 = vweird.f32 %v10256_v24  ;;  %vm10332_vm2 = vmor %vm4798_vm11, %vm4799_vm15 }
 0x975   : > { %v10322_v54 = vadd.f32 1.1283791, %v4900_v14  ;;  %v4948_v7 = vadd.f32 0.112945676, %v4947_v37  ;;  %vm4879_vm1 = vweird.f32 %v10266_v39  ;;  %v4922_v35 = vand.u32 2147483647, %v10268_v49  ;;  %vm10356_vm5 = vmor %vm4838_vm12, %vm4839_vm0 }
 0x976   : > { %v4915_v20 = vsub.f32 1.0, %v4914_v30  ;;  %v4975_v13 = vadd.f32 0.0036580483, %v4974_v17  ;;  %v4937_v15 = vadd.f32 0.05243302, %v4936_v61  ;;  %v4837_v9 = vadd.f32 %v10256_v24, %v4836_v32  ;;  %vm10368_vm6 = vmor %vm4878_vm13, %vm4879_vm1 }
 0x977   : > { %v4949_v26 = vmul.f32 %v4948_v7, %v10220_v5  ;;  %v4984_v50 = vadd.f32 0.001143296, %v4983_v25  ;;  %v5012_v0 = vmul.f32 2.1237322e-06, %v10302_v47  ;;  %vm10337_vm3 = vcmp.eq.f32.partialorder %v4842_v18, 8.507059e+37  ;;  %v8006_v7 = vld [vmem:[#allocation5 + $0x38] sm:$0xff] }
 0x978   : > { %v4877_v33 = vadd.f32 %v10266_v39, %v4876_v2  ;;  %vm10342_vm4 = vcmp.eq.f32.partialorder %v4882_v1, 8.507059e+37  ;;  %v4924_v29 = vand.u32 2147483648, %v10268_v49  ;;  %v5023_v43 = vmul.f32 3.8918573e-05, %v10302_v47  ;;  %5296 = vmatpush.bf16.msrb.mxu0 %v8006_v7 }
 0x979   : > { %v4801_v46 = vsel %vm10332_vm2, %v10246_v19, %v4797_v31  ;;  %v4950_v63 = vadd.f32 0.4994258, %v4949_v26  ;;  %v4985_v18 = vmul.f32 %v4984_v50, %v10239_v59  ;;  %v5013_v42 = vadd.f32 0.00028619796, %v5012_v0  ;;  %v8012_v31 = vld [vmem:[#allocation5 + $0x68] sm:$0xff] }
 0x97a   : > { %v4916_v60 = vmul.f32 %v10304_v40, %v4915_v20  ;;  %v4976_v1 = vmul.f32 %v4975_v13, %v10239_v59  ;;  %v5024_v17 = vadd.f32 0.001143296, %v5023_v43  ;;  %v5050_v19 = vmul.f32 %v10263_v28, %v10263_v28  ;;  %v8022_v20 = vld [vmem:[#allocation5 + $0xb8] sm:$0xff]  ;;  %5221 = vmatpush.bf16.msra.mxu3 %v8012_v31  ;;  %v8028_v31 = vld [vmem:[#allocation5 + $0xe8] sm:$0xff] }
 0x97b   : > { %v4938_v3 = vmul.f32 %v4937_v15, %v10220_v5  ;;  %v4951_v37 = vmul.f32 %v4950_v63, %v10220_v5  ;;  %v4986_v25 = vadd.f32 0.014752088, %v4985_v18  ;;  %v5014_v32 = vmul.f32 %v5013_v42, %v10302_v47  ;;  %v8030_v15 = vld [vmem:[#allocation5 + $0xf8] sm:$0xff]  ;;  %5402 = vmatpush.bf16.msrb.mxu1 %v8022_v20  ;;  %v8005_v63 = vld [vmem:[#allocation5 + $0x30] sm:$0xff] }
 0x97c   : > { %v4806_v2 = vsel %vm10306_vm14, %v4805_v22, %v4801_v46  ;;  %v4841_v30 = vsel %vm10356_vm5, %v10256_v24, %v4837_v9  ;;  %v4881_v55 = vsel %vm10368_vm6, %v10266_v39, %v4877_v33  ;;  %v5025_v38 = vmul.f32 %v5024_v17, %v10302_v47  ;;  %5516 = vmatpush.bf16.msrb.mxu2 %v8030_v15  ;;  %v8011_v46 = vld [vmem:[#allocation5 + $0x60] sm:$0xff]  ;;  %v8021_v18 = vld [vmem:[#allocation5 + $0xb0] sm:$0xff] }
 0x97d   : > { %vm4919_vm7 = vweird.f32 %v10304_v40  ;;  %v10385_v13 = vadd.f32 1.0, %v4951_v37  ;;  %v4987_v12 = vmul.f32 %v4986_v25, %v10239_v59  ;;  %v10388_v22 = vmin.f32 %v5050_v19, 16.0  ;;  %5297 = vmatpush.bf16.msrb.mxu0 %v8005_v63  ;;  %v8010_v37 = vld [vmem:[#allocation5 + $0x58] sm:$0xff]  ;;  %v8004_v25 = vld [vmem:[#allocation5 + $0x28] sm:$0xff]  ;;  %v8009_v39 = vld [vmem:[#allocation5 + $0x50] sm:$0xff] }
 0x97e   : > { %v4917_v24 = vadd.f32 %v10304_v40, %v4916_v60  ;;  %v4977_v26 = vadd.f32 0.05243302, %v4976_v1  ;;  %v5015_v50 = vadd.f32 0.0036580483, %v5014_v32  ;;  %v5026_v0 = vadd.f32 0.014752088, %v5025_v38  ;;  %5222 = vmatpush.bf16.msra.mxu3 %v8011_v46 }
 0x97f   : > { %vm4918_vm8 = vweird.f32 %v10268_v49  ;;  %vm10392_vm9 = vcmp.eq.f32.partialorder %v4922_v35, 8.507059e+37  ;;  %v4939_v41 = vadd.f32 0.18741608, %v4938_v3  ;;  %8174 = vrcp.f32 %v10385_v13  ;;  %v8029_v60 = vld [vmem:[#allocation5 + $0xf0] sm:$0xff]  ;;  %5403 = vmatpush.bf16.msrb.mxu1 %v8021_v18  ;;  %v8020_v38 = vld [vmem:[#allocation5 + $0xa8] sm:$0xff]  ;;  %v8027_v63 = vld [vmem:[#allocation5 + $0xe0] sm:$0xff] }
 0x980   : > { %v10398_v9 = vmul.f32 %v4806_v2, %v10280_v23  ;;  %v4925_v33 = vor.u32 1.1754944e-38, %v4924_v29  ;;  %v4988_v43 = vadd.f32 0.112945676, %v4987_v12  ;;  %v5016_v11 = vmul.f32 %v5015_v50, %v10302_v47  ;;  %vm10411_vm10 = vmor %vm4918_vm8, %vm4919_vm7  ;;  %5517 = vmatpush.bf16.msrb.mxu2 %v8029_v60 }
 0x981   : > { %v4846_v35 = vsel %vm10337_vm3, %v10297_v4, %v4841_v30  ;;  %v4886_v42 = vsel %vm10342_vm4, %v10310_v34, %v4881_v55  ;;  %v5027_v29 = vmul.f32 %v5026_v0, %v10302_v47  ;;  %v5052_v14 = vmul.f32 2.1237322e-06, %v10388_v22  ;;  %5298 = vmatpush.bf16.msrb.mxu0 %v8004_v25 }
 0x982   : > { %v4921_v4 = vsel %vm10411_vm10, %v10304_v40, %v4917_v24  ;;  %v4978_v6 = vmul.f32 %v4977_v26, %v10239_v59  ;;  %v4989_v34 = vmul.f32 %v4988_v43, %v10239_v59  ;;  %v5063_v8 = vmul.f32 3.8918573e-05, %v10388_v22  ;;  %5223 = vmatpush.bf16.msra.mxu3 %v8010_v37 }
 0x983   : > { %v4940_v49 = vmul.f32 %v4939_v41, %v10220_v5  ;;  %v5017_v1 = vadd.f32 0.05243302, %v5016_v11  ;;  %v5028_v17 = vadd.f32 0.112945676, %v5027_v29  ;;  %v5053_v19 = vadd.f32 0.00028619796, %v5052_v14  ;;  %5404 = vmatpush.bf16.msrb.mxu1 %v8020_v38 }
 0x984   : > { %v4902_v61 = vmul.f32 %v10322_v54, %v10132_v57  ;;  %v4990_v3 = vadd.f32 0.4994258, %v4989_v34  ;;  %v5064_v40 = vadd.f32 0.001143296, %v5063_v8  ;;  %v10429_v2 = vmul.f32 %v4846_v35, %v10286_v53  ;;  %5518 = vmatpush.bf16.msrb.mxu2 %v8028_v31  ;;  %v8003_v41 = vld [vmem:[#allocation5 + $0x20] sm:$0xff]  ;;  %v8008_v34 = vld [vmem:[#allocation5 + $0x48] sm:$0xff] }
 0x985   : > { %v10426_v32 = vpop.eup %8174  ;;  %v10432_v30 = vmul.f32 %v4886_v42, %v10292_v58  ;;  %v4926_v5 = vsel %vm10392_vm9, %v4925_v33, %v4921_v4  ;;  %v5029_v55 = vmul.f32 %v5028_v17, %v10302_v47  ;;  %v7483_v57 = vclamps-f32 %v10398_v9, 1.0  ;;  %v8019_v9 = vld [vmem:[#allocation5 + $0xa0] sm:$0xff]  ;;  %5299 = vmatpush.bf16.msrb.mxu0 %v8003_v41  ;;  %v8002_v8 = vld [vmem:[#allocation5 + $0x18] sm:$0xff]  ;;  %v8017_v38 = vld [vmem:[#allocation5 + $0x90] sm:$0xff] }
 0x986   : > { %v4954_v54 = vmul.f32 %v10426_v32, %v10385_v13  ;;  %v4991_v7 = vmul.f32 %v4990_v3, %v10239_v59  ;;  %v5054_v53 = vmul.f32 %v5053_v19, %v10388_v22  ;;  %v4941_v58 = vadd.f32 1.1283791, %v4940_v49  ;;  %5224 = vmatpush.bf16.msra.mxu3 %v8009_v39  ;;  %v8018_v49 = vld [vmem:[#allocation5 + $0x98] sm:$0xff] }
 0x987   : > { %v4979_v20 = vadd.f32 0.18741608, %v4978_v6  ;;  %v5030_v12 = vadd.f32 0.4994258, %v5029_v55  ;;  %v5065_v15 = vmul.f32 %v5064_v40, %v10388_v22  ;;  %v4927_v24 = vmul.f32 %v4926_v5, %v4902_v61  ;;  %5405 = vmatpush.bf16.msrb.mxu1 %v8019_v9  ;;  %v8026_v19 = vld [vmem:[#allocation5 + $0xd8] sm:$0xff]  ;;  %v8001_v55 = vld [vmem:[#allocation5 + $0x10] sm:$0xff] }
 0x988   : > { %v4955_v26 = vsub.f32 1.0, %v4954_v54  ;;  %v10443_v50 = vadd.f32 1.0, %v4991_v7  ;;  %v5018_v0 = vmul.f32 %v5017_v1, %v10302_v47  ;;  %v4962_v33 = vand.u32 2147483647, %v10385_v13  ;;  %5519 = vmatpush.bf16.msrb.mxu2 %v8027_v63  ;;  %v5142_v63 = vld [vmem:[#allocation2 + $0x1] sm:$0xff] }
 0x989   : > { %v4964_v43 = vand.u32 2147483648, %v10385_v13  ;;  %v5031_v11 = vmul.f32 %v5030_v12, %v10302_v47  ;;  %v5066_v46 = vadd.f32 0.014752088, %v5065_v15  ;;  %vm4959_vm11 = vweird.f32 %v10426_v32  ;;  %5300 = vmatpush.bf16.msrb.mxu0 %v8002_v8 }
 0x98a   : > { %v4956_v18 = vmul.f32 %v10426_v32, %v4955_v26  ;;  %8176 = vrcp.f32 %v10443_v50  ;;  %v5055_v35 = vadd.f32 0.0036580483, %v5054_v53  ;;  %v7484_v42 = vclamps-f32 %v10429_v2, 1.0  ;;  %5225 = vmatpush.bf16.msra.mxu3 %v8008_v34  ;;  %v8025_v53 = vld [vmem:[#allocation5 + $0xd0] sm:$0xff] }
 0x98b   : > { %v7485_v23 = vclamps-f32 %v10432_v30, 1.0  ;;  %v4980_v29 = vmul.f32 %v4979_v20, %v10239_v59  ;;  %v10455_v14 = vadd.f32 1.0, %v5031_v11  ;;  %vm4958_vm12 = vweird.f32 %v10385_v13  ;;  %5406 = vmatpush.bf16.msrb.mxu1 %v8018_v49  ;;  %v8015_v49 = vld [vmem:[#allocation5 + $0x80] sm:$0xff] }
 0x98c   : > { %v4957_v60 = vadd.f32 %v10426_v32, %v4956_v18  ;;  %v5019_v4 = vadd.f32 0.18741608, %v5018_v0  ;;  %v5067_v6 = vmul.f32 %v5066_v46, %v10388_v22  ;;  %v7486_v1 = vclamps-f32 %v4927_v24, 1.0  ;;  %vm4960_vm13 = vmor %vm4958_vm12, %vm4959_vm11  ;;  %5520 = vmatpush.bf16.msrb.mxu2 %v8026_v19 }
 0x98d   : > { %v4942_v17 = vmul.f32 %v4941_v58, %v10185_v62  ;;  %v4965_v59 = vor.u32 1.1754944e-38, %v4964_v43  ;;  %8178 = vrcp.f32 %v10455_v14  ;;  %vm4963_vm14 = vcmp.eq.f32.partialorder %v4962_v33, 8.507059e+37  ;;  %v8007_v58 = vld [vmem:[#allocation5 + $0x40] sm:$0xff]  ;;  %5301 = vmatpush.bf16.msrb.mxu0 %v8001_v55  ;;  %v8016_v33 = vld [vmem:[#allocation5 + $0x88] sm:$0xff] }
 0x98e   : > { %v4961_v61 = vsel %vm4960_vm13, %v10426_v32, %v4957_v60  ;;  %v5056_v13 = vmul.f32 %v5055_v35, %v10388_v22  ;;  %v5090_v3 = vadd.f32 1.0, %v7483_v57  ;;  %v5068_v37 = vadd.f32 0.112945676, %v5067_v6  ;;  %5226 = vmatpush.bf16.msra.mxu3 %v8007_v58  ;;  %v8038_v35 = vld [vmem:[#allocation5 + $0x138] sm:$0xff]  ;;  %v7999_v60 = vld [vmem:[#allocation5] sm:$0xff] }
 0x98f   : > { %v4966_v40 = vsel %vm4963_vm14, %v4965_v59, %v4961_v61  ;;  %v5091_v25 = vadd.f32 1.0, %v7484_v42  ;;  %v5092_v2 = vadd.f32 1.0, %v7485_v23  ;;  %v4981_v5 = vadd.f32 1.1283791, %v4980_v29  ;;  %5407 = vmatpush.bf16.msrb.mxu1 %v8017_v38  ;;  %v10530_v55 = vld [vmem:[#allocation2] sm:$0xff] }
 0x990   : > { %v10466_v62 = vpop.eup %8176  ;;  %v4967_v30 = vmul.f32 %v4966_v40, %v4942_v17  ;;  %vm4998_vm15 = vweird.f32 %v10443_v50  ;;  %v5020_v32 = vmul.f32 %v5019_v4, %v10302_v47  ;;  %v5002_v57 = vand.u32 2147483647, %v10443_v50  ;;  %v8000_v47 = vld [vmem:[#allocation5 + $0x8] sm:$0xff]  ;;  %5521 = vmatpush.bf16.msrb.mxu2 %v8025_v53 }
 0x991   : > { %v4994_v31 = vmul.f32 %v10466_v62, %v10443_v50  ;;  %v5069_v54 = vmul.f32 %v5068_v37, %v10388_v22  ;;  %v5093_v7 = vadd.f32 1.0, %v7486_v1  ;;  %v5057_v12 = vadd.f32 0.05243302, %v5056_v13  ;;  %5302 = vmatpush.bf16.msrb.mxu0 %v8000_v47 }
 0x992   : > { %v7487_v20 = vclamps-f32 %v4967_v30, 1.0  ;;  %v10475_v15 = vmul.f32 %v5090_v3, %v10229_v10  ;;  %v10478_v24 = vmul.f32 %v5091_v25, %v10233_v44  ;;  %v10483_v41 = vmul.f32 %v5092_v2, %v10236_v52  ;;  %v8024_v10 = vld [vmem:[#allocation5 + $0xc8] sm:$0xff]  ;;  %5630 = vmatpush.bf16.msrb.mxu3 %v8038_v35 }
 0x993   : > { %v10480_v26 = vpop.eup %8178  ;;  %v4995_v0 = vsub.f32 1.0, %v4994_v31  ;;  %v5070_v39 = vadd.f32 0.4994258, %v5069_v54  ;;  %v10486_v9 = vmul.f32 %v5093_v7, %v10242_v27  ;;  %v5004_v43 = vand.u32 2147483648, %v10443_v50  ;;  %5408 = vmatpush.bf16.msrb.mxu1 %v8016_v33  ;;  %v5325_v3 = vld [vmem:[#allocation2 + $0x2] sm:$0xff]  ;;  %v8037_v50 = vld [vmem:[#allocation5 + $0x130] sm:$0xff] }
 0x994   : > { %v5021_v44 = vadd.f32 1.1283791, %v5020_v32  ;;  %v5034_v11 = vmul.f32 %v10480_v26, %v10455_v14  ;;  %v5094_v46 = vadd.f32 1.0, %v7487_v20  ;;  %5106 = vst [vmem:[#allocation2 + $0x11] sm:$0xff] %v10475_v15  ;;  %vm4999_vm0 = vweird.f32 %v10466_v62  ;;  %5522 = vmatpush.bf16.msrb.mxu2 %v8024_v10  ;;  %v8036_v7 = vld [vmem:[#allocation5 + $0x128] sm:$0xff]  ;;  %v8054_v33 = vld [vmem:[#allocation5 + $0x1b8] sm:$0xff] }
 0x995   : > { %v4996_v52 = vmul.f32 %v10466_v62, %v4995_v0  ;;  %v5071_v27 = vmul.f32 %v5070_v39, %v10388_v22  ;;  %5107 = vst [vmem:[#allocation2 + $0x21] sm:$0xff] %v10478_v24  ;;  %v5150_v18 = vpack.c.bf16 %v10475_v15, %v5142_v63  ;;  %v5058_v23 = vmul.f32 %v5057_v12, %v10388_v22  ;;  %vm5000_vm1 = vmor %vm4998_vm15, %vm4999_vm0  ;;  %v8046_v39 = vld [vmem:[#allocation5 + $0x178] sm:$0xff] }
 0x996   : > { %v5035_v42 = vsub.f32 1.0, %v5034_v11  ;;  %v10499_v29 = vmul.f32 %v5094_v46, %v10249_v36  ;;  %5108 = vst [vmem:[#allocation2 + $0x31] sm:$0xff] %v10483_v41  ;;  %v5561_v4 = vpack.c.bf16 %v10478_v24, %v10475_v15  ;;  %v5044_v34 = vand.u32 2147483648, %v10455_v14  ;;  %v8023_v36 = vld [vmem:[#allocation5 + $0xc0] sm:$0xff]  ;;  %5303 = vmatpush.bf16.msrb.mxu0 %v7999_v60  ;;  %5631 = vmatpush.bf16.msrb.mxu3 %v8037_v50  ;;  %v8062_v10 = vld [vmem:[#allocation5 + $0x1f8] sm:$0xff]  ;;  %v8064_v15 = vld [vmem:[#allocation5 + $0x208] sm:$0xff] }
 0x997   : > { %v4997_v6 = vadd.f32 %v10466_v62, %v4996_v52  ;;  %v10506_v8 = vadd.f32 1.0, %v5071_v27  ;;  %5109 = vst [vmem:[#allocation2 + $0x41] sm:$0xff] %v10486_v9  ;;  %v5562_v1 = vpack.c.bf16 %v10486_v9, %v10483_v41  ;;  %v5005_v17 = vor.u32 1.1754944e-38, %v5004_v43  ;;  %5227 = vmatmul.bf16.vlgmr.msra.gmra.mxu3 %v5150_v18  ;;  %5409 = vmatpush.bf16.msrb.mxu1 %v8015_v49  ;;  %v8061_v18 = vld [vmem:[#allocation5 + $0x1f0] sm:$0xff]  ;;  %v8034_v60 = vld [vmem:[#allocation5 + $0x118] sm:$0xff]  ;;  %v8044_v49 = vld [vmem:[#allocation5 + $0x168] sm:$0xff] }
 0x998   : > { %v5036_v59 = vmul.f32 %v10480_v26, %v5035_v42  ;;  %vm5039_vm2 = vweird.f32 %v10480_v26  ;;  %v5042_v19 = vand.u32 2147483647, %v10455_v14  ;;  %5110 = vst [vmem:[#allocation2 + $0x51] sm:$0xff] %v10499_v29  ;;  %v4982_v61 = vmul.f32 %v4981_v5, %v10196_v51  ;;  %5523 = vmatpush.bf16.msrb.mxu2 %v8023_v36  ;;  %v8052_v36 = vld [vmem:[#allocation5 + $0x1a8] sm:$0xff] }
 0x999   : > { %v5001_v13 = vsel %vm5000_vm1, %v10466_v62, %v4997_v6  ;;  %vm5003_vm3 = vcmp.eq.f32.partialorder %v5002_v57, 8.507059e+37  ;;  %8180 = vrcp.f32 %v10506_v8  ;;  %vm5038_vm4 = vweird.f32 %v10455_v14 }
 0x99a   : > { %v5006_v40 = vsel %vm5003_vm3, %v5005_v17, %v5001_v13  ;;  %v5037_v37 = vadd.f32 %v10480_v26, %v5036_v59  ;;  %v5022_v2 = vmul.f32 %v5021_v44, %v10252_v16  ;;  %vm5040_vm5 = vmor %vm5038_vm4, %vm5039_vm2  ;;  %v5045_v51 = vor.u32 1.1754944e-38, %v5044_v34  ;;  %5632 = vmatpush.bf16.msrb.mxu3 %v8036_v7  ;;  %v8035_v44 = vld [vmem:[#allocation5 + $0x120] sm:$0xff]  ;;  %5744 = vmatpush.bf16.msra.mxu0 %v8046_v39  ;;  %v8060_v59 = vld [vmem:[#allocation5 + $0x1e8] sm:$0xff] }
 0x99b   : > { %v5007_v25 = vmul.f32 %v5006_v40, %v4982_v61  ;;  %v5059_v62 = vadd.f32 0.18741608, %v5058_v23  ;;  %v5115_v30 = vld [vmem:[#allocation2 + $0x10] sm:$0xff]  ;;  %vm5043_vm6 = vcmp.eq.f32.partialorder %v5042_v19, 8.507059e+37  ;;  %v4759_v20 = vmul.f32 0.5, %v10182_v21  ;;  %5858 = vmatpush.bf16.msra.mxu1 %v8054_v33  ;;  %v8050_v7 = vld [vmem:[#allocation5 + $0x198] sm:$0xff] }
 0x99c   : > { %v10527_v5 = vld [vmem:[#allocation2 + $0x12] sm:$0xff]  ;;  %v5041_v32 = vsel %vm5040_vm5, %v10480_v26, %v5037_v37  ;;  %v5122_v14 = vpack.c.bf16 %v5115_v30, %v10530_v55  ;;  %v10534_v16 = vld [vmem:[#allocation2 + $0x20] sm:$0xff]  ;;  %v4760_v11 = vmul.f32 0.5, %v10223_v45  ;;  %v5084_v27 = vand.u32 2147483648, %v10506_v8  ;;  %5972 = vmatpush.bf16.msra.mxu2 %v8062_v10  ;;  %v8048_v33 = vld [vmem:[#allocation5 + $0x188] sm:$0xff] }
 0x99d   : > { %v5333_v38 = vpack.c.bf16 %v10527_v5, %v5325_v3  ;;  %v7488_v31 = vclamps-f32 %v5007_v25, 1.0  ;;  %v5046_v57 = vsel %vm5043_vm6, %v5045_v51, %v5041_v32  ;;  %v5447_v54 = vpack.c.bf16 %v10534_v16, %v5115_v30  ;;  %v8045_v21 = vld [vmem:[#allocation5 + $0x170] sm:$0xff]  ;;  %v8051_v30 = vld [vmem:[#allocation5 + $0x1a0] sm:$0xff] }
 0x99e   : > { %v5047_v53 = vmul.f32 %v5046_v57, %v5022_v2  ;;  %5304 = vmatmul.bf16.vlgmr.msrb.gmra.mxu0 %v5122_v14  ;;  %v5060_v12 = vmul.f32 %v5059_v62, %v10388_v22  ;;  %v8053_v22 = vld [vmem:[#allocation5 + $0x1b0] sm:$0xff]  ;;  %v5082_v45 = vand.u32 2147483647, %v10506_v8  ;;  %5633 = vmatpush.bf16.msrb.mxu3 %v8035_v44  ;;  %vm5078_vm8 = vweird.f32 %v10506_v8  ;;  %v5442_v25 = vld [vmem:[#allocation2 + $0x40] sm:$0xff]  ;;  %v8032_v57 = vld [vmem:[#allocation5 + $0x108] sm:$0xff] }
 0x99f   : > { %5410 = vmatmul.bf16.vlgmr.msrb.gmra.mxu1 %v5333_v38  ;;  %v8181_v58 = vpop.eup %8180  ;;  %v5095_v47 = vadd.f32 1.0, %v7488_v31  ;;  %5524 = vmatmul.bf16.vlgmr.msrb.gmra.mxu2 %v5447_v54  ;;  %v10554_v34 = vpack.c.bf16 %v10483_v41, %v10478_v24  ;;  %v5085_v17 = vor.u32 1.1754944e-38, %v5084_v27  ;;  %v5117_v3 = vld [vmem:[#allocation2 + $0x30] sm:$0xff]  ;;  %v8043_v2 = vld [vmem:[#allocation5 + $0x160] sm:$0xff]  ;;  %v4761_v38 = vmul.f32 0.5, %v10226_v56 }
 0x9a0   : > { %v7489_v26 = vclamps-f32 %v5047_v53, 1.0  ;;  %v5074_v0 = vmul.f32 %v8181_v58, %v10506_v8  ;;  %v5061_v52 = vadd.f32 1.1283791, %v5060_v12  ;;  %vm5079_vm7 = vweird.f32 %v8181_v58  ;;  %5745 = vmatpush.bf16.msra.mxu0 %v8045_v21  ;;  %5859 = vmatpush.bf16.msra.mxu1 %v8053_v22  ;;  %v10558_v8 = vld [vmem:[#allocation2 + $0x22] sm:$0xff]  ;;  %v10560_v50 = vld [vmem:[#allocation2 + $0x32] sm:$0xff] }
 0x9a1   : > { %v10540_v43 = vmul.f32 %v5095_v47, %v4759_v20  ;;  %vm5080_vm9 = vmor %vm5078_vm8, %vm5079_vm7  ;;  %5973 = vmatpush.bf16.msra.mxu2 %v8061_v18  ;;  %vm5083_vm10 = vcmp.eq.f32.partialorder %v5082_v45, 8.507059e+37  ;;  %v8033_v40 = vld [vmem:[#allocation5 + $0x110] sm:$0xff]  ;;  %v10567_v62 = vpack.c.bf16 %v10560_v50, %v10558_v8  ;;  %v8059_v32 = vld [vmem:[#allocation5 + $0x1e0] sm:$0xff]  ;;  %v5448_v14 = vpack.c.bf16 %v5442_v25, %v5117_v3 }
 0x9a2   : > { %v5075_v46 = vsub.f32 1.0, %v5074_v0  ;;  %v5096_v63 = vadd.f32 1.0, %v7489_v26  ;;  %v5062_v19 = vmul.f32 %v5061_v52, %v10263_v28  ;;  %5634 = vmatpush.bf16.msrb.mxu3 %v8034_v60  ;;  %v10563_v28 = vpack.c.bf16 %v5117_v3, %v10534_v16  ;;  %v8042_v16 = vld [vmem:[#allocation5 + $0x158] sm:$0xff]  ;;  %v8041_v20 = vld [vmem:[#allocation5 + $0x150] sm:$0xff]  ;;  %v8040_v0 = vld [vmem:[#allocation5 + $0x148] sm:$0xff] }
 0x9a3   : > { %5111 = vst [vmem:[#allocation2 + $0x61] sm:$0xff] %v10540_v43  ;;  %v5563_v35 = vpack.c.bf16 %v10540_v43, %v10499_v29  ;;  %v8058_v53 = vld [vmem:[#allocation5 + $0x1d8] sm:$0xff]  ;;  %v8049_v12 = vld [vmem:[#allocation5 + $0x190] sm:$0xff]  ;;  %v5152_v26 = vpack.c.bf16 %v10499_v29, %v10486_v9  ;;  %v5329_v39 = vld [vmem:[#allocation2 + $0x42] sm:$0xff] }
 0x9a4   : > { %v5076_v42 = vmul.f32 %v8181_v58, %v5075_v46  ;;  %v10548_v23 = vmul.f32 %v5096_v63, %v4760_v11  ;;  %5746 = vmatpush.bf16.msra.mxu0 %v8044_v49  ;;  %5860 = vmatpush.bf16.msra.mxu1 %v8052_v36  ;;  %v8057_v47 = vld [vmem:[#allocation5 + $0x1d0] sm:$0xff]  ;;  %v8056_v11 = vld [vmem:[#allocation5 + $0x1c8] sm:$0xff]  ;;  %v8039_v63 = vld [vmem:[#allocation5 + $0x140] sm:$0xff] }
 0x9a5   : > { %5974 = vmatpush.bf16.msra.mxu2 %v8060_v59  ;;  %v5119_v10 = vld [vmem:[#allocation2 + $0x50] sm:$0xff]  ;;  %v8047_v52 = vld [vmem:[#allocation5 + $0x180] sm:$0xff] }
 0x9a6   : > { %v5077_v6 = vadd.f32 %v8181_v58, %v5076_v42  ;;  %5112 = vst [vmem:[#allocation2 + $0x71] sm:$0xff] %v10548_v23  ;;  %5635 = vmatpush.bf16.msrb.mxu3 %v8033_v40  ;;  %v5330_v44 = vld [vmem:[#allocation2 + $0x52] sm:$0xff]  ;;  %v5124_v21 = vpack.c.bf16 %v5119_v10, %v5442_v25  ;;  %v8055_v18 = vld [vmem:[#allocation5 + $0x1c0] sm:$0xff]  ;;  %v5153_v60 = vpack.c.bf16 %v10548_v23, %v10540_v43 }
 0x9a7   : > { %5232 = vmatmul.bf16.gmra.mxu3 %v10554_v34  ;;  %v10579_v22 = vpack.c.bf16 %v5330_v44, %v5329_v39  ;;  %v8070_v42 = vld [vmem:[#allocation5 + $0x238] sm:$0xff]  ;;  %v8069_v45 = vld [vmem:[#allocation5 + $0x230] sm:$0xff]  ;;  %v8067_v3 = vld [vmem:[#allocation5 + $0x220] sm:$0xff]  ;;  %v5675_v40 = vpack.c.bf16 %v10558_v8, %v10527_v5 }
 0x9a8   : > { %v5081_v61 = vsel %vm5080_vm9, %v8181_v58, %v5077_v6  ;;  %5747 = vmatpush.bf16.msra.mxu0 %v8043_v2  ;;  %5861 = vmatpush.bf16.msra.mxu1 %v8051_v30  ;;  %v8031_v58 = vld [vmem:[#allocation5 + $0x100] sm:$0xff]  ;;  %v8065_v25 = vld [vmem:[#allocation5 + $0x210] sm:$0xff]  ;;  %v5676_v2 = vpack.c.bf16 %v5329_v39, %v10560_v50 }
 0x9a9   : > { %v5086_v13 = vsel %vm5083_vm10, %v5085_v17, %v5081_v61  ;;  %5975 = vmatpush.bf16.msra.mxu2 %v8059_v32  ;;  %v8063_v24 = vld [vmem:[#allocation5 + $0x200] sm:$0xff]  ;;  %v5902_v9 = vld [vmem:[#allocation2 + $0x91] sm:$0xff] }
 0x9aa   : > { %v5087_v37 = vmul.f32 %v5086_v13, %v5062_v19  ;;  %5636 = vmatpush.bf16.msrb.mxu3 %v8032_v57  ;;  %v5444_v46 = vld [vmem:[#allocation2 + $0x60] sm:$0xff]  ;;  %v8068_v13 = vld [vmem:[#allocation5 + $0x228] sm:$0xff] }
 0x9ab   : > { %v5449_v27 = vpack.c.bf16 %v5444_v46, %v5119_v10  ;;  %v5331_v49 = vld [vmem:[#allocation2 + $0x62] sm:$0xff] }
 0x9ac   : > { %v7490_v51 = vclamps-f32 %v5087_v37, 1.0  ;;  %5748 = vmatpush.bf16.msra.mxu0 %v8042_v16  ;;  %5862 = vmatpush.bf16.msra.mxu1 %v8050_v7  ;;  %v8066_v37 = vld [vmem:[#allocation5 + $0x218] sm:$0xff] }
 0x9ad   : > { %5976 = vmatpush.bf16.msra.mxu2 %v8058_v53  ;;  %v5121_v6 = vld [vmem:[#allocation2 + $0x70] sm:$0xff] }
 0x9ae   : > { %v5097_v31 = vadd.f32 1.0, %v7490_v51  ;;  %5309 = vmatmul.bf16.gmra.mxu0 %v10563_v28  ;;  %5637 = vmatpush.bf16.msrb.mxu3 %v8031_v58  ;;  %v5332_v36 = vld [vmem:[#allocation2 + $0x72] sm:$0xff]  ;;  %v5125_v59 = vpack.c.bf16 %v5121_v6, %v5444_v46 }
 0x9af   : > { %5415 = vmatmul.bf16.gmra.mxu1 %v10567_v62  ;;  %5529 = vmatmul.bf16.gmra.mxu2 %v5448_v14  ;;  %v10584_v19 = vpack.c.bf16 %v5332_v36, %v5331_v49 }
 0x9b0   : > { %v10572_v54 = vmul.f32 %v5097_v31, %v4761_v38  ;;  %5749 = vmatpush.bf16.msra.mxu0 %v8041_v20  ;;  %5863 = vmatpush.bf16.msra.mxu1 %v8049_v12 }
 0x9b1   : > { %5977 = vmatpush.bf16.msra.mxu2 %v8057_v47 }
 0x9b2   : > { %5113 = vst [vmem:[#allocation2 + $0x81] sm:$0xff] %v10572_v54  ;;  %v5564_v56 = vpack.c.bf16 %v10572_v54, %v10548_v23  ;;  %6086 = vmatpush.bf16.msra.mxu3 %v8070_v42 }
 0x9b4   : > { %5750 = vmatpush.bf16.msra.mxu0 %v8040_v0  ;;  %5864 = vmatpush.bf16.msra.mxu1 %v8048_v33 }
 0x9b5   : > { %5978 = vmatpush.bf16.msra.mxu2 %v8056_v11 }
 0x9b6   : > { %6087 = vmatpush.bf16.msra.mxu3 %v8069_v45 }
 0x9b7   : > { %5237 = vmatmul.bf16.gmra.mxu3 %v5152_v26 }
 0x9b8   : > { %5751 = vmatpush.bf16.msra.mxu0 %v8039_v63  ;;  %5865 = vmatpush.bf16.msra.mxu1 %v8047_v52  ;;  %v6016_v52 = vld [vmem:[#allocation2 + $0x92] sm:$0xff] }
 0x9b9   : > { %5979 = vmatpush.bf16.msra.mxu2 %v8055_v18  ;;  %v5446_v17 = vld [vmem:[#allocation2 + $0x80] sm:$0xff] }
 0x9ba   : > { %v5450_v61 = vpack.c.bf16 %v5446_v17, %v5121_v6  ;;  %6088 = vmatpush.bf16.msra.mxu3 %v8068_v13  ;;  %v5674_v41 = vld [vmem:[#allocation2 + $0x82] sm:$0xff]  ;;  %v5792_v5 = vpack.c.bf16 %v10530_v55, %v5446_v17 }
 0x9bb   : > { %v6020_v45 = vpack.c.bf16 %v6016_v52, %v5674_v41 }
 0x9be   : > { %5314 = vmatmul.bf16.gmra.mxu0 %v5124_v21  ;;  %6089 = vmatpush.bf16.msra.mxu3 %v8067_v3 }
 0x9bf   : > { %5420 = vmatmul.bf16.gmra.mxu1 %v10579_v22  ;;  %5534 = vmatmul.bf16.gmra.mxu2 %v5449_v27 }
 0x9c2   : > { %6090 = vmatpush.bf16.msra.mxu3 %v8066_v37 }
 0x9c6   : > { %6091 = vmatpush.bf16.msra.mxu3 %v8065_v25 }
 0x9c7   : > { %5242 = vmatmul.bf16.gmra.mxu3 %v5153_v60 }
 0x9ca   : > { %6092 = vmatpush.bf16.msra.mxu3 %v8064_v15 }
 0x9ce   : > { %5319 = vmatmul.bf16.gmra.mxu0 %v5125_v59  ;;  %6093 = vmatpush.bf16.msra.mxu3 %v8063_v24 }
 0x9cf   : > { %5425 = vmatmul.bf16.gmra.mxu1 %v10584_v19  ;;  %5539 = vmatmul.bf16.gmra.mxu2 %v5450_v61 }
 0x9d7   : > { %5638 = vmatmul.bf16.vlgmr.msrb.gmra.mxu3 %v5561_v4  ;;  %v5677_v4 = vpack.c.bf16 %v5331_v49, %v5330_v44 }
 0x9de   : > { %5752 = vmatmul.bf16.vlgmr.msra.gmra.mxu0 %v5675_v40 }
 0x9df   : > { %5866 = vmatmul.bf16.vlgmr.msra.gmra.mxu1 %v10563_v28  ;;  %5980 = vmatmul.bf16.vlgmr.msra.gmra.mxu2 %v10554_v34  ;;  %v5906_v34 = vpack.c.bf16 %v5902_v9, %v10572_v54 }
 0x9e7   : > { %5643 = vmatmul.bf16.gmra.mxu3 %v5562_v1  ;;  %v5678_v1 = vpack.c.bf16 %v5674_v41, %v5332_v36 }
 0x9ee   : > { %5757 = vmatmul.bf16.gmra.mxu0 %v5676_v2 }
 0x9ef   : > { %5871 = vmatmul.bf16.gmra.mxu1 %v5124_v21  ;;  %5985 = vmatmul.bf16.gmra.mxu2 %v5152_v26 }
 0x9f7   : > { %5648 = vmatmul.bf16.gmra.mxu3 %v5563_v35 }
 0x9fe   : > { %5762 = vmatmul.bf16.gmra.mxu0 %v5677_v4 }
 0x9ff   : > { %5876 = vmatmul.bf16.gmra.mxu1 %v5125_v59  ;;  %5990 = vmatmul.bf16.gmra.mxu2 %v5153_v60 }
 0xa07   : > { %5653 = vmatmul.bf16.gmra.mxu3 %v5564_v56 }
 0xa0e   : > { %5767 = vmatmul.bf16.gmra.mxu0 %v5678_v1 }
 0xa0f   : > { %5881 = vmatmul.bf16.gmra.mxu1 %v5792_v5  ;;  %5995 = vmatmul.bf16.gmra.mxu2 %v5906_v34 }
 0xa17   : > { %6094 = vmatmul.bf16.vlgmr.msra.gmra.mxu3 %v10567_v62 }
 0xa1a   : > { %v5228_v35 = vpop.f32.mrf.mxu3 }
 0xa1b   : > { %v5305_v29 = vpop.f32.mrf.mxu0 }
 0xa1c   : > { %v5411_v43 = vpop.f32.mrf.mxu1  ;;  %v5306_v8 = vadd.f32 %v5305_v29, %v5228_v35 }
 0xa1e   : > { %v5431_v50 = vadd.f32 %v5411_v43, %v5306_v8 }
 0xa22   : > { %v5525_v51 = vpop.f32.mrf.mxu2  ;;  %v5230_v32 = vpop.f32.mrf.mxu3 }
 0xa23   : > { %v5545_v23 = vadd.f32 %v5525_v51, %v5431_v50  ;;  %v5307_v28 = vpop.f32.mrf.mxu0 }
 0xa24   : > { %v5413_v30 = vpop.f32.mrf.mxu1  ;;  %v5308_v14 = vadd.f32 %v5307_v28, %v5230_v32 }
 0xa26   : > { %v5432_v38 = vadd.f32 %v5413_v30, %v5308_v14 }
 0xa27   : > { %6099 = vmatmul.bf16.gmra.mxu3 %v10579_v22 }
 0xa2a   : > { %v5527_v55 = vpop.f32.mrf.mxu2  ;;  %v5233_v54 = vpop.f32.mrf.mxu3 }
 0xa2b   : > { %v5546_v31 = vadd.f32 %v5527_v55, %v5432_v38  ;;  %v5310_v57 = vpop.f32.mrf.mxu0 }
 0xa2c   : > { %v5416_v16 = vpop.f32.mrf.mxu1  ;;  %v5311_v62 = vadd.f32 %v5310_v57, %v5233_v54 }
 0xa2e   : > { %v5433_v7 = vadd.f32 %v5416_v16, %v5311_v62 }
 0xa32   : > { %v5530_v53 = vpop.f32.mrf.mxu2  ;;  %v5235_v12 = vpop.f32.mrf.mxu3 }
 0xa33   : > { %v5547_v58 = vadd.f32 %v5530_v53, %v5433_v7  ;;  %v5312_v56 = vpop.f32.mrf.mxu0 }
 0xa34   : > { %v5418_v20 = vpop.f32.mrf.mxu1  ;;  %v5313_v47 = vadd.f32 %v5312_v56, %v5235_v12 }
 0xa36   : > { %v5434_v26 = vadd.f32 %v5418_v20, %v5313_v47 }
 0xa37   : > { %6104 = vmatmul.bf16.gmra.mxu3 %v10584_v19 }
 0xa3a   : > { %v5532_v0 = vpop.f32.mrf.mxu2  ;;  %v5238_v44 = vpop.f32.mrf.mxu3 }
 0xa3b   : > { %v5548_v39 = vadd.f32 %v5532_v0, %v5434_v26  ;;  %v5315_v33 = vpop.f32.mrf.mxu0 }
 0xa3c   : > { %v5421_v10 = vpop.f32.mrf.mxu1  ;;  %v5316_v11 = vadd.f32 %v5315_v33, %v5238_v44 }
 0xa3e   : > { %v5435_v46 = vadd.f32 %v5421_v10, %v5316_v11 }
 0xa42   : > { %v5535_v63 = vpop.f32.mrf.mxu2  ;;  %v5240_v27 = vpop.f32.mrf.mxu3 }
 0xa43   : > { %v5549_v21 = vadd.f32 %v5535_v63, %v5435_v46  ;;  %v5317_v22 = vpop.f32.mrf.mxu0 }
 0xa44   : > { %v5318_v18 = vadd.f32 %v5317_v22, %v5240_v27  ;;  %v5423_v42 = vpop.f32.mrf.mxu1 }
 0xa46   : > { %v5436_v60 = vadd.f32 %v5423_v42, %v5318_v18 }
 0xa47   : > { %6109 = vmatmul.bf16.gmra.mxu3 %v6020_v45 }
 0xa4a   : > { %v5537_v6 = vpop.f32.mrf.mxu2  ;;  %v5243_v36 = vpop.f32.mrf.mxu3 }
 0xa4b   : > { %v5550_v49 = vadd.f32 %v5537_v6, %v5436_v60  ;;  %v5320_v37 = vpop.f32.mrf.mxu0 }
 0xa4c   : > { %v5426_v2 = vpop.f32.mrf.mxu1  ;;  %v5321_v0 = vadd.f32 %v5320_v37, %v5243_v36 }
 0xa4e   : > { %v5437_v44 = vadd.f32 %v5426_v2, %v5321_v0 }
 0xa52   : > { %v5245_v17 = vpop.f32.mrf.mxu3  ;;  %v5540_v24 = vpop.f32.mrf.mxu2 }
 0xa53   : > { %v5322_v4 = vpop.f32.mrf.mxu0 }
 0xa54   : > { %v5428_v1 = vpop.f32.mrf.mxu1  ;;  %v5323_v33 = vadd.f32 %v5322_v4, %v5245_v17 }
 0xa56   : > { %v5438_v52 = vadd.f32 %v5428_v1, %v5323_v33 }
 0xa5a   : > { %v5639_v59 = vpop.f32.mrf.mxu3  ;;  %v5542_v5 = vpop.f32.mrf.mxu2 }
 0xa5b   : > { %v5659_v19 = vadd.f32 %v5639_v59, %v5545_v23  ;;  %v5753_v34 = vpop.f32.mrf.mxu0 }
 0xa5c   : > { %v5867_v35 = vpop.f32.mrf.mxu1 }
 0xa5d   : > { %v5773_v11 = vadd.f32 %v5753_v34, %v5659_v19 }
 0xa5f   : > { %v5887_v42 = vadd.f32 %v5867_v35, %v5773_v11 }
 0xa62   : > { %v5641_v61 = vpop.f32.mrf.mxu3  ;;  %v5981_v8 = vpop.f32.mrf.mxu2 }
 0xa63   : > { %v5660_v13 = vadd.f32 %v5641_v61, %v5546_v31  ;;  %v5755_v51 = vpop.f32.mrf.mxu0  ;;  %v6001_v17 = vadd.f32 %v5981_v8, %v5887_v42 }
 0xa64   : > { %v5869_v23 = vpop.f32.mrf.mxu1 }
 0xa6a   : > { %v5644_v3 = vpop.f32.mrf.mxu3  ;;  %v5983_v28 = vpop.f32.mrf.mxu2 }
 0xa6b   : > { %v5661_v40 = vadd.f32 %v5644_v3, %v5547_v58  ;;  %v5758_v32 = vpop.f32.mrf.mxu0 }
 0xa6c   : > { %v5872_v38 = vpop.f32.mrf.mxu1 }
 0xa6d   : > { %v5775_v46 = vadd.f32 %v5758_v32, %v5661_v40 }
 0xa6f   : > { %v5889_v60 = vadd.f32 %v5872_v38, %v5775_v46 }
 0xa72   : > { %v5646_v25 = vpop.f32.mrf.mxu3  ;;  %v5986_v55 = vpop.f32.mrf.mxu2 }
 0xa73   : > { %v5662_v15 = vadd.f32 %v5646_v25, %v5548_v39  ;;  %v5760_v31 = vpop.f32.mrf.mxu0  ;;  %v5774_v39 = vadd.f32 %v5755_v51, %v5660_v13  ;;  %v5552_v13 = vadd.f32 %v5542_v5, %v5438_v52  ;;  %v6003_v3 = vadd.f32 %v5986_v55, %v5889_v60 }
 0xa74   : > { %v5874_v16 = vpop.f32.mrf.mxu1 }
 0xa75   : > { %v5776_v63 = vadd.f32 %v5760_v31, %v5662_v15  ;;  %v5888_v22 = vadd.f32 %v5869_v23, %v5774_v39 }
 0xa77   : > { %v6002_v45 = vadd.f32 %v5983_v28, %v5888_v22 }
 0xa7a   : > { %v5649_v9 = vpop.f32.mrf.mxu3  ;;  %v5988_v54 = vpop.f32.mrf.mxu2 }
 0xa7b   : > { %v5663_v41 = vadd.f32 %v5649_v9, %v5549_v21  ;;  %v5763_v62 = vpop.f32.mrf.mxu0  ;;  %v5551_v21 = vadd.f32 %v5540_v24, %v5437_v44 }
 0xa7c   : > { %v5877_v53 = vpop.f32.mrf.mxu1 }
 0xa7d   : > { %v5777_v27 = vadd.f32 %v5763_v62, %v5663_v41 }
 0xa7f   : > { %v5891_v40 = vadd.f32 %v5877_v53, %v5777_v27 }
 0xa82   : > { %v5651_v29 = vpop.f32.mrf.mxu3  ;;  %v5991_v58 = vpop.f32.mrf.mxu2 }
 0xa83   : > { %v5664_v43 = vadd.f32 %v5651_v29, %v5550_v49  ;;  %v5765_v20 = vpop.f32.mrf.mxu0  ;;  %v5890_v49 = vadd.f32 %v5874_v16, %v5776_v63  ;;  %v6005_v41 = vadd.f32 %v5991_v58, %v5891_v40 }
 0xa84   : > { %v5879_v12 = vpop.f32.mrf.mxu1 }
 0xa85   : > { %v5778_v59 = vadd.f32 %v5765_v20, %v5664_v43  ;;  %v6004_v19 = vadd.f32 %v5988_v54, %v5890_v49 }
 0xa87   : > { %v5892_v4 = vadd.f32 %v5879_v12, %v5778_v59 }
 0xa8a   : > { %v5654_v50 = vpop.f32.mrf.mxu3  ;;  %v5993_v47 = vpop.f32.mrf.mxu2 }
 0xa8b   : > { %v5768_v10 = vpop.f32.mrf.mxu0  ;;  %v5665_v6 = vadd.f32 %v5654_v50, %v5551_v21  ;;  %v6006_v29 = vadd.f32 %v5993_v47, %v5892_v4 }
 0xa8c   : > { %v5882_v61 = vpop.f32.mrf.mxu1 }
 0xa8d   : > { %v5779_v25 = vadd.f32 %v5768_v10, %v5665_v6 }
 0xa8f   : > { %v5893_v43 = vadd.f32 %v5882_v61, %v5779_v25 }
 0xa92   : > { %v5656_v30 = vpop.f32.mrf.mxu3  ;;  %v5996_v36 = vpop.f32.mrf.mxu2 }
 0xa93   : > { %v5666_v2 = vadd.f32 %v5656_v30, %v5552_v13  ;;  %v5770_v9 = vpop.f32.mrf.mxu0  ;;  %v6007_v8 = vadd.f32 %v5996_v36, %v5893_v43 }
 0xa94   : > { %v5884_v32 = vpop.f32.mrf.mxu1 }
 0xa95   : > { %v5780_v50 = vadd.f32 %v5770_v9, %v5666_v2 }
 0xa97   : > { %v5894_v55 = vadd.f32 %v5884_v32, %v5780_v50 }
 0xa9a   : > { %v6095_v14 = vpop.f32.mrf.mxu3  ;;  %v5998_v38 = vpop.f32.mrf.mxu2 }
 0xa9b   : > { %v6115_v15 = vadd.f32 %v6095_v14, %v6001_v17  ;;  %v6008_v31 = vadd.f32 %v5998_v38, %v5894_v55 }
 0xaa2   : > { %v6097_v57 = vpop.f32.mrf.mxu3 }
 0xaa3   : > { %v6116_v37 = vadd.f32 %v6097_v57, %v6002_v45 }
 0xaa5   : > { %v6123_v1 = vadd.f32 %v6116_v37, %v6115_v15 }
 0xaaa   : > { %v6100_v7 = vpop.f32.mrf.mxu3 }
 0xaab   : > { %v6117_v24 = vadd.f32 %v6100_v7, %v6003_v3 }
 0xaad   : > { %v6124_v51 = vadd.f32 %v6123_v1, %v6117_v24 }
 0xab2   : > { %v6102_v56 = vpop.f32.mrf.mxu3 }
 0xab3   : > { %v6118_v34 = vadd.f32 %v6102_v56, %v6004_v19 }
 0xab5   : > { %v6125_v23 = vadd.f32 %v6124_v51, %v6118_v34 }
 0xaba   : > { %v6105_v26 = vpop.f32.mrf.mxu3 }
 0xabb   : > { %v6119_v5 = vadd.f32 %v6105_v26, %v6005_v41 }
 0xabd   : > { %v6126_v30 = vadd.f32 %v6125_v23, %v6119_v5 }
 0xac2   : > { %v6107_v18 = vpop.f32.mrf.mxu3 }
 0xac3   : > { %v6120_v28 = vadd.f32 %v6107_v18, %v6006_v29 }
 0xac5   : > { %v6127_v57 = vadd.f32 %v6126_v30, %v6120_v28  ;;  %v8125_v30 = vld [vmem:[%s10650_s11] ss:$0 sm:$0xff] }
 0xaca   : > { %v6110_v35 = vpop.f32.mrf.mxu3 }
 0xacb   : > { %v6121_v14 = vadd.f32 %v6110_v35, %v6007_v8 }
 0xacd   : > { %v6128_v54 = vadd.f32 %v6127_v57, %v6121_v14 }
 0xad2   : > { %v6112_v16 = vpop.f32.mrf.mxu3 }
 0xad3   : > { %v6122_v62 = vadd.f32 %v6112_v16, %v6008_v31 }
 0xad5   : > { %v6129_v7 = vadd.f32 %v6128_v54, %v6122_v62 }
 0xad7   : > { %6130 = vadd.xlane.f32.xlu0 %v6129_v7 }
 0xb4a   : > { %v6131_v53 = vpop.xlane.xlu0 %6130 }
 0xb4b   : > { %v6132_v58 = vrot.slane %v6131_v53, 4 }
 0xb4d   : > { %v6133_v56 = vadd.f32 %v6132_v58, %v6131_v53 }
 0xb4f   : > { %v6134_v20 = vrot.slane %v6133_v56, 2 }
 0xb51   : > { %v6135_v12 = vadd.f32 %v6134_v20, %v6133_v56 }
 0xb53   : > { %v6136_v47 = vrot.slane %v6135_v12, 1 }
 0xb55   : > { %v6137_v26 = vadd.f32 %v6136_v47, %v6135_v12 }
 0xb57   : > { %8083 = vpush %v6137_v26 }
 0xb88   : > { %s8084_s27 = spop %8083 }
 0xb89   : > { %v6139_v0 = vstv %s8084_s27  ;;  %s515_s27 = scalar_lea.vmem %s10653_s14, %s7782_s28 }
 0xb8a   : > { %v6140_v39 = vmul.f32 0.001953125, %v6139_v0  ;;  %v8127_v0 = vld [vmem:[%s510_s21] ss:$0 sm:$0xff] }
 0xb8c   : > { %v6141_v33 = vsub.f32 %v6115_v15, %v6140_v39  ;;  %v6142_v10 = vsub.f32 %v6116_v37, %v6140_v39  ;;  %v6143_v44 = vsub.f32 %v6117_v24, %v6140_v39  ;;  %v6144_v11 = vsub.f32 %v6118_v34, %v6140_v39 }
 0xb8d   : > { %v6145_v46 = vsub.f32 %v6119_v5, %v6140_v39  ;;  %v6146_v52 = vsub.f32 %v6120_v28, %v6140_v39  ;;  %v6147_v45 = vsub.f32 %v6121_v14, %v6140_v39  ;;  %v6148_v59 = vsub.f32 %v6122_v62, %v6140_v39  ;;  %v8126_v62 = vld [vmem:[%s10651_s12] ss:$0 sm:$0xff] }
 0xb8e   : > { %v6149_v63 = vmul.f32 %v10068_v48, %v6141_v33  ;;  %v6150_v21 = vmul.f32 %v10068_v48, %v6142_v10  ;;  %v6151_v22 = vmul.f32 %v10068_v48, %v6143_v44  ;;  %v6152_v27 = vmul.f32 %v10068_v48, %v6144_v11 }
 0xb8f   : > { %v6153_v60 = vmul.f32 %v10068_v48, %v6145_v46  ;;  %v6154_v61 = vmul.f32 %v10068_v48, %v6146_v52  ;;  %v6155_v17 = vmul.f32 %v10068_v48, %v6147_v45  ;;  %v6156_v19 = vmul.f32 %v10068_v48, %v6148_v59 }
 0xb90   : > { %v6157_v18 = vmul.f32 %v6149_v63, %v6149_v63  ;;  %v6158_v42 = vmul.f32 %v6150_v21, %v6150_v21  ;;  %v6159_v6 = vmul.f32 %v6151_v22, %v6151_v22  ;;  %v6160_v36 = vmul.f32 %v6152_v27, %v6152_v27 }
 0xb91   : > { %v6161_v3 = vmul.f32 %v6153_v60, %v6153_v60  ;;  %v6162_v40 = vmul.f32 %v6154_v61, %v6154_v61  ;;  %v6163_v2 = vmul.f32 %v6155_v17, %v6155_v17  ;;  %v6164_v24 = vmul.f32 %v6156_v19, %v6156_v19 }
 0xb92   : > { %v6165_v49 = vadd.f32 %v6158_v42, %v6157_v18 }
 0xb94   : > { %v6166_v13 = vadd.f32 %v6165_v49, %v6159_v6 }
 0xb96   : > { %v6167_v37 = vadd.f32 %v6166_v13, %v6160_v36 }
 0xb98   : > { %v6168_v25 = vadd.f32 %v6167_v37, %v6161_v3 }
 0xb9a   : > { %v6169_v15 = vadd.f32 %v6168_v25, %v6162_v40 }
 0xb9c   : > { %v6170_v4 = vadd.f32 %v6169_v15, %v6163_v2 }
 0xb9e   : > { %v6171_v9 = vadd.f32 %v6170_v4, %v6164_v24 }
 0xba0   : > { %6172 = vadd.xlane.f32.xlu1 %v6171_v9 }
 0xc13   : > { %v6173_v41 = vpop.xlane.xlu1 %6172 }
 0xc14   : > { %v6174_v1 = vrot.slane %v6173_v41, 4 }
 0xc16   : > { %v6175_v34 = vadd.f32 %v6174_v1, %v6173_v41 }
 0xc18   : > { %v6176_v29 = vrot.slane %v6175_v34, 2 }
 0xc1a   : > { %v6177_v35 = vadd.f32 %v6176_v29, %v6175_v34 }
 0xc1c   : > { %v6178_v43 = vrot.slane %v6177_v35, 1 }
 0xc1e   : > { %v6179_v50 = vadd.f32 %v6178_v43, %v6177_v35 }
 0xc20   : > { %8085 = vpush %v6179_v50 }
 0xc51   : > { %s8086_s22 = spop %8085 }
 0xc52   : > { %v6181_v48 = vstv %s8086_s22 }
 0xc53   : > { %v6182_v51 = vmul.f32 0.001953125, %v6181_v48 }
 0xc55   : > { %v6183_v5 = vadd.f32 1e-05, %v6182_v51 }
 0xc57   : > { %8182 = vrsqrt.f32 %v6183_v5  ;;  %vm6190_vm12 = vweird.f32 %v6183_v5 }
 0xc5d   : > { %v8183_v8 = vpop.eup %8182 }
 0xc5e   : > { %v6185_v23 = vmul.f32 %v8183_v8, %v6183_v5  ;;  %vm6191_vm11 = vweird.f32 %v8183_v8 }
 0xc5f   : > { %vm6192_vm13 = vmor %vm6190_vm12, %vm6191_vm11 }
 0xc60   : > { %v6186_v28 = vmul.f32 %v8183_v8, %v6185_v23 }
 0xc62   : > { %v6187_v32 = vmul.f32 0.5, %v6186_v28 }
 0xc64   : > { %v6188_v38 = vsub.f32 1.5, %v6187_v32 }
 0xc66   : > { %v6189_v55 = vmul.f32 %v8183_v8, %v6188_v38 }
 0xc68   : > { %v6193_v14 = vsel %vm6192_vm13, %v8183_v8, %v6189_v55 }
 0xc69   : > { %v6194_v31 = vmul.f32 %v6193_v14, %v6141_v33  ;;  %v6195_v57 = vmul.f32 %v6193_v14, %v6142_v10  ;;  %v6196_v16 = vmul.f32 %v6193_v14, %v6143_v44  ;;  %v6197_v54 = vmul.f32 %v6193_v14, %v6144_v11 }
 0xc6a   : > { %v6198_v7 = vmul.f32 %v6193_v14, %v6145_v46  ;;  %v6199_v53 = vmul.f32 %v6193_v14, %v6146_v52  ;;  %v6200_v58 = vmul.f32 %v6193_v14, %v6147_v45  ;;  %v6201_v56 = vmul.f32 %v6193_v14, %v6148_v59 }
 0xc6b   : > { %v6206_v20 = vmul.f32 %v8125_v30, %v6194_v31  ;;  %v6207_v12 = vmul.f32 %v8125_v30, %v6195_v57  ;;  %v6208_v47 = vmul.f32 %v8125_v30, %v6196_v16  ;;  %v6209_v26 = vmul.f32 %v8125_v30, %v6197_v54 }
 0xc6c   : > { %v6210_v39 = vmul.f32 %v8125_v30, %v6198_v7  ;;  %v6211_v33 = vmul.f32 %v8125_v30, %v6199_v53  ;;  %v6212_v10 = vmul.f32 %v8125_v30, %v6200_v58  ;;  %v6213_v44 = vmul.f32 %v8125_v30, %v6201_v56 }
 0xc6d   : > { %v6218_v11 = vadd.f32 %v8126_v62, %v6206_v20  ;;  %v6219_v63 = vadd.f32 %v8126_v62, %v6207_v12  ;;  %v6220_v46 = vadd.f32 %v8126_v62, %v6208_v47  ;;  %v6221_v21 = vadd.f32 %v8126_v62, %v6209_v26 }
 0xc6e   : > { %v6222_v22 = vadd.f32 %v8126_v62, %v6210_v39  ;;  %v6223_v52 = vadd.f32 %v8126_v62, %v6211_v33  ;;  %v6224_v27 = vadd.f32 %v8126_v62, %v6212_v10  ;;  %v6225_v60 = vadd.f32 %v8126_v62, %v6213_v44 }
 0xc6f   : > { %v6230_v18 = vadd.f32 %v8127_v0, %v6218_v11  ;;  %v6231_v42 = vadd.f32 %v8127_v0, %v6219_v63  ;;  %v6232_v45 = vadd.f32 %v8127_v0, %v6220_v46  ;;  %v6233_v6 = vadd.f32 %v8127_v0, %v6221_v21 }
 0xc70   : > { %v6234_v49 = vadd.f32 %v8127_v0, %v6222_v22  ;;  %v6235_v59 = vadd.f32 %v8127_v0, %v6223_v52  ;;  %v6236_v61 = vadd.f32 %v8127_v0, %v6224_v27  ;;  %v6237_v36 = vadd.f32 %v8127_v0, %v6225_v60 }
 0xc71   : > { %6238 = vst [vmem:[%s515_s27] sm:$0xff] %v6230_v18 }
 0xc72   : > { %6239 = vst [vmem:[%s515_s27 + $0x8] sm:$0xff] %v6231_v42 }
 0xc73   : > { %6240 = vst [vmem:[%s515_s27 + $0x10] sm:$0xff] %v6232_v45 }
 0xc74   : > { %6241 = vst [vmem:[%s515_s27 + $0x18] sm:$0xff] %v6233_v6 }
 0xc75   : > { %6242 = vst [vmem:[%s515_s27 + $0x20] sm:$0xff] %v6234_v49 }
 0xc76   : > { %6243 = vst [vmem:[%s515_s27 + $0x28] sm:$0xff] %v6235_v59 }
 0xc77   : > { %6244 = vst [vmem:[%s515_s27 + $0x30] sm:$0xff] %v6236_v61 }
 0xc78   : > { %6245 = vst [vmem:[%s515_s27 + $0x38] sm:$0xff] %v6237_v36 }
 0xc79 PF: > { %s26_s29 = sadd.s32 1, %s8262_s29  }
 0xc7a   : > { %p23_p7 = scmp.ge.s32.totalorder %s26_s29, 4  }
 0xc7c   :  { %25 = sbr.rel (!%p23_p7) target bundleno = 2 (0x2), region = 152 }
 0xc81   :  { %6267 = vsyncpa [#allocation4], 1 }
 0xc82   :  { %6269 = vsyncpa [#allocation4 + $0x1], 1 }
 0xc83   :  { %6270 = vsyncpa [#allocation6], 1 }

</bundles_post_ra>
